<compile_context>
chip_gen: v6e
topology: v6e:2x2x1
jax: 0.10.0
libtpu: 0.0.40
codegen_flags: <defaults>
</compile_context>

<pallas_src>
import math

import jax
import jax.numpy as jnp
import numpy as np
from jax.experimental import pallas as pl
from jax.experimental.pallas import tpu as pltpu


def _make_lstm_kernel(H, T, S, hseq_2d, needs_mask):
    """Builds the time-block kernel.  H, T, S are compile-time constants;
    hseq_2d / needs_mask select the store layout and tail masking at trace time."""

    def kernel(x_ref, wx_ref, wh_ref, b_ref, hseq_ref, h_ref, c_ref):
        tb = pl.program_id(1)  # time-block index (inner, sequential axis)

        # init_states is None in the reference forward -> zeros at the first block.
        @pl.when(tb == 0)
        def _():
            h_ref[...] = jnp.zeros_like(h_ref)
            c_ref[...] = jnp.zeros_like(c_ref)

        B = x_ref.shape[0]
        G = 4 * H

        # Input projection for the whole time block: one (B*T, I)@(I, 4H) MXU GEMM
        # hoisted off the sequential chain (bias added once here).
        x_blk = x_ref[...]
        xp = (
            jnp.dot(
                x_blk.reshape(B * T, x_blk.shape[-1]),
                wx_ref[...],
                preferred_element_type=jnp.float32,
            )
            + b_ref[...]
        ).reshape(B, T, G)

        wh = wh_ref[...]
        h = h_ref[...]
        c = c_ref[...]

        # T is a small compile-time constant: unroll so the per-step critical path
        # is one (B,H)@(H,4H) dot plus elementwise work.  Each step's h is stored
        # immediately (cheap store off the serial chain, no live stack of tiles).
        for tau in range(T):
            gates = xp[:, tau, :] + jnp.dot(
                h, wh, preferred_element_type=jnp.float32
            )
            # Gate layout is [i | f | o | g]: one sigmoid slab + one tanh slab.
            sig = jax.nn.sigmoid(gates[:, : 3 * H])
            g_t = jnp.tanh(gates[:, 3 * H :])
            i_t = sig[:, :H]
            f_t = sig[:, H : 2 * H]
            o_t = sig[:, 2 * H :]
            c_new = f_t * c + i_t * g_t
            h_new = o_t * jnp.tanh(c_new)

            if needs_mask:
                # Freeze the carry on zero-padded tail timesteps (t >= S).
                valid = (tb * T + tau) < S
                c = jnp.where(valid, c_new, c)
                h = jnp.where(valid, h_new, h)
            else:
                c, h = c_new, h_new

            if hseq_2d:
                hseq_ref[:, tau * H : (tau + 1) * H] = h
            else:
                hseq_ref[:, tau, :] = h

        h_ref[...] = h
        c_ref[...] = c

    return kernel


def _pick_time_block(seq_len, cap=32):
    """Returns (T, padded_seq_len).  Prefers an exact multiple-of-8 divisor of
    seq_len up to `cap`; otherwise pads the sequence to a multiple of `cap`."""
    if seq_len <= cap:
        return seq_len, seq_len
    for t in range(cap, 7, -1):
        if t % 8 == 0 and seq_len % t == 0:
            return t, seq_len
    t = cap
    return t, pl.cdiv(seq_len, t) * t


def single_layer_lstm_forward(x, params, *, time_block_cap=32):
    """x: (batch, seq, input_size) float32.  Returns (hidden_seq, (h_t, c_t)),
    matching the PyTorch module's forward with init_states=None."""
    x = jnp.asarray(x, jnp.float32)
    B, S, I = x.shape
    H = params["W_hi"].shape[0]
    G = 4 * H

    # Fused gate weights / bias in [i | f | o | g] order (sigmoid slab first).
    wx = jnp.concatenate(
        [params["W_ii"], params["W_if"], params["W_io"], params["W_ig"]], axis=1
    ).astype(jnp.float32)
    wh = jnp.concatenate(
        [params["W_hi"], params["W_hf"], params["W_ho"], params["W_hg"]], axis=1
    ).astype(jnp.float32)
    b = (
        jnp.concatenate(
            [params["b_i"], params["b_f"], params["b_o"], params["b_g"]]
        )
        .reshape(1, G)
        .astype(jnp.float32)
    )
    # TODO(synk): bf16 weight cast for v6e/v7x production (kept f32 for exactness).

    T, S_pad = _pick_time_block(S, time_block_cap)
    nb = S_pad // T
    if S_pad != S:
        x = jnp.pad(x, ((0, 0), (0, S_pad - S), (0, 0)))

    # Batch-parallel leading grid axis: v7x's two TensorCores split the batch
    # (each core keeps >= 8 f32 sublanes).  No-op for small B / single-TC chips.
    n_batch_blocks = 2 if (B % 16 == 0) else 1
    Bb = B // n_batch_blocks

    # Lane-dense hidden_seq: write through a (B, S_pad*H) view (identical
    # row-major memory to (B, S_pad, H)) whenever the block shape stays legal.
    hseq_2d = (nb == 1) or ((T * H) % 128 == 0)

    kernel = _make_lstm_kernel(
        H=H, T=T, S=S, hseq_2d=hseq_2d, needs_mask=(S_pad != S)
    )

    if hseq_2d:
        hseq_shape = jax.ShapeDtypeStruct((B, S_pad * H), jnp.float32)
        hseq_spec = pl.BlockSpec((Bb, T * H), lambda bb, tb: (bb, tb))
    else:
        hseq_shape = jax.ShapeDtypeStruct((B, S_pad, H), jnp.float32)
        hseq_spec = pl.BlockSpec((Bb, T, H), lambda bb, tb: (bb, tb, 0))

    # Explicit scoped-VMEM budget: weights single-buffered, x/hseq double-buffered,
    # xp temporary, 2x headroom.  Don't rely on the 16/32 MiB default scoped limit.
    lane = lambda n: ((n + 127) // 128) * 128
    est = 4 * (
        lane(G) * (I + H + 1)
        + 2 * Bb * T * lane(I)
        + 2 * Bb * lane(T * H)
        + 4 * Bb * lane(H)
        + Bb * T * lane(G)
    )
    vmem_limit = int(min(120 * 2**20, max(32 * 2**20, 2 * est)))

    def _call(single_buffer_weights):
        def const_spec(shape):
            n = len(shape)
            index_map = lambda bb, tb, _n=n: (0,) * _n
            if single_buffer_weights:
                # Grid-constant blocks: double-buffering them is pure VMEM waste.
                return pl.BlockSpec(shape, index_map, pipeline_mode=pl.Buffered(1))
            return pl.BlockSpec(shape, index_map)

        return pl.pallas_call(
            kernel,
            out_shape=(
                hseq_shape,
                jax.ShapeDtypeStruct((B, H), jnp.float32),  # h_t
                jax.ShapeDtypeStruct((B, H), jnp.float32),  # c_t
            ),
            grid_spec=pltpu.PrefetchScalarGridSpec(
                num_scalar_prefetch=0,
                grid=(n_batch_blocks, nb),
                in_specs=[
                    pl.BlockSpec((Bb, T, I), lambda bb, tb: (bb, tb, 0)),  # x
                    const_spec((I, G)),   # fused W_x
                    const_spec((H, G)),   # fused W_h
                    const_spec((1, G)),   # fused bias
                ],
                out_specs=(
                    hseq_spec,                                      # hidden_seq
                    pl.BlockSpec((Bb, H), lambda bb, tb: (bb, 0)),  # h_t (resident)
                    pl.BlockSpec((Bb, H), lambda bb, tb: (bb, 0)),  # c_t (resident)
                ),
            ),
            compiler_params=pltpu.CompilerParams(
                dimension_semantics=("parallel", "arbitrary"),
                vmem_limit_bytes=vmem_limit,
            ),
        )(x, wx, wh, b)

    try:
        hseq, h_t, c_t = _call(True)
    except Exception:
        # Fallback if pipeline_mode=pl.Buffered(1) is unsupported in this jax build.
        hseq, h_t, c_t = _call(False)

    hidden_seq = hseq.reshape(B, S_pad, H) if hseq_2d else hseq
    if S_pad != S:
        hidden_seq = hidden_seq[:, :S, :]
    return hidden_seq, (h_t, c_t)


def _reference_forward(x, params):
    """Pure-JAX reference mirroring the PyTorch loop."""
    B, S, I = x.shape
    H = params["W_hi"].shape[0]
    h = jnp.zeros((B, H), jnp.float32)
    c = jnp.zeros((B, H), jnp.float32)
    hs = []
    for t in range(S):
        x_t = x[:, t, :]
        i_t = jax.nn.sigmoid(x_t @ params["W_ii"] + h @ params["W_hi"] + params["b_i"])
        f_t = jax.nn.sigmoid(x_t @ params["W_if"] + h @ params["W_hf"] + params["b_f"])
        g_t = jnp.tanh(x_t @ params["W_ig"] + h @ params["W_hg"] + params["b_g"])
        o_t = jax.nn.sigmoid(x_t @ params["W_io"] + h @ params["W_ho"] + params["b_o"])
        c = f_t * c + i_t * g_t
        h = o_t * jnp.tanh(c)
        hs.append(h)
    return jnp.stack(hs, axis=1), (h, c)


def init_params(key, input_size, hidden_size):
    stdv = 1.0 / math.sqrt(hidden_size)
    names_shapes = []
    for g in ("i", "f", "g", "o"):
        names_shapes += [
            (f"W_i{g}", (input_size, hidden_size)),
            (f"W_h{g}", (hidden_size, hidden_size)),
            (f"b_{g}", (hidden_size,)),
        ]
    keys = jax.random.split(key, len(names_shapes))
    params = {}
    for (name, shape), k in zip(names_shapes, keys):
        params[name] = jax.random.uniform(
            k, shape, dtype=jnp.float32, minval=-stdv, maxval=stdv
        )
    return params


if __name__ == "__main__":
    B, S, I, H = 8, 8, 16, 32
    key = jax.random.PRNGKey(0)
    k_x, k_p = jax.random.split(key)
    x = jax.random.normal(k_x, (B, S, I), dtype=jnp.float32)
    params = init_params(k_p, I, H)

    hidden_seq, (h_t, c_t) = jax.block_until_ready(
        single_layer_lstm_forward(x, params)
    )

    ref_seq, (ref_h, ref_c) = _reference_forward(x, params)
    assert hidden_seq.shape == (B, S, H)
    assert h_t.shape == (B, H) and c_t.shape == (B, H)
    np.testing.assert_allclose(np.asarray(hidden_seq), np.asarray(ref_seq),
                               rtol=1e-5, atol=1e-5)
    np.testing.assert_allclose(np.asarray(h_t), np.asarray(ref_h),
                               rtol=1e-5, atol=1e-5)
    np.testing.assert_allclose(np.asarray(c_t), np.asarray(ref_c),
                               rtol=1e-5, atol=1e-5)

    print("KERNEL_OK")
</pallas_src>

<mosaic_0001>
module attributes {stable_mosaic.version = 11 : i64} {
  func.func @kernel(%arg0: i32, %arg1: i32, %arg2: memref<8x8x16xf32, #tpu.memory_space<vmem>>, %arg3: memref<16x128xf32, #tpu.memory_space<vmem>>, %arg4: memref<32x128xf32, #tpu.memory_space<vmem>>, %arg5: memref<1x128xf32, #tpu.memory_space<vmem>>, %arg6: memref<8x256xf32, #tpu.memory_space<vmem>>, %arg7: memref<8x32xf32, #tpu.memory_space<vmem>>, %arg8: memref<8x32xf32, #tpu.memory_space<vmem>>) attributes {dimension_semantics = [#tpu.dimension_semantics<parallel>, #tpu.dimension_semantics<arbitrary>], iteration_bounds = array<i64: 1, 1>, scalar_prefetch = 0 : i64, scratch_operands = 0 : i64, tpu.core_type = #tpu.core_type<tc>, window_params = [{transform_indices = @transform_0, window_bounds = array<i64: 8, 8, 16>}, {pipeline_mode = #tpu.pipeline_mode<synchronous>, transform_indices = @transform_1, window_bounds = array<i64: 16, 128>}, {pipeline_mode = #tpu.pipeline_mode<synchronous>, transform_indices = @transform_2, window_bounds = array<i64: 32, 128>}, {pipeline_mode = #tpu.pipeline_mode<synchronous>, transform_indices = @transform_3, window_bounds = array<i64: 1, 128>}, {transform_indices = @transform_4, window_bounds = array<i64: 8, 256>}, {transform_indices = @transform_5, window_bounds = array<i64: 8, 32>}, {transform_indices = @transform_6, window_bounds = array<i64: 8, 32>}]} {
    %c0_i32 = arith.constant 0 : i32
    %0 = arith.cmpi eq, %arg1, %c0_i32 : i32
    %1 = arith.extui %0 : i1 to i32
    %c0_i32_0 = arith.constant 0 : i32
    %2 = arith.cmpi ne, %1, %c0_i32_0 : i32
    scf.if %2 {
      %cst_42 = arith.constant 0.000000e+00 : f32
      %184 = vector.broadcast %cst_42 : f32 to vector<8x32xf32>
      %c0_43 = arith.constant 0 : index
      %c0_44 = arith.constant 0 : index
      %185 = vector.load %arg7[%c0_43, %c0_44] : memref<8x32xf32, #tpu.memory_space<vmem>>, vector<8x32xf32>
      tpu.vector_store %arg7[%c0_43, %c0_44], %184 {strides = array<i32>} : memref<8x32xf32, #tpu.memory_space<vmem>>, vector<8x32xf32>,
      %cst_45 = arith.constant 0.000000e+00 : f32
      %186 = vector.broadcast %cst_45 : f32 to vector<8x32xf32>
      %c0_46 = arith.constant 0 : index
      %c0_47 = arith.constant 0 : index
      %187 = vector.load %arg8[%c0_46, %c0_47] : memref<8x32xf32, #tpu.memory_space<vmem>>, vector<8x32xf32>
      tpu.vector_store %arg8[%c0_46, %c0_47], %186 {strides = array<i32>} : memref<8x32xf32, #tpu.memory_space<vmem>>, vector<8x32xf32>,
    } else {
    }
    %c0 = arith.constant 0 : index
    %c0_1 = arith.constant 0 : index
    %c0_2 = arith.constant 0 : index
    %3 = vector.load %arg2[%c0, %c0_1, %c0_2] : memref<8x8x16xf32, #tpu.memory_space<vmem>>, vector<8x8x16xf32>
    %4 = vector.shape_cast %3 : vector<8x8x16xf32> to vector<64x16xf32>
    %c0_3 = arith.constant 0 : index
    %c0_4 = arith.constant 0 : index
    %5 = vector.load %arg3[%c0_3, %c0_4] : memref<16x128xf32, #tpu.memory_space<vmem>>, vector<16x128xf32>
    %cst = arith.constant dense<0.000000e+00> : vector<64x128xf32>
    %6 = tpu.matmul %4, %5, %cst {dimension_numbers = #tpu.dot_dimension_numbers<[1], [0], [0], [1], [0, 0, 1, 1], [], []>} : vector<64x16xf32>, vector<16x128xf32>, vector<64x128xf32> -> vector<64x128xf32>
    %c0_5 = arith.constant 0 : index
    %c0_6 = arith.constant 0 : index
    %7 = vector.load %arg5[%c0_5, %c0_6] : memref<1x128xf32, #tpu.memory_space<vmem>>, vector<1x128xf32>
    %8 = vector.broadcast %7 : vector<1x128xf32> to vector<64x128xf32>
    %9 = arith.addf %6, %8 : vector<64x128xf32>
    %10 = vector.shape_cast %9 : vector<64x128xf32> to vector<8x8x128xf32>
    %c0_7 = arith.constant 0 : index
    %c0_8 = arith.constant 0 : index
    %11 = vector.load %arg4[%c0_7, %c0_8] : memref<32x128xf32, #tpu.memory_space<vmem>>, vector<32x128xf32>
    %c0_9 = arith.constant 0 : index
    %c0_10 = arith.constant 0 : index
    %12 = vector.load %arg7[%c0_9, %c0_10] : memref<8x32xf32, #tpu.memory_space<vmem>>, vector<8x32xf32>
    %c0_11 = arith.constant 0 : index
    %c0_12 = arith.constant 0 : index
    %13 = vector.load %arg8[%c0_11, %c0_12] : memref<8x32xf32, #tpu.memory_space<vmem>>, vector<8x32xf32>
    %14 = vector.extract_strided_slice %10 {offsets = [0, 0, 0], sizes = [8, 1, 128], strides = [1, 1, 1]} : vector<8x8x128xf32> to vector<8x1x128xf32>
    %15 = vector.shape_cast %14 : vector<8x1x128xf32> to vector<8x128xf32>
    %cst_13 = arith.constant dense<0.000000e+00> : vector<8x128xf32>
    %16 = tpu.matmul %12, %11, %cst_13 {dimension_numbers = #tpu.dot_dimension_numbers<[1], [0], [0], [1], [0, 0, 1, 1], [], []>} : vector<8x32xf32>, vector<32x128xf32>, vector<8x128xf32> -> vector<8x128xf32>
    %17 = arith.addf %15, %16 : vector<8x128xf32>
    %18 = vector.extract_strided_slice %17 {offsets = [0, 0], sizes = [8, 96], strides = [1, 1]} : vector<8x128xf32> to vector<8x96xf32>
    %19 = arith.negf %18 : vector<8x96xf32>
    %20 = math.exp %19 : vector<8x96xf32>
    %cst_14 = arith.constant 1.000000e+00 : f32
    %21 = vector.broadcast %cst_14 : f32 to vector<8x96xf32>
    %22 = arith.addf %21, %20 : vector<8x96xf32>
    %23 = arith.divf %21, %22 : vector<8x96xf32>
    %24 = vector.extract_strided_slice %17 {offsets = [0, 96], sizes = [8, 32], strides = [1, 1]} : vector<8x128xf32> to vector<8x32xf32>
    %25 = math.tanh %24 : vector<8x32xf32>
    %26 = vector.extract_strided_slice %23 {offsets = [0, 0], sizes = [8, 32], strides = [1, 1]} : vector<8x96xf32> to vector<8x32xf32>
    %27 = vector.extract_strided_slice %23 {offsets = [0, 32], sizes = [8, 32], strides = [1, 1]} : vector<8x96xf32> to vector<8x32xf32>
    %28 = vector.extract_strided_slice %23 {offsets = [0, 64], sizes = [8, 32], strides = [1, 1]} : vector<8x96xf32> to vector<8x32xf32>
    %29 = arith.mulf %27, %13 : vector<8x32xf32>
    %30 = arith.mulf %26, %25 : vector<8x32xf32>
    %31 = arith.addf %29, %30 : vector<8x32xf32>
    %32 = math.tanh %31 : vector<8x32xf32>
    %33 = arith.mulf %28, %32 : vector<8x32xf32>
    %c0_15 = arith.constant 0 : index
    %c0_16 = arith.constant 0 : index
    %34 = vector.load %arg6[%c0_15, %c0_16] : memref<8x256xf32, #tpu.memory_space<vmem>>, vector<8x32xf32>
    tpu.vector_store %arg6[%c0_15, %c0_16], %33 {strides = array<i32>} : memref<8x256xf32, #tpu.memory_space<vmem>>, vector<8x32xf32>,
    %35 = vector.extract_strided_slice %10 {offsets = [0, 1, 0], sizes = [8, 1, 128], strides = [1, 1, 1]} : vector<8x8x128xf32> to vector<8x1x128xf32>
    %36 = vector.shape_cast %35 : vector<8x1x128xf32> to vector<8x128xf32>
    %cst_17 = arith.constant dense<0.000000e+00> : vector<8x128xf32>
    %37 = tpu.matmul %33, %11, %cst_17 {dimension_numbers = #tpu.dot_dimension_numbers<[1], [0], [0], [1], [0, 0, 1, 1], [], []>} : vector<8x32xf32>, vector<32x128xf32>, vector<8x128xf32> -> vector<8x128xf32>
    %38 = arith.addf %36, %37 : vector<8x128xf32>
    %39 = vector.extract_strided_slice %38 {offsets = [0, 0], sizes = [8, 96], strides = [1, 1]} : vector<8x128xf32> to vector<8x96xf32>
    %40 = arith.negf %39 : vector<8x96xf32>
    %41 = math.exp %40 : vector<8x96xf32>
    %cst_18 = arith.constant 1.000000e+00 : f32
    %42 = vector.broadcast %cst_18 : f32 to vector<8x96xf32>
    %43 = arith.addf %42, %41 : vector<8x96xf32>
    %44 = arith.divf %42, %43 : vector<8x96xf32>
    %45 = vector.extract_strided_slice %38 {offsets = [0, 96], sizes = [8, 32], strides = [1, 1]} : vector<8x128xf32> to vector<8x32xf32>
    %46 = math.tanh %45 : vector<8x32xf32>
    %47 = vector.extract_strided_slice %44 {offsets = [0, 0], sizes = [8, 32], strides = [1, 1]} : vector<8x96xf32> to vector<8x32xf32>
    %48 = vector.extract_strided_slice %44 {offsets = [0, 32], sizes = [8, 32], strides = [1, 1]} : vector<8x96xf32> to vector<8x32xf32>
    %49 = vector.extract_strided_slice %44 {offsets = [0, 64], sizes = [8, 32], strides = [1, 1]} : vector<8x96xf32> to vector<8x32xf32>
    %50 = arith.mulf %48, %31 : vector<8x32xf32>
    %51 = arith.mulf %47, %46 : vector<8x32xf32>
    %52 = arith.addf %50, %51 : vector<8x32xf32>
    %53 = math.tanh %52 : vector<8x32xf32>
    %54 = arith.mulf %49, %53 : vector<8x32xf32>
    %c0_19 = arith.constant 0 : index
    %c32 = arith.constant 32 : index
    %55 = vector.load %arg6[%c0_19, %c32] : memref<8x256xf32, #tpu.memory_space<vmem>>, vector<8x32xf32>
    tpu.vector_store %arg6[%c0_19, %c32], %54 {strides = array<i32>} : memref<8x256xf32, #tpu.memory_space<vmem>>, vector<8x32xf32>,
    %56 = vector.extract_strided_slice %10 {offsets = [0, 2, 0], sizes = [8, 1, 128], strides = [1, 1, 1]} : vector<8x8x128xf32> to vector<8x1x128xf32>
    %57 = vector.shape_cast %56 : vector<8x1x128xf32> to vector<8x128xf32>
    %cst_20 = arith.constant dense<0.000000e+00> : vector<8x128xf32>
    %58 = tpu.matmul %54, %11, %cst_20 {dimension_numbers = #tpu.dot_dimension_numbers<[1], [0], [0], [1], [0, 0, 1, 1], [], []>} : vector<8x32xf32>, vector<32x128xf32>, vector<8x128xf32> -> vector<8x128xf32>
    %59 = arith.addf %57, %58 : vector<8x128xf32>
    %60 = vector.extract_strided_slice %59 {offsets = [0, 0], sizes = [8, 96], strides = [1, 1]} : vector<8x128xf32> to vector<8x96xf32>
    %61 = arith.negf %60 : vector<8x96xf32>
    %62 = math.exp %61 : vector<8x96xf32>
    %cst_21 = arith.constant 1.000000e+00 : f32
    %63 = vector.broadcast %cst_21 : f32 to vector<8x96xf32>
    %64 = arith.addf %63, %62 : vector<8x96xf32>
    %65 = arith.divf %63, %64 : vector<8x96xf32>
    %66 = vector.extract_strided_slice %59 {offsets = [0, 96], sizes = [8, 32], strides = [1, 1]} : vector<8x128xf32> to vector<8x32xf32>
    %67 = math.tanh %66 : vector<8x32xf32>
    %68 = vector.extract_strided_slice %65 {offsets = [0, 0], sizes = [8, 32], strides = [1, 1]} : vector<8x96xf32> to vector<8x32xf32>
    %69 = vector.extract_strided_slice %65 {offsets = [0, 32], sizes = [8, 32], strides = [1, 1]} : vector<8x96xf32> to vector<8x32xf32>
    %70 = vector.extract_strided_slice %65 {offsets = [0, 64], sizes = [8, 32], strides = [1, 1]} : vector<8x96xf32> to vector<8x32xf32>
    %71 = arith.mulf %69, %52 : vector<8x32xf32>
    %72 = arith.mulf %68, %67 : vector<8x32xf32>
    %73 = arith.addf %71, %72 : vector<8x32xf32>
    %74 = math.tanh %73 : vector<8x32xf32>
    %75 = arith.mulf %70, %74 : vector<8x32xf32>
    %c0_22 = arith.constant 0 : index
    %c64 = arith.constant 64 : index
    %76 = vector.load %arg6[%c0_22, %c64] : memref<8x256xf32, #tpu.memory_space<vmem>>, vector<8x32xf32>
    tpu.vector_store %arg6[%c0_22, %c64], %75 {strides = array<i32>} : memref<8x256xf32, #tpu.memory_space<vmem>>, vector<8x32xf32>,
    %77 = vector.extract_strided_slice %10 {offsets = [0, 3, 0], sizes = [8, 1, 128], strides = [1, 1, 1]} : vector<8x8x128xf32> to vector<8x1x128xf32>
    %78 = vector.shape_cast %77 : vector<8x1x128xf32> to vector<8x128xf32>
    %cst_23 = arith.constant dense<0.000000e+00> : vector<8x128xf32>
    %79 = tpu.matmul %75, %11, %cst_23 {dimension_numbers = #tpu.dot_dimension_numbers<[1], [0], [0], [1], [0, 0, 1, 1], [], []>} : vector<8x32xf32>, vector<32x128xf32>, vector<8x128xf32> -> vector<8x128xf32>
    %80 = arith.addf %78, %79 : vector<8x128xf32>
    %81 = vector.extract_strided_slice %80 {offsets = [0, 0], sizes = [8, 96], strides = [1, 1]} : vector<8x128xf32> to vector<8x96xf32>
    %82 = arith.negf %81 : vector<8x96xf32>
    %83 = math.exp %82 : vector<8x96xf32>
    %cst_24 = arith.constant 1.000000e+00 : f32
    %84 = vector.broadcast %cst_24 : f32 to vector<8x96xf32>
    %85 = arith.addf %84, %83 : vector<8x96xf32>
    %86 = arith.divf %84, %85 : vector<8x96xf32>
    %87 = vector.extract_strided_slice %80 {offsets = [0, 96], sizes = [8, 32], strides = [1, 1]} : vector<8x128xf32> to vector<8x32xf32>
    %88 = math.tanh %87 : vector<8x32xf32>
    %89 = vector.extract_strided_slice %86 {offsets = [0, 0], sizes = [8, 32], strides = [1, 1]} : vector<8x96xf32> to vector<8x32xf32>
    %90 = vector.extract_strided_slice %86 {offsets = [0, 32], sizes = [8, 32], strides = [1, 1]} : vector<8x96xf32> to vector<8x32xf32>
    %91 = vector.extract_strided_slice %86 {offsets = [0, 64], sizes = [8, 32], strides = [1, 1]} : vector<8x96xf32> to vector<8x32xf32>
    %92 = arith.mulf %90, %73 : vector<8x32xf32>
    %93 = arith.mulf %89, %88 : vector<8x32xf32>
    %94 = arith.addf %92, %93 : vector<8x32xf32>
    %95 = math.tanh %94 : vector<8x32xf32>
    %96 = arith.mulf %91, %95 : vector<8x32xf32>
    %c0_25 = arith.constant 0 : index
    %c96 = arith.constant 96 : index
    %97 = vector.load %arg6[%c0_25, %c96] : memref<8x256xf32, #tpu.memory_space<vmem>>, vector<8x32xf32>
    tpu.vector_store %arg6[%c0_25, %c96], %96 {strides = array<i32>} : memref<8x256xf32, #tpu.memory_space<vmem>>, vector<8x32xf32>,
    %98 = vector.extract_strided_slice %10 {offsets = [0, 4, 0], sizes = [8, 1, 128], strides = [1, 1, 1]} : vector<8x8x128xf32> to vector<8x1x128xf32>
    %99 = vector.shape_cast %98 : vector<8x1x128xf32> to vector<8x128xf32>
    %cst_26 = arith.constant dense<0.000000e+00> : vector<8x128xf32>
    %100 = tpu.matmul %96, %11, %cst_26 {dimension_numbers = #tpu.dot_dimension_numbers<[1], [0], [0], [1], [0, 0, 1, 1], [], []>} : vector<8x32xf32>, vector<32x128xf32>, vector<8x128xf32> -> vector<8x128xf32>
    %101 = arith.addf %99, %100 : vector<8x128xf32>
    %102 = vector.extract_strided_slice %101 {offsets = [0, 0], sizes = [8, 96], strides = [1, 1]} : vector<8x128xf32> to vector<8x96xf32>
    %103 = arith.negf %102 : vector<8x96xf32>
    %104 = math.exp %103 : vector<8x96xf32>
    %cst_27 = arith.constant 1.000000e+00 : f32
    %105 = vector.broadcast %cst_27 : f32 to vector<8x96xf32>
    %106 = arith.addf %105, %104 : vector<8x96xf32>
    %107 = arith.divf %105, %106 : vector<8x96xf32>
    %108 = vector.extract_strided_slice %101 {offsets = [0, 96], sizes = [8, 32], strides = [1, 1]} : vector<8x128xf32> to vector<8x32xf32>
    %109 = math.tanh %108 : vector<8x32xf32>
    %110 = vector.extract_strided_slice %107 {offsets = [0, 0], sizes = [8, 32], strides = [1, 1]} : vector<8x96xf32> to vector<8x32xf32>
    %111 = vector.extract_strided_slice %107 {offsets = [0, 32], sizes = [8, 32], strides = [1, 1]} : vector<8x96xf32> to vector<8x32xf32>
    %112 = vector.extract_strided_slice %107 {offsets = [0, 64], sizes = [8, 32], strides = [1, 1]} : vector<8x96xf32> to vector<8x32xf32>
    %113 = arith.mulf %111, %94 : vector<8x32xf32>
    %114 = arith.mulf %110, %109 : vector<8x32xf32>
    %115 = arith.addf %113, %114 : vector<8x32xf32>
    %116 = math.tanh %115 : vector<8x32xf32>
    %117 = arith.mulf %112, %116 : vector<8x32xf32>
    %c0_28 = arith.constant 0 : index
    %c128 = arith.constant 128 : index
    %118 = vector.load %arg6[%c0_28, %c128] : memref<8x256xf32, #tpu.memory_space<vmem>>, vector<8x32xf32>
    tpu.vector_store %arg6[%c0_28, %c128], %117 {strides = array<i32>} : memref<8x256xf32, #tpu.memory_space<vmem>>, vector<8x32xf32>,
    %119 = vector.extract_strided_slice %10 {offsets = [0, 5, 0], sizes = [8, 1, 128], strides = [1, 1, 1]} : vector<8x8x128xf32> to vector<8x1x128xf32>
    %120 = vector.shape_cast %119 : vector<8x1x128xf32> to vector<8x128xf32>
    %cst_29 = arith.constant dense<0.000000e+00> : vector<8x128xf32>
    %121 = tpu.matmul %117, %11, %cst_29 {dimension_numbers = #tpu.dot_dimension_numbers<[1], [0], [0], [1], [0, 0, 1, 1], [], []>} : vector<8x32xf32>, vector<32x128xf32>, vector<8x128xf32> -> vector<8x128xf32>
    %122 = arith.addf %120, %121 : vector<8x128xf32>
    %123 = vector.extract_strided_slice %122 {offsets = [0, 0], sizes = [8, 96], strides = [1, 1]} : vector<8x128xf32> to vector<8x96xf32>
    %124 = arith.negf %123 : vector<8x96xf32>
    %125 = math.exp %124 : vector<8x96xf32>
    %cst_30 = arith.constant 1.000000e+00 : f32
    %126 = vector.broadcast %cst_30 : f32 to vector<8x96xf32>
    %127 = arith.addf %126, %125 : vector<8x96xf32>
    %128 = arith.divf %126, %127 : vector<8x96xf32>
    %129 = vector.extract_strided_slice %122 {offsets = [0, 96], sizes = [8, 32], strides = [1, 1]} : vector<8x128xf32> to vector<8x32xf32>
    %130 = math.tanh %129 : vector<8x32xf32>
    %131 = vector.extract_strided_slice %128 {offsets = [0, 0], sizes = [8, 32], strides = [1, 1]} : vector<8x96xf32> to vector<8x32xf32>
    %132 = vector.extract_strided_slice %128 {offsets = [0, 32], sizes = [8, 32], strides = [1, 1]} : vector<8x96xf32> to vector<8x32xf32>
    %133 = vector.extract_strided_slice %128 {offsets = [0, 64], sizes = [8, 32], strides = [1, 1]} : vector<8x96xf32> to vector<8x32xf32>
    %134 = arith.mulf %132, %115 : vector<8x32xf32>
    %135 = arith.mulf %131, %130 : vector<8x32xf32>
    %136 = arith.addf %134, %135 : vector<8x32xf32>
    %137 = math.tanh %136 : vector<8x32xf32>
    %138 = arith.mulf %133, %137 : vector<8x32xf32>
    %c0_31 = arith.constant 0 : index
    %c160 = arith.constant 160 : index
    %139 = vector.load %arg6[%c0_31, %c160] : memref<8x256xf32, #tpu.memory_space<vmem>>, vector<8x32xf32>
    tpu.vector_store %arg6[%c0_31, %c160], %138 {strides = array<i32>} : memref<8x256xf32, #tpu.memory_space<vmem>>, vector<8x32xf32>,
    %140 = vector.extract_strided_slice %10 {offsets = [0, 6, 0], sizes = [8, 1, 128], strides = [1, 1, 1]} : vector<8x8x128xf32> to vector<8x1x128xf32>
    %141 = vector.shape_cast %140 : vector<8x1x128xf32> to vector<8x128xf32>
    %cst_32 = arith.constant dense<0.000000e+00> : vector<8x128xf32>
    %142 = tpu.matmul %138, %11, %cst_32 {dimension_numbers = #tpu.dot_dimension_numbers<[1], [0], [0], [1], [0, 0, 1, 1], [], []>} : vector<8x32xf32>, vector<32x128xf32>, vector<8x128xf32> -> vector<8x128xf32>
    %143 = arith.addf %141, %142 : vector<8x128xf32>
    %144 = vector.extract_strided_slice %143 {offsets = [0, 0], sizes = [8, 96], strides = [1, 1]} : vector<8x128xf32> to vector<8x96xf32>
    %145 = arith.negf %144 : vector<8x96xf32>
    %146 = math.exp %145 : vector<8x96xf32>
    %cst_33 = arith.constant 1.000000e+00 : f32
    %147 = vector.broadcast %cst_33 : f32 to vector<8x96xf32>
    %148 = arith.addf %147, %146 : vector<8x96xf32>
    %149 = arith.divf %147, %148 : vector<8x96xf32>
    %150 = vector.extract_strided_slice %143 {offsets = [0, 96], sizes = [8, 32], strides = [1, 1]} : vector<8x128xf32> to vector<8x32xf32>
    %151 = math.tanh %150 : vector<8x32xf32>
    %152 = vector.extract_strided_slice %149 {offsets = [0, 0], sizes = [8, 32], strides = [1, 1]} : vector<8x96xf32> to vector<8x32xf32>
    %153 = vector.extract_strided_slice %149 {offsets = [0, 32], sizes = [8, 32], strides = [1, 1]} : vector<8x96xf32> to vector<8x32xf32>
    %154 = vector.extract_strided_slice %149 {offsets = [0, 64], sizes = [8, 32], strides = [1, 1]} : vector<8x96xf32> to vector<8x32xf32>
    %155 = arith.mulf %153, %136 : vector<8x32xf32>
    %156 = arith.mulf %152, %151 : vector<8x32xf32>
    %157 = arith.addf %155, %156 : vector<8x32xf32>
    %158 = math.tanh %157 : vector<8x32xf32>
    %159 = arith.mulf %154, %158 : vector<8x32xf32>
    %c0_34 = arith.constant 0 : index
    %c192 = arith.constant 192 : index
    %160 = vector.load %arg6[%c0_34, %c192] : memref<8x256xf32, #tpu.memory_space<vmem>>, vector<8x32xf32>
    tpu.vector_store %arg6[%c0_34, %c192], %159 {strides = array<i32>} : memref<8x256xf32, #tpu.memory_space<vmem>>, vector<8x32xf32>,
    %161 = vector.extract_strided_slice %10 {offsets = [0, 7, 0], sizes = [8, 1, 128], strides = [1, 1, 1]} : vector<8x8x128xf32> to vector<8x1x128xf32>
    %162 = vector.shape_cast %161 : vector<8x1x128xf32> to vector<8x128xf32>
    %cst_35 = arith.constant dense<0.000000e+00> : vector<8x128xf32>
    %163 = tpu.matmul %159, %11, %cst_35 {dimension_numbers = #tpu.dot_dimension_numbers<[1], [0], [0], [1], [0, 0, 1, 1], [], []>} : vector<8x32xf32>, vector<32x128xf32>, vector<8x128xf32> -> vector<8x128xf32>
    %164 = arith.addf %162, %163 : vector<8x128xf32>
    %165 = vector.extract_strided_slice %164 {offsets = [0, 0], sizes = [8, 96], strides = [1, 1]} : vector<8x128xf32> to vector<8x96xf32>
    %166 = arith.negf %165 : vector<8x96xf32>
    %167 = math.exp %166 : vector<8x96xf32>
    %cst_36 = arith.constant 1.000000e+00 : f32
    %168 = vector.broadcast %cst_36 : f32 to vector<8x96xf32>
    %169 = arith.addf %168, %167 : vector<8x96xf32>
    %170 = arith.divf %168, %169 : vector<8x96xf32>
    %171 = vector.extract_strided_slice %164 {offsets = [0, 96], sizes = [8, 32], strides = [1, 1]} : vector<8x128xf32> to vector<8x32xf32>
    %172 = math.tanh %171 : vector<8x32xf32>
    %173 = vector.extract_strided_slice %170 {offsets = [0, 0], sizes = [8, 32], strides = [1, 1]} : vector<8x96xf32> to vector<8x32xf32>
    %174 = vector.extract_strided_slice %170 {offsets = [0, 32], sizes = [8, 32], strides = [1, 1]} : vector<8x96xf32> to vector<8x32xf32>
    %175 = vector.extract_strided_slice %170 {offsets = [0, 64], sizes = [8, 32], strides = [1, 1]} : vector<8x96xf32> to vector<8x32xf32>
    %176 = arith.mulf %174, %157 : vector<8x32xf32>
    %177 = arith.mulf %173, %172 : vector<8x32xf32>
    %178 = arith.addf %176, %177 : vector<8x32xf32>
    %179 = math.tanh %178 : vector<8x32xf32>
    %180 = arith.mulf %175, %179 : vector<8x32xf32>
    %c0_37 = arith.constant 0 : index
    %c224 = arith.constant 224 : index
    %181 = vector.load %arg6[%c0_37, %c224] : memref<8x256xf32, #tpu.memory_space<vmem>>, vector<8x32xf32>
    tpu.vector_store %arg6[%c0_37, %c224], %180 {strides = array<i32>} : memref<8x256xf32, #tpu.memory_space<vmem>>, vector<8x32xf32>,
    %c0_38 = arith.constant 0 : index
    %c0_39 = arith.constant 0 : index
    %182 = vector.load %arg7[%c0_38, %c0_39] : memref<8x32xf32, #tpu.memory_space<vmem>>, vector<8x32xf32>
    tpu.vector_store %arg7[%c0_38, %c0_39], %180 {strides = array<i32>} : memref<8x32xf32, #tpu.memory_space<vmem>>, vector<8x32xf32>,
    %c0_40 = arith.constant 0 : index
    %c0_41 = arith.constant 0 : index
    %183 = vector.load %arg8[%c0_40, %c0_41] : memref<8x32xf32, #tpu.memory_space<vmem>>, vector<8x32xf32>
    tpu.vector_store %arg8[%c0_40, %c0_41], %178 {strides = array<i32>} : memref<8x32xf32, #tpu.memory_space<vmem>>, vector<8x32xf32>,
    return
  }
  func.func @transform_0(%arg0: i32, %arg1: i32) -> (i32, i32, i32) {
    %c0_i32 = arith.constant 0 : i32
    %c0_i32_0 = arith.constant 0 : i32
    return %arg0, %arg1, %c0_i32 : i32, i32, i32
  }
  func.func @transform_1(%arg0: i32, %arg1: i32) -> (i32, i32) {
    %c0_i32 = arith.constant 0 : i32
    %c0_i32_0 = arith.constant 0 : i32
    %c0_i32_1 = arith.constant 0 : i32
    return %c0_i32, %c0_i32_0 : i32, i32
  }
  func.func @transform_2(%arg0: i32, %arg1: i32) -> (i32, i32) {
    %c0_i32 = arith.constant 0 : i32
    %c0_i32_0 = arith.constant 0 : i32
    %c0_i32_1 = arith.constant 0 : i32
    return %c0_i32, %c0_i32_0 : i32, i32
  }
  func.func @transform_3(%arg0: i32, %arg1: i32) -> (i32, i32) {
    %c0_i32 = arith.constant 0 : i32
    %c0_i32_0 = arith.constant 0 : i32
    %c0_i32_1 = arith.constant 0 : i32
    return %c0_i32, %c0_i32_0 : i32, i32
  }
  func.func @transform_4(%arg0: i32, %arg1: i32) -> (i32, i32) {
    %c0_i32 = arith.constant 0 : i32
    return %arg0, %arg1 : i32, i32
  }
  func.func @transform_5(%arg0: i32, %arg1: i32) -> (i32, i32) {
    %c0_i32 = arith.constant 0 : i32
    %c0_i32_0 = arith.constant 0 : i32
    return %arg0, %c0_i32 : i32, i32
  }
  func.func @transform_6(%arg0: i32, %arg1: i32) -> (i32, i32) {
    %c0_i32 = arith.constant 0 : i32
    %c0_i32_0 = arith.constant 0 : i32
    return %arg0, %c0_i32 : i32, i32
  }
}

module attributes {stable_mosaic.version = 11 : i64} {
  func.func @kernel(%arg0: i32, %arg1: i32, %arg2: memref<8x8x16xf32, #tpu.memory_space<vmem>>, %arg3: memref<16x128xf32, #tpu.memory_space<vmem>>, %arg4: memref<32x128xf32, #tpu.memory_space<vmem>>, %arg5: memref<1x128xf32, #tpu.memory_space<vmem>>, %arg6: memref<8x256xf32, #tpu.memory_space<vmem>>, %arg7: memref<8x32xf32, #tpu.memory_space<vmem>>, %arg8: memref<8x32xf32, #tpu.memory_space<vmem>>) attributes {dimension_semantics = [#tpu.dimension_semantics<parallel>, #tpu.dimension_semantics<arbitrary>], iteration_bounds = array<i64: 1, 1>, scalar_prefetch = 0 : i64, scratch_operands = 0 : i64, tpu.core_type = #tpu.core_type<tc>, window_params = [{transform_indices = @transform_0, window_bounds = array<i64: 8, 8, 16>}, {pipeline_mode = #tpu.pipeline_mode<synchronous>, transform_indices = @transform_1, window_bounds = array<i64: 16, 128>}, {pipeline_mode = #tpu.pipeline_mode<synchronous>, transform_indices = @transform_2, window_bounds = array<i64: 32, 128>}, {pipeline_mode = #tpu.pipeline_mode<synchronous>, transform_indices = @transform_3, window_bounds = array<i64: 1, 128>}, {transform_indices = @transform_4, window_bounds = array<i64: 8, 256>}, {transform_indices = @transform_5, window_bounds = array<i64: 8, 32>}, {transform_indices = @transform_6, window_bounds = array<i64: 8, 32>}]} {
    %c0_i32 = arith.constant 0 : i32
    %0 = arith.cmpi eq, %arg1, %c0_i32 : i32
    %1 = arith.extui %0 : i1 to i32
    %c0_i32_0 = arith.constant 0 : i32
    %2 = arith.cmpi ne, %1, %c0_i32_0 : i32
    scf.if %2 {
      %cst_42 = arith.constant 0.000000e+00 : f32
      %184 = vector.broadcast %cst_42 : f32 to vector<8x32xf32>
      %c0_43 = arith.constant 0 : index
      %c0_44 = arith.constant 0 : index
      %185 = vector.load %arg7[%c0_43, %c0_44] : memref<8x32xf32, #tpu.memory_space<vmem>>, vector<8x32xf32>
      tpu.vector_store %arg7[%c0_43, %c0_44], %184 {strides = array<i32>} : memref<8x32xf32, #tpu.memory_space<vmem>>, vector<8x32xf32>,
      %cst_45 = arith.constant 0.000000e+00 : f32
      %186 = vector.broadcast %cst_45 : f32 to vector<8x32xf32>
      %c0_46 = arith.constant 0 : index
      %c0_47 = arith.constant 0 : index
      %187 = vector.load %arg8[%c0_46, %c0_47] : memref<8x32xf32, #tpu.memory_space<vmem>>, vector<8x32xf32>
      tpu.vector_store %arg8[%c0_46, %c0_47], %186 {strides = array<i32>} : memref<8x32xf32, #tpu.memory_space<vmem>>, vector<8x32xf32>,
    } else {
    }
    %c0 = arith.constant 0 : index
    %c0_1 = arith.constant 0 : index
    %c0_2 = arith.constant 0 : index
    %3 = vector.load %arg2[%c0, %c0_1, %c0_2] : memref<8x8x16xf32, #tpu.memory_space<vmem>>, vector<8x8x16xf32>
    %4 = vector.shape_cast %3 : vector<8x8x16xf32> to vector<64x16xf32>
    %c0_3 = arith.constant 0 : index
    %c0_4 = arith.constant 0 : index
    %5 = vector.load %arg3[%c0_3, %c0_4] : memref<16x128xf32, #tpu.memory_space<vmem>>, vector<16x128xf32>
    %cst = arith.constant dense<0.000000e+00> : vector<64x128xf32>
    %6 = tpu.matmul %4, %5, %cst {dimension_numbers = #tpu.dot_dimension_numbers<[1], [0], [0], [1], [0, 0, 1, 1], [], []>} : vector<64x16xf32>, vector<16x128xf32>, vector<64x128xf32> -> vector<64x128xf32>
    %c0_5 = arith.constant 0 : index
    %c0_6 = arith.constant 0 : index
    %7 = vector.load %arg5[%c0_5, %c0_6] : memref<1x128xf32, #tpu.memory_space<vmem>>, vector<1x128xf32>
    %8 = vector.broadcast %7 : vector<1x128xf32> to vector<64x128xf32>
    %9 = arith.addf %6, %8 : vector<64x128xf32>
    %10 = vector.shape_cast %9 : vector<64x128xf32> to vector<8x8x128xf32>
    %c0_7 = arith.constant 0 : index
    %c0_8 = arith.constant 0 : index
    %11 = vector.load %arg4[%c0_7, %c0_8] : memref<32x128xf32, #tpu.memory_space<vmem>>, vector<32x128xf32>
    %c0_9 = arith.constant 0 : index
    %c0_10 = arith.constant 0 : index
    %12 = vector.load %arg7[%c0_9, %c0_10] : memref<8x32xf32, #tpu.memory_space<vmem>>, vector<8x32xf32>
    %c0_11 = arith.constant 0 : index
    %c0_12 = arith.constant 0 : index
    %13 = vector.load %arg8[%c0_11, %c0_12] : memref<8x32xf32, #tpu.memory_space<vmem>>, vector<8x32xf32>
    %14 = vector.extract_strided_slice %10 {offsets = [0, 0, 0], sizes = [8, 1, 128], strides = [1, 1, 1]} : vector<8x8x128xf32> to vector<8x1x128xf32>
    %15 = vector.shape_cast %14 : vector<8x1x128xf32> to vector<8x128xf32>
    %cst_13 = arith.constant dense<0.000000e+00> : vector<8x128xf32>
    %16 = tpu.matmul %12, %11, %cst_13 {dimension_numbers = #tpu.dot_dimension_numbers<[1], [0], [0], [1], [0, 0, 1, 1], [], []>} : vector<8x32xf32>, vector<32x128xf32>, vector<8x128xf32> -> vector<8x128xf32>
    %17 = arith.addf %15, %16 : vector<8x128xf32>
    %18 = vector.extract_strided_slice %17 {offsets = [0, 0], sizes = [8, 96], strides = [1, 1]} : vector<8x128xf32> to vector<8x96xf32>
    %19 = arith.negf %18 : vector<8x96xf32>
    %20 = math.exp %19 : vector<8x96xf32>
    %cst_14 = arith.constant 1.000000e+00 : f32
    %21 = vector.broadcast %cst_14 : f32 to vector<8x96xf32>
    %22 = arith.addf %21, %20 : vector<8x96xf32>
    %23 = arith.divf %21, %22 : vector<8x96xf32>
    %24 = vector.extract_strided_slice %17 {offsets = [0, 96], sizes = [8, 32], strides = [1, 1]} : vector<8x128xf32> to vector<8x32xf32>
    %25 = math.tanh %24 : vector<8x32xf32>
    %26 = vector.extract_strided_slice %23 {offsets = [0, 0], sizes = [8, 32], strides = [1, 1]} : vector<8x96xf32> to vector<8x32xf32>
    %27 = vector.extract_strided_slice %23 {offsets = [0, 32], sizes = [8, 32], strides = [1, 1]} : vector<8x96xf32> to vector<8x32xf32>
    %28 = vector.extract_strided_slice %23 {offsets = [0, 64], sizes = [8, 32], strides = [1, 1]} : vector<8x96xf32> to vector<8x32xf32>
    %29 = arith.mulf %27, %13 : vector<8x32xf32>
    %30 = arith.mulf %26, %25 : vector<8x32xf32>
    %31 = arith.addf %29, %30 : vector<8x32xf32>
    %32 = math.tanh %31 : vector<8x32xf32>
    %33 = arith.mulf %28, %32 : vector<8x32xf32>
    %c0_15 = arith.constant 0 : index
    %c0_16 = arith.constant 0 : index
    %34 = vector.load %arg6[%c0_15, %c0_16] : memref<8x256xf32, #tpu.memory_space<vmem>>, vector<8x32xf32>
    tpu.vector_store %arg6[%c0_15, %c0_16], %33 {strides = array<i32>} : memref<8x256xf32, #tpu.memory_space<vmem>>, vector<8x32xf32>,
    %35 = vector.extract_strided_slice %10 {offsets = [0, 1, 0], sizes = [8, 1, 128], strides = [1, 1, 1]} : vector<8x8x128xf32> to vector<8x1x128xf32>
    %36 = vector.shape_cast %35 : vector<8x1x128xf32> to vector<8x128xf32>
    %cst_17 = arith.constant dense<0.000000e+00> : vector<8x128xf32>
    %37 = tpu.matmul %33, %11, %cst_17 {dimension_numbers = #tpu.dot_dimension_numbers<[1], [0], [0], [1], [0, 0, 1, 1], [], []>} : vector<8x32xf32>, vector<32x128xf32>, vector<8x128xf32> -> vector<8x128xf32>
    %38 = arith.addf %36, %37 : vector<8x128xf32>
    %39 = vector.extract_strided_slice %38 {offsets = [0, 0], sizes = [8, 96], strides = [1, 1]} : vector<8x128xf32> to vector<8x96xf32>
    %40 = arith.negf %39 : vector<8x96xf32>
    %41 = math.exp %40 : vector<8x96xf32>
    %cst_18 = arith.constant 1.000000e+00 : f32
    %42 = vector.broadcast %cst_18 : f32 to vector<8x96xf32>
    %43 = arith.addf %42, %41 : vector<8x96xf32>
    %44 = arith.divf %42, %43 : vector<8x96xf32>
    %45 = vector.extract_strided_slice %38 {offsets = [0, 96], sizes = [8, 32], strides = [1, 1]} : vector<8x128xf32> to vector<8x32xf32>
    %46 = math.tanh %45 : vector<8x32xf32>
    %47 = vector.extract_strided_slice %44 {offsets = [0, 0], sizes = [8, 32], strides = [1, 1]} : vector<8x96xf32> to vector<8x32xf32>
    %48 = vector.extract_strided_slice %44 {offsets = [0, 32], sizes = [8, 32], strides = [1, 1]} : vector<8x96xf32> to vector<8x32xf32>
    %49 = vector.extract_strided_slice %44 {offsets = [0, 64], sizes = [8, 32], strides = [1, 1]} : vector<8x96xf32> to vector<8x32xf32>
    %50 = arith.mulf %48, %31 : vector<8x32xf32>
    %51 = arith.mulf %47, %46 : vector<8x32xf32>
    %52 = arith.addf %50, %51 : vector<8x32xf32>
    %53 = math.tanh %52 : vector<8x32xf32>
    %54 = arith.mulf %49, %53 : vector<8x32xf32>
    %c0_19 = arith.constant 0 : index
    %c32 = arith.constant 32 : index
    %55 = vector.load %arg6[%c0_19, %c32] : memref<8x256xf32, #tpu.memory_space<vmem>>, vector<8x32xf32>
    tpu.vector_store %arg6[%c0_19, %c32], %54 {strides = array<i32>} : memref<8x256xf32, #tpu.memory_space<vmem>>, vector<8x32xf32>,
    %56 = vector.extract_strided_slice %10 {offsets = [0, 2, 0], sizes = [8, 1, 128], strides = [1, 1, 1]} : vector<8x8x128xf32> to vector<8x1x128xf32>
    %57 = vector.shape_cast %56 : vector<8x1x128xf32> to vector<8x128xf32>
    %cst_20 = arith.constant dense<0.000000e+00> : vector<8x128xf32>
    %58 = tpu.matmul %54, %11, %cst_20 {dimension_numbers = #tpu.dot_dimension_numbers<[1], [0], [0], [1], [0, 0, 1, 1], [], []>} : vector<8x32xf32>, vector<32x128xf32>, vector<8x128xf32> -> vector<8x128xf32>
    %59 = arith.addf %57, %58 : vector<8x128xf32>
    %60 = vector.extract_strided_slice %59 {offsets = [0, 0], sizes = [8, 96], strides = [1, 1]} : vector<8x128xf32> to vector<8x96xf32>
    %61 = arith.negf %60 : vector<8x96xf32>
    %62 = math.exp %61 : vector<8x96xf32>
    %cst_21 = arith.constant 1.000000e+00 : f32
    %63 = vector.broadcast %cst_21 : f32 to vector<8x96xf32>
    %64 = arith.addf %63, %62 : vector<8x96xf32>
    %65 = arith.divf %63, %64 : vector<8x96xf32>
    %66 = vector.extract_strided_slice %59 {offsets = [0, 96], sizes = [8, 32], strides = [1, 1]} : vector<8x128xf32> to vector<8x32xf32>
    %67 = math.tanh %66 : vector<8x32xf32>
    %68 = vector.extract_strided_slice %65 {offsets = [0, 0], sizes = [8, 32], strides = [1, 1]} : vector<8x96xf32> to vector<8x32xf32>
    %69 = vector.extract_strided_slice %65 {offsets = [0, 32], sizes = [8, 32], strides = [1, 1]} : vector<8x96xf32> to vector<8x32xf32>
    %70 = vector.extract_strided_slice %65 {offsets = [0, 64], sizes = [8, 32], strides = [1, 1]} : vector<8x96xf32> to vector<8x32xf32>
    %71 = arith.mulf %69, %52 : vector<8x32xf32>
    %72 = arith.mulf %68, %67 : vector<8x32xf32>
    %73 = arith.addf %71, %72 : vector<8x32xf32>
    %74 = math.tanh %73 : vector<8x32xf32>
    %75 = arith.mulf %70, %74 : vector<8x32xf32>
    %c0_22 = arith.constant 0 : index
    %c64 = arith.constant 64 : index
    %76 = vector.load %arg6[%c0_22, %c64] : memref<8x256xf32, #tpu.memory_space<vmem>>, vector<8x32xf32>
    tpu.vector_store %arg6[%c0_22, %c64], %75 {strides = array<i32>} : memref<8x256xf32, #tpu.memory_space<vmem>>, vector<8x32xf32>,
    %77 = vector.extract_strided_slice %10 {offsets = [0, 3, 0], sizes = [8, 1, 128], strides = [1, 1, 1]} : vector<8x8x128xf32> to vector<8x1x128xf32>
    %78 = vector.shape_cast %77 : vector<8x1x128xf32> to vector<8x128xf32>
    %cst_23 = arith.constant dense<0.000000e+00> : vector<8x128xf32>
    %79 = tpu.matmul %75, %11, %cst_23 {dimension_numbers = #tpu.dot_dimension_numbers<[1], [0], [0], [1], [0, 0, 1, 1], [], []>} : vector<8x32xf32>, vector<32x128xf32>, vector<8x128xf32> -> vector<8x128xf32>
    %80 = arith.addf %78, %79 : vector<8x128xf32>
    %81 = vector.extract_strided_slice %80 {offsets = [0, 0], sizes = [8, 96], strides = [1, 1]} : vector<8x128xf32> to vector<8x96xf32>
    %82 = arith.negf %81 : vector<8x96xf32>
    %83 = math.exp %82 : vector<8x96xf32>
    %cst_24 = arith.constant 1.000000e+00 : f32
    %84 = vector.broadcast %cst_24 : f32 to vector<8x96xf32>
    %85 = arith.addf %84, %83 : vector<8x96xf32>
    %86 = arith.divf %84, %85 : vector<8x96xf32>
    %87 = vector.extract_strided_slice %80 {offsets = [0, 96], sizes = [8, 32], strides = [1, 1]} : vector<8x128xf32> to vector<8x32xf32>
    %88 = math.tanh %87 : vector<8x32xf32>
    %89 = vector.extract_strided_slice %86 {offsets = [0, 0], sizes = [8, 32], strides = [1, 1]} : vector<8x96xf32> to vector<8x32xf32>
    %90 = vector.extract_strided_slice %86 {offsets = [0, 32], sizes = [8, 32], strides = [1, 1]} : vector<8x96xf32> to vector<8x32xf32>
    %91 = vector.extract_strided_slice %86 {offsets = [0, 64], sizes = [8, 32], strides = [1, 1]} : vector<8x96xf32> to vector<8x32xf32>
    %92 = arith.mulf %90, %73 : vector<8x32xf32>
    %93 = arith.mulf %89, %88 : vector<8x32xf32>
    %94 = arith.addf %92, %93 : vector<8x32xf32>
    %95 = math.tanh %94 : vector<8x32xf32>
    %96 = arith.mulf %91, %95 : vector<8x32xf32>
    %c0_25 = arith.constant 0 : index
    %c96 = arith.constant 96 : index
    %97 = vector.load %arg6[%c0_25, %c96] : memref<8x256xf32, #tpu.memory_space<vmem>>, vector<8x32xf32>
    tpu.vector_store %arg6[%c0_25, %c96], %96 {strides = array<i32>} : memref<8x256xf32, #tpu.memory_space<vmem>>, vector<8x32xf32>,
    %98 = vector.extract_strided_slice %10 {offsets = [0, 4, 0], sizes = [8, 1, 128], strides = [1, 1, 1]} : vector<8x8x128xf32> to vector<8x1x128xf32>
    %99 = vector.shape_cast %98 : vector<8x1x128xf32> to vector<8x128xf32>
    %cst_26 = arith.constant dense<0.000000e+00> : vector<8x128xf32>
    %100 = tpu.matmul %96, %11, %cst_26 {dimension_numbers = #tpu.dot_dimension_numbers<[1], [0], [0], [1], [0, 0, 1, 1], [], []>} : vector<8x32xf32>, vector<32x128xf32>, vector<8x128xf32> -> vector<8x128xf32>
    %101 = arith.addf %99, %100 : vector<8x128xf32>
    %102 = vector.extract_strided_slice %101 {offsets = [0, 0], sizes = [8, 96], strides = [1, 1]} : vector<8x128xf32> to vector<8x96xf32>
    %103 = arith.negf %102 : vector<8x96xf32>
    %104 = math.exp %103 : vector<8x96xf32>
    %cst_27 = arith.constant 1.000000e+00 : f32
    %105 = vector.broadcast %cst_27 : f32 to vector<8x96xf32>
    %106 = arith.addf %105, %104 : vector<8x96xf32>
    %107 = arith.divf %105, %106 : vector<8x96xf32>
    %108 = vector.extract_strided_slice %101 {offsets = [0, 96], sizes = [8, 32], strides = [1, 1]} : vector<8x128xf32> to vector<8x32xf32>
    %109 = math.tanh %108 : vector<8x32xf32>
    %110 = vector.extract_strided_slice %107 {offsets = [0, 0], sizes = [8, 32], strides = [1, 1]} : vector<8x96xf32> to vector<8x32xf32>
    %111 = vector.extract_strided_slice %107 {offsets = [0, 32], sizes = [8, 32], strides = [1, 1]} : vector<8x96xf32> to vector<8x32xf32>
    %112 = vector.extract_strided_slice %107 {offsets = [0, 64], sizes = [8, 32], strides = [1, 1]} : vector<8x96xf32> to vector<8x32xf32>
    %113 = arith.mulf %111, %94 : vector<8x32xf32>
    %114 = arith.mulf %110, %109 : vector<8x32xf32>
    %115 = arith.addf %113, %114 : vector<8x32xf32>
    %116 = math.tanh %115 : vector<8x32xf32>
    %117 = arith.mulf %112, %116 : vector<8x32xf32>
    %c0_28 = arith.constant 0 : index
    %c128 = arith.constant 128 : index
    %118 = vector.load %arg6[%c0_28, %c128] : memref<8x256xf32, #tpu.memory_space<vmem>>, vector<8x32xf32>
    tpu.vector_store %arg6[%c0_28, %c128], %117 {strides = array<i32>} : memref<8x256xf32, #tpu.memory_space<vmem>>, vector<8x32xf32>,
    %119 = vector.extract_strided_slice %10 {offsets = [0, 5, 0], sizes = [8, 1, 128], strides = [1, 1, 1]} : vector<8x8x128xf32> to vector<8x1x128xf32>
    %120 = vector.shape_cast %119 : vector<8x1x128xf32> to vector<8x128xf32>
    %cst_29 = arith.constant dense<0.000000e+00> : vector<8x128xf32>
    %121 = tpu.matmul %117, %11, %cst_29 {dimension_numbers = #tpu.dot_dimension_numbers<[1], [0], [0], [1], [0, 0, 1, 1], [], []>} : vector<8x32xf32>, vector<32x128xf32>, vector<8x128xf32> -> vector<8x128xf32>
    %122 = arith.addf %120, %121 : vector<8x128xf32>
    %123 = vector.extract_strided_slice %122 {offsets = [0, 0], sizes = [8, 96], strides = [1, 1]} : vector<8x128xf32> to vector<8x96xf32>
    %124 = arith.negf %123 : vector<8x96xf32>
    %125 = math.exp %124 : vector<8x96xf32>
    %cst_30 = arith.constant 1.000000e+00 : f32
    %126 = vector.broadcast %cst_30 : f32 to vector<8x96xf32>
    %127 = arith.addf %126, %125 : vector<8x96xf32>
    %128 = arith.divf %126, %127 : vector<8x96xf32>
    %129 = vector.extract_strided_slice %122 {offsets = [0, 96], sizes = [8, 32], strides = [1, 1]} : vector<8x128xf32> to vector<8x32xf32>
    %130 = math.tanh %129 : vector<8x32xf32>
    %131 = vector.extract_strided_slice %128 {offsets = [0, 0], sizes = [8, 32], strides = [1, 1]} : vector<8x96xf32> to vector<8x32xf32>
    %132 = vector.extract_strided_slice %128 {offsets = [0, 32], sizes = [8, 32], strides = [1, 1]} : vector<8x96xf32> to vector<8x32xf32>
    %133 = vector.extract_strided_slice %128 {offsets = [0, 64], sizes = [8, 32], strides = [1, 1]} : vector<8x96xf32> to vector<8x32xf32>
    %134 = arith.mulf %132, %115 : vector<8x32xf32>
    %135 = arith.mulf %131, %130 : vector<8x32xf32>
    %136 = arith.addf %134, %135 : vector<8x32xf32>
    %137 = math.tanh %136 : vector<8x32xf32>
    %138 = arith.mulf %133, %137 : vector<8x32xf32>
    %c0_31 = arith.constant 0 : index
    %c160 = arith.constant 160 : index
    %139 = vector.load %arg6[%c0_31, %c160] : memref<8x256xf32, #tpu.memory_space<vmem>>, vector<8x32xf32>
    tpu.vector_store %arg6[%c0_31, %c160], %138 {strides = array<i32>} : memref<8x256xf32, #tpu.memory_space<vmem>>, vector<8x32xf32>,
    %140 = vector.extract_strided_slice %10 {offsets = [0, 6, 0], sizes = [8, 1, 128], strides = [1, 1, 1]} : vector<8x8x128xf32> to vector<8x1x128xf32>
    %141 = vector.shape_cast %140 : vector<8x1x128xf32> to vector<8x128xf32>
    %cst_32 = arith.constant dense<0.000000e+00> : vector<8x128xf32>
    %142 = tpu.matmul %138, %11, %cst_32 {dimension_numbers = #tpu.dot_dimension_numbers<[1], [0], [0], [1], [0, 0, 1, 1], [], []>} : vector<8x32xf32>, vector<32x128xf32>, vector<8x128xf32> -> vector<8x128xf32>
    %143 = arith.addf %141, %142 : vector<8x128xf32>
    %144 = vector.extract_strided_slice %143 {offsets = [0, 0], sizes = [8, 96], strides = [1, 1]} : vector<8x128xf32> to vector<8x96xf32>
    %145 = arith.negf %144 : vector<8x96xf32>
    %146 = math.exp %145 : vector<8x96xf32>
    %cst_33 = arith.constant 1.000000e+00 : f32
    %147 = vector.broadcast %cst_33 : f32 to vector<8x96xf32>
    %148 = arith.addf %147, %146 : vector<8x96xf32>
    %149 = arith.divf %147, %148 : vector<8x96xf32>
    %150 = vector.extract_strided_slice %143 {offsets = [0, 96], sizes = [8, 32], strides = [1, 1]} : vector<8x128xf32> to vector<8x32xf32>
    %151 = math.tanh %150 : vector<8x32xf32>
    %152 = vector.extract_strided_slice %149 {offsets = [0, 0], sizes = [8, 32], strides = [1, 1]} : vector<8x96xf32> to vector<8x32xf32>
    %153 = vector.extract_strided_slice %149 {offsets = [0, 32], sizes = [8, 32], strides = [1, 1]} : vector<8x96xf32> to vector<8x32xf32>
    %154 = vector.extract_strided_slice %149 {offsets = [0, 64], sizes = [8, 32], strides = [1, 1]} : vector<8x96xf32> to vector<8x32xf32>
    %155 = arith.mulf %153, %136 : vector<8x32xf32>
    %156 = arith.mulf %152, %151 : vector<8x32xf32>
    %157 = arith.addf %155, %156 : vector<8x32xf32>
    %158 = math.tanh %157 : vector<8x32xf32>
    %159 = arith.mulf %154, %158 : vector<8x32xf32>
    %c0_34 = arith.constant 0 : index
    %c192 = arith.constant 192 : index
    %160 = vector.load %arg6[%c0_34, %c192] : memref<8x256xf32, #tpu.memory_space<vmem>>, vector<8x32xf32>
    tpu.vector_store %arg6[%c0_34, %c192], %159 {strides = array<i32>} : memref<8x256xf32, #tpu.memory_space<vmem>>, vector<8x32xf32>,
    %161 = vector.extract_strided_slice %10 {offsets = [0, 7, 0], sizes = [8, 1, 128], strides = [1, 1, 1]} : vector<8x8x128xf32> to vector<8x1x128xf32>
    %162 = vector.shape_cast %161 : vector<8x1x128xf32> to vector<8x128xf32>
    %cst_35 = arith.constant dense<0.000000e+00> : vector<8x128xf32>
    %163 = tpu.matmul %159, %11, %cst_35 {dimension_numbers = #tpu.dot_dimension_numbers<[1], [0], [0], [1], [0, 0, 1, 1], [], []>} : vector<8x32xf32>, vector<32x128xf32>, vector<8x128xf32> -> vector<8x128xf32>
    %164 = arith.addf %162, %163 : vector<8x128xf32>
    %165 = vector.extract_strided_slice %164 {offsets = [0, 0], sizes = [8, 96], strides = [1, 1]} : vector<8x128xf32> to vector<8x96xf32>
    %166 = arith.negf %165 : vector<8x96xf32>
    %167 = math.exp %166 : vector<8x96xf32>
    %cst_36 = arith.constant 1.000000e+00 : f32
    %168 = vector.broadcast %cst_36 : f32 to vector<8x96xf32>
    %169 = arith.addf %168, %167 : vector<8x96xf32>
    %170 = arith.divf %168, %169 : vector<8x96xf32>
    %171 = vector.extract_strided_slice %164 {offsets = [0, 96], sizes = [8, 32], strides = [1, 1]} : vector<8x128xf32> to vector<8x32xf32>
    %172 = math.tanh %171 : vector<8x32xf32>
    %173 = vector.extract_strided_slice %170 {offsets = [0, 0], sizes = [8, 32], strides = [1, 1]} : vector<8x96xf32> to vector<8x32xf32>
    %174 = vector.extract_strided_slice %170 {offsets = [0, 32], sizes = [8, 32], strides = [1, 1]} : vector<8x96xf32> to vector<8x32xf32>
    %175 = vector.extract_strided_slice %170 {offsets = [0, 64], sizes = [8, 32], strides = [1, 1]} : vector<8x96xf32> to vector<8x32xf32>
    %176 = arith.mulf %174, %157 : vector<8x32xf32>
    %177 = arith.mulf %173, %172 : vector<8x32xf32>
    %178 = arith.addf %176, %177 : vector<8x32xf32>
    %179 = math.tanh %178 : vector<8x32xf32>
    %180 = arith.mulf %175, %179 : vector<8x32xf32>
    %c0_37 = arith.constant 0 : index
    %c224 = arith.constant 224 : index
    %181 = vector.load %arg6[%c0_37, %c224] : memref<8x256xf32, #tpu.memory_space<vmem>>, vector<8x32xf32>
    tpu.vector_store %arg6[%c0_37, %c224], %180 {strides = array<i32>} : memref<8x256xf32, #tpu.memory_space<vmem>>, vector<8x32xf32>,
    %c0_38 = arith.constant 0 : index
    %c0_39 = arith.constant 0 : index
    %182 = vector.load %arg7[%c0_38, %c0_39] : memref<8x32xf32, #tpu.memory_space<vmem>>, vector<8x32xf32>
    tpu.vector_store %arg7[%c0_38, %c0_39], %180 {strides = array<i32>} : memref<8x32xf32, #tpu.memory_space<vmem>>, vector<8x32xf32>,
    %c0_40 = arith.constant 0 : index
    %c0_41 = arith.constant 0 : index
    %183 = vector.load %arg8[%c0_40, %c0_41] : memref<8x32xf32, #tpu.memory_space<vmem>>, vector<8x32xf32>
    tpu.vector_store %arg8[%c0_40, %c0_41], %178 {strides = array<i32>} : memref<8x32xf32, #tpu.memory_space<vmem>>, vector<8x32xf32>,
    return
  }
  func.func @transform_0(%arg0: i32, %arg1: i32) -> (i32, i32, i32) {
    %c0_i32 = arith.constant 0 : i32
    %c0_i32_0 = arith.constant 0 : i32
    return %arg0, %arg1, %c0_i32 : i32, i32, i32
  }
  func.func @transform_1(%arg0: i32, %arg1: i32) -> (i32, i32) {
    %c0_i32 = arith.constant 0 : i32
    %c0_i32_0 = arith.constant 0 : i32
    %c0_i32_1 = arith.constant 0 : i32
    return %c0_i32, %c0_i32_0 : i32, i32
  }
  func.func @transform_2(%arg0: i32, %arg1: i32) -> (i32, i32) {
    %c0_i32 = arith.constant 0 : i32
    %c0_i32_0 = arith.constant 0 : i32
    %c0_i32_1 = arith.constant 0 : i32
    return %c0_i32, %c0_i32_0 : i32, i32
  }
  func.func @transform_3(%arg0: i32, %arg1: i32) -> (i32, i32) {
    %c0_i32 = arith.constant 0 : i32
    %c0_i32_0 = arith.constant 0 : i32
    %c0_i32_1 = arith.constant 0 : i32
    return %c0_i32, %c0_i32_0 : i32, i32
  }
  func.func @transform_4(%arg0: i32, %arg1: i32) -> (i32, i32) {
    %c0_i32 = arith.constant 0 : i32
    return %arg0, %arg1 : i32, i32
  }
  func.func @transform_5(%arg0: i32, %arg1: i32) -> (i32, i32) {
    %c0_i32 = arith.constant 0 : i32
    %c0_i32_0 = arith.constant 0 : i32
    return %arg0, %c0_i32 : i32, i32
  }
  func.func @transform_6(%arg0: i32, %arg1: i32) -> (i32, i32) {
    %c0_i32 = arith.constant 0 : i32
    %c0_i32_0 = arith.constant 0 : i32
    return %arg0, %c0_i32 : i32, i32
  }
}

</mosaic_0001>

<bundles_post_ra>
// kernel: tpu_custom_call.1
= control target key start
LH: loop header
LB: loop body
LE: loop exit
PB: predicated region body
PF: predicated region fallthrough
CT: control target
= control target key end

     0   :  { %12 = vsyncpa [#allocation3], 0  ;;  %s5073_s0 = inlined_call_operand.hbm [shape: f32[8,8,16], index: 0, kind: input, shape index: {}]   ;;  %s5074_s1 = inlined_call_operand.hbm [shape: f32[16,128], index: 1, kind: input, shape index: {}]   ;;  %s5075_s2 = inlined_call_operand.hbm [shape: f32[32,128], index: 2, kind: input, shape index: {}]   ;;  %s5076_s3 = inlined_call_operand.vmem [shape: f32[1,128], index: 3, kind: input, shape index: {}]   ;;  %s5077_s4 = inlined_call_operand.hbm [shape: f32[8,256], index: 4, kind: output, shape index: {0}]   ;;  %s5078_s5 = inlined_call_operand.hbm [shape: f32[8,32], index: 5, kind: output, shape index: {1}]   ;;  %s5079_s6 = inlined_call_operand.hbm [shape: f32[8,32], index: 6, kind: output, shape index: {2}]  }
   0x1   :  { %13 = vsyncpa [#allocation6], 0 }
   0x2   :  { %14 = vsyncpa [#allocation4], 0 }
   0x3   :  { %15 = vsyncpa [#allocation10], 0  ;;  %s3940_s21 = smov [#allocation5]   ;;  %s3941_s23 = smov [#allocation2]  }
   0x4   :  { %s33_s22 = sshll.u32 %s3940_s21, 4  ;;  %s21_s24 = sshll.u32 %s3941_s23, 4  ;;  %s34_s22 = int_to_ptr.vmem [resolvable:$true] %s33_s22  ;;  %s22_s24 = int_to_ptr.vmem [resolvable:$true] %s21_s24 }
   0x5   :  { %s3820_s25 = scalar_lea.vmem %s34_s22, 256  ;;  %p3825_p1 = scmp.lt.s32.totalorder %s34_s22, %s34_s22 }
   0x6   :  { %p3821_p0 = scmp.ne.s32.totalorder %s34_s22, %s3820_s25  ;;  %p3826_p2 = scmp.lt.s32.totalorder %s3820_s25, %s3820_s25 }
   0x8   :  { %p3827_p3 = por %p3826_p2, %p3825_p1 }
   0xa   :  { %p3828_p4 = pnand %p3827_p3, %p3821_p0 }
   0xc   :  { %3831 = shalt.err (!%p3828_p4)
}
   0xd   :  { %s3942_s26 = smov 128   ;;  %s3943_s27 = smov 8  }
   0xe   :  { %39 = dma.hbm_to_vmem [thread:$0]  %s5074_s1, 256, %s34_s22, [#allocation6], %s3942_s26, %s3942_s26, %s3943_s27  }
   0xf   :  { %s3840_s30 = scalar_lea.vmem %s22_s24, 1024  ;;  %p3845_p6 = scmp.lt.s32.totalorder %s22_s24, %s22_s24 }
  0x10   :  { %p3841_p5 = scmp.ne.s32.totalorder %s22_s24, %s3840_s30  ;;  %p3846_p7 = scmp.lt.s32.totalorder %s3840_s30, %s3840_s30 }
  0x12   :  { %p3847_p8 = por %p3846_p7, %p3845_p6 }
  0x14   :  { %p3848_p9 = pnand %p3847_p8, %p3841_p5 }
  0x16   :  { %3851 = shalt.err (!%p3848_p9)
}
  0x17   :  { %27 = dma.hbm_to_vmem [thread:$0]  %s5073_s0, 1024, %s22_s24, [#allocation3], %s3942_s26, %s3942_s26, %s3943_s27  }
  0x18   :  { %s3944_s9 = smov [#allocation7]  }
  0x19   :  { %s45_s10 = sshll.u32 %s3944_s9, 4  ;;  %s46_s10 = int_to_ptr.vmem [resolvable:$true] %s45_s10 }
  0x1a   :  { %s3860_s11 = scalar_lea.vmem %s46_s10, 512  ;;  %p3865_p11 = scmp.lt.s32.totalorder %s46_s10, %s46_s10 }
  0x1b   :  { %p3861_p10 = scmp.ne.s32.totalorder %s46_s10, %s3860_s11  ;;  %p3866_p12 = scmp.lt.s32.totalorder %s3860_s11, %s3860_s11 }
  0x1d   :  { %p3867_p13 = por %p3866_p12, %p3865_p11 }
  0x1f   :  { %p3868_p0 = pnand %p3867_p13, %p3861_p10 }
  0x21   :  { %3871 = shalt.err (!%p3868_p0)
}
  0x22   :  { %51 = dma.hbm_to_vmem [thread:$0]  %s5075_s2, 512, %s46_s10, [#allocation6], %s3942_s26, %s3942_s26, %s3943_s27  }
  0x23   :  { %3932 = dma.done.wait [#allocation3], 1024  }
  0x24   :  { %3933 = vsyncadd [#allocation3], 4294966272 }
  0x25   :  { %3934 = dma.done.wait [#allocation6], 768  }
  0x26   :  { %3935 = vsyncadd [#allocation6], 4294966528  ;;  %vm67_vm0 = vcmask 261120   ;;  %v3945_v0 = vmov 0.0   ;;  %vm3946_vm1 = vmmov 0   ;;  %v79_v1 = vld [vmem:[#allocation5 + $0x8] sm:$0xff] }
  0x27   :  { %3195 = vmatprep.subr.mxu1 %v3945_v0  ;;  %3203 = vmatprep.mubr.msk.f32.mxu1 %vm3946_vm1, %v3945_v0  ;;  %68 = vst.msk [vmem:[#allocation9] sm:$0xff] %vm67_vm0, %v3945_v0  ;;  %69 = vst.msk [vmem:[#allocation11] sm:$0xff] %vm67_vm0, %v3945_v0  ;;  %v4004_v2 = vld [vmem:[#allocation7 + $0x18] sm:$0xff]  ;;  %v78_v3 = vld [vmem:[#allocation5] sm:$0xff]  ;;  %vm87_vm2 = vcmask 130048   ;;  %vm554_vm3 = vcmask 1041409  }
  0x28   :  { %3179 = vmatprep.subr.mxu0 %v79_v1  ;;  %3196 = vmatpush3.msra.mxu1 %v4004_v2  ;;  %v4007_v4 = vld [vmem:[#allocation7 + $0x10] sm:$0xff]  ;;  %v71_v6 = vld [vmem:[#allocation2 + $0x8] sm:$0xff]  ;;  %v4011_v7 = vld [vmem:[#allocation7 + $0x8] sm:$0xff]  ;;  %vm557_vm4 = vcmask 1042434   ;;  %vm560_vm5 = vcmask 1043459   ;;  %vm563_vm6 = vcmask 1044484  }
  0x29   :  { %v70_v5 = vld [vmem:[#allocation2] sm:$0xff]  ;;  %3180 = vmatpush3.msra.mxu0 %v79_v1  ;;  %3197 = vmatprep.subr.mxu1 %v3945_v0  ;;  %v72_v8 = vld [vmem:[#allocation2 + $0x10] sm:$0xff]  ;;  %v73_v11 = vld [vmem:[#allocation2 + $0x18] sm:$0xff]  ;;  %vm566_vm7 = vcmask 1045509   ;;  %vm569_vm8 = vcmask 1046534   ;;  %vm572_vm9 = vcmask 1047559  }
  0x2a   :  { %3181 = vmatprep.subr.mxu0 %v78_v3  ;;  %3198 = vmatpush3.msra.mxu1 %v4007_v4  ;;  %v4016_v9 = vld [vmem:[#allocation7] sm:$0xff]  ;;  %v74_v12 = vld [vmem:[#allocation2 + $0x20] sm:$0xff]  ;;  %v75_v13 = vld [vmem:[#allocation2 + $0x28] sm:$0xff]  ;;  %s3948_s13 = smov 64   ;;  %s3949_s14 = smov 96   ;;  %vm915_vm10 = vcmask 523520  }
  0x2b   :  { %3182 = vmatpush3.msra.mxu0 %v78_v3  ;;  %3183 = vmatprep.mubr.msk.f32.mxu0 %vm87_vm2, %v70_v5  ;;  %v76_v14 = vld [vmem:[#allocation2 + $0x30] sm:$0xff]  ;;  %v77_v15 = vld [vmem:[#allocation2 + $0x38] sm:$0xff]  ;;  %v3048_v17 = vld [vmem:[%s5076_s3] ss:$0 sm:$0xff]  ;;  %s3947_s3 = smov 32   ;;  %vm1254_vm11 = vcmask 785920  }
  0x2c   :  { %3199 = vmatprep.subr.mxu1 %v3945_v0  ;;  %3184 = vmatmul.mubr.msk.f32.vlgmr.msra.gmra.mxu0 %vm87_vm2, %v71_v6  ;;  %vm1595_vm12 = vcmask 1048320   ;;  %vm2972_vm13 = vcmask 261127   ;;  %s3950_s15 = smov [#allocation9]   ;;  %vm2974_vm14 = vcmask 260096   ;;  %s3951_s17 = smov [#allocation8]  }
  0x2d   :  { %3200 = vmatpush3.msra.mxu1 %v4011_v7  ;;  %3186 = vmatprep.mubr.msk.f32.mxu0 %vm87_vm2, %v72_v8  ;;  %s3021_s16 = sshll.u32 %s3950_s15, 4  ;;  %s3011_s18 = sshll.u32 %s3951_s17, 4  ;;  %s3022_s16 = int_to_ptr.vmem [resolvable:$true] %s3021_s16  ;;  %s3012_s18 = int_to_ptr.vmem [resolvable:$true] %s3011_s18 }
  0x2e   :  { %v221_v10 = vld [vmem:[#allocation9] sm:$0xff]  ;;  %3201 = vmatprep.subr.mxu1 %v3945_v0  ;;  %3217 = vmatprep.subr.mxu0 %v3945_v0  ;;  %v222_v56 = vld [vmem:[#allocation11] sm:$0xff]  ;;  %s3872_s19 = scalar_lea.vmem %s3022_s16, 128  ;;  %p3877_p2 = scmp.lt.s32.totalorder %s3022_s16, %s3022_s16 }
  0x2f   :  { %3202 = vmatpush3.msra.mxu1 %v4016_v9  ;;  %3218 = vmatpush3.msra.mxu0 %v4004_v2  ;;  %v379_v59 = vrot.slane %v222_v56, 2  ;;  %v378_v60 = vrot.slane %v222_v56, 1  ;;  %v380_v61 = vrot.slane %v222_v56, 3  ;;  %v381_v62 = vrot.slane %v222_v56, 4  ;;  %p3873_p1 = scmp.ne.s32.totalorder %s3022_s16, %s3872_s19  ;;  %p3878_p3 = scmp.lt.s32.totalorder %s3872_s19, %s3872_s19 }
  0x30   :  { %3204 = vmatmul.mubr.msk.f32.vlgmr.msra.gmra.mxu1 %vm67_vm0, %v221_v10  ;;  %3187 = vmatmul.mubr.msk.f32.gmra.mxu0 %vm87_vm2, %v73_v11  ;;  %v383_v63 = vrot.slane %v222_v56, 6  ;;  %v382_v1 = vrot.slane %v222_v56, 5  ;;  %v384_v3 = vrot.slane %v222_v56, 7 }
  0x31   :  { %3189 = vmatprep.mubr.msk.f32.mxu0 %vm87_vm2, %v74_v12  ;;  %3206 = vmatprep.subr.mxu1 %v3945_v0  ;;  %p3879_p4 = por %p3878_p3, %p3877_p2 }
  0x32   :  { %3207 = vmatpush3.msra.mxu1 %v4004_v2  ;;  %3214 = vmatprep.mubr.msk.f32.mxu1 %vm3946_vm1, %v3945_v0 }
  0x33   :  { %3208 = vmatprep.subr.mxu1 %v3945_v0  ;;  %3219 = vmatprep.subr.mxu0 %v3945_v0  ;;  %p3880_p5 = pnand %p3879_p4, %p3873_p1 }
  0x34   :  { %3190 = vmatmul.mubr.msk.f32.gmra.mxu0 %vm87_vm2, %v75_v13  ;;  %3209 = vmatpush3.msra.mxu1 %v4007_v4 }
  0x35   :  { %3192 = vmatprep.mubr.msk.f32.mxu0 %vm87_vm2, %v76_v14  ;;  %3210 = vmatprep.subr.mxu1 %v3945_v0 }
  0x36   :  { %3211 = vmatpush3.msra.mxu1 %v4011_v7  ;;  %3220 = vmatpush3.msra.mxu0 %v4007_v4 }
  0x37   :  { %3212 = vmatprep.subr.mxu1 %v3945_v0  ;;  %3221 = vmatprep.subr.mxu0 %v3945_v0 }
  0x38   :  { %3193 = vmatmul.mubr.msk.f32.gmra.mxu0 %vm87_vm2, %v77_v15  ;;  %3213 = vmatpush3.msra.mxu1 %v4016_v9 }
  0x39   :  { %3222 = vmatpush3.msra.mxu0 %v4011_v7  ;;  %3225 = vmatprep.mubr.msk.f32.mxu0 %vm3946_vm1, %v3945_v0 }
  0x3a   :  { %3223 = vmatprep.subr.mxu0 %v3945_v0  ;;  %3228 = vmatprep.subr.mxu1 %v3945_v0 }
  0x3b   :  { %3224 = vmatpush3.msra.mxu0 %v4016_v9 }
  0x3c   :  { %3239 = vmatprep.subr.mxu0 %v3945_v0 }
  0xec   :  { %v3185_v16 = vpop.f32.mrf.mxu0 }
  0xed   :  { %v4058_v25 = vadd.f32 %v3185_v16, %v3048_v17 }
  0xee   :  { %v178_v18 = vpop.f32.mrf.mxu0 }
  0xef   :  { %v4053_v19 = vadd.f32 %v3048_v17, %v178_v18 }
  0xf0   :  { %v293_v20 = vpop.f32.mrf.mxu1  ;;  %v3188_v21 = vpop.f32.mrf.mxu0 }
  0xf1   :  { %v4056_v24 = vadd.f32 %v293_v20, %v4053_v19  ;;  %v298_v26 = vrot.slane %v293_v20, 1  ;;  %v300_v27 = vrot.slane %v293_v20, 3  ;;  %v4060_v28 = vadd.f32 %v3188_v21, %v3048_v17 }
  0xf2   :  { %v3205_v22 = vpop.f32.mrf.mxu1  ;;  %v188_v23 = vpop.f32.mrf.mxu0  ;;  %v299_v33 = vrot.slane %v293_v20, 2  ;;  %v302_v37 = vrot.slane %v293_v20, 5  ;;  %v301_v42 = vrot.slane %v293_v20, 4  ;;  %v304_v45 = vrot.slane %v293_v20, 7 }
  0xf3   :  { %3296 = vtanh.f32 %v4056_v24  ;;  %v314_v30 = vadd.f32 %v298_v26, %v4058_v25  ;;  %v4064_v31 = vadd.f32 %v3048_v17, %v188_v23  ;;  %v316_v34 = vadd.f32 %v300_v27, %v4060_v28 }
  0xf4   :  { %v3191_v29 = vpop.f32.mrf.mxu0  ;;  %v303_v46 = vrot.slane %v293_v20, 6  ;;  %v3058_v5 = vmul.f32 -1.442695, %v4056_v24 }
  0xf5   :  { %3298 = vtanh.f32 %v314_v30  ;;  %v4067_v35 = vadd.f32 %v3191_v29, %v3048_v17  ;;  %v315_v38 = vadd.f32 %v299_v33, %v4064_v31  ;;  %v3059_v6 = vmul.f32 -1.442695, %v314_v30 }
  0xf6   :  { %v198_v32 = vpop.f32.mrf.mxu0  ;;  %3300 = vtanh.f32 %v316_v34  ;;  %v3061_v8 = vmul.f32 -1.442695, %v316_v34 }
  0xf7   :  { %v4070_v39 = vadd.f32 %v3048_v17, %v198_v32  ;;  %v318_v43 = vadd.f32 %v302_v37, %v4067_v35  ;;  %3302 = vtanh.f32 %v315_v38  ;;  %v3060_v10 = vmul.f32 -1.442695, %v315_v38 }
  0xf8   :  { %v3194_v36 = vpop.f32.mrf.mxu0 }
  0xf9   :  { %v4072_v41 = vadd.f32 %v3194_v36, %v3048_v17  ;;  %v317_v47 = vadd.f32 %v301_v42, %v4070_v39  ;;  %3304 = vtanh.f32 %v318_v43  ;;  %v3063_v11 = vmul.f32 -1.442695, %v318_v43 }
  0xfa   :  { %v208_v40 = vpop.f32.mrf.mxu0 }
  0xfb   :  { %v4075_v44 = vadd.f32 %v3048_v17, %v208_v40  ;;  %v320_v48 = vadd.f32 %v304_v45, %v4072_v41  ;;  %3306 = vtanh.f32 %v317_v47  ;;  %v3062_v12 = vmul.f32 -1.442695, %v317_v47 }
  0xfd   :  { %v319_v49 = vadd.f32 %v303_v46, %v4075_v44  ;;  %3308 = vtanh.f32 %v320_v48  ;;  %v3065_v15 = vmul.f32 -1.442695, %v320_v48 }
  0xff   :  { %3310 = vtanh.f32 %v319_v49  ;;  %v3064_v14 = vmul.f32 -1.442695, %v319_v49 }
 0x100   :  { %v3297_v50 = vpop.eup %3296  ;;  %3312 = vpow2.f32 %v3058_v5 }
 0x101   :  { %425 = vrot.lane.b32.xlu1 %v3297_v50, %s3947_s3  ;;  %3314 = vpow2.f32 %v3059_v6 }
 0x102   :  { %v3299_v51 = vpop.eup %3298  ;;  %3316 = vpow2.f32 %v3061_v8 }
 0x103   :  { %427 = vrot.lane.b32.xlu0 %v3299_v51, %s3947_s3  ;;  %v3301_v52 = vpop.eup %3300  ;;  %3318 = vpow2.f32 %v3060_v10 }
 0x104   :  { %v3303_v53 = vpop.eup %3302  ;;  %3320 = vpow2.f32 %v3063_v11 }
 0x105   :  { %431 = vrot.lane.b32.xlu1 %v3301_v52, %s3947_s3  ;;  %3322 = vpow2.f32 %v3062_v12 }
 0x106   :  { %v3305_v54 = vpop.eup %3304  ;;  %3324 = vpow2.f32 %v3064_v14 }
 0x107   :  { %429 = vrot.lane.b32.xlu0 %v3303_v53, %s3947_s3  ;;  %3326 = vpow2.f32 %v3065_v15 }
 0x108   :  { %v3307_v55 = vpop.eup %3306 }
 0x109   :  { %435 = vrot.lane.b32.xlu1 %v3305_v54, %s3947_s3 }
 0x10a   :  { %v3309_v57 = vpop.eup %3308 }
 0x10b   :  { %433 = vrot.lane.b32.xlu0 %v3307_v55, %s3947_s3 }
 0x10c   :  { %v3311_v58 = vpop.eup %3310 }
 0x10d   :  { %439 = vrot.lane.b32.xlu1 %v3309_v57, %s3947_s3  ;;  %v3313_v13 = vpop.eup %3312 }
 0x10e   :  { %v345_v16 = vadd.f32 1.0, %v3313_v13  ;;  %v3315_v17 = vpop.eup %3314 }
 0x10f   :  { %437 = vrot.lane.b32.xlu0 %v3311_v58, %s3947_s3  ;;  %v346_v18 = vadd.f32 1.0, %v3315_v17  ;;  %v3317_v20 = vpop.eup %3316 }
 0x110   :  { %3328 = vrcp.f32 %v345_v16  ;;  %v3319_v21 = vpop.eup %3318  ;;  %v348_v22 = vadd.f32 1.0, %v3317_v20 }
 0x111   :  { %389 = vrot.lane.b32.xlu1 %v379_v59, %s3947_s3  ;;  %3330 = vrcp.f32 %v346_v18  ;;  %v3321_v23 = vpop.eup %3320  ;;  %v347_v24 = vadd.f32 1.0, %v3319_v21 }
 0x112   :  { %3332 = vrcp.f32 %v348_v22  ;;  %v350_v26 = vadd.f32 1.0, %v3321_v23  ;;  %v3323_v27 = vpop.eup %3322 }
 0x113   :  { %387 = vrot.lane.b32.xlu0 %v378_v60, %s3947_s3  ;;  %3334 = vrcp.f32 %v347_v24  ;;  %v3325_v29 = vpop.eup %3324  ;;  %v349_v32 = vadd.f32 1.0, %v3323_v27 }
 0x114   :  { %v3327_v30 = vpop.eup %3326  ;;  %3336 = vrcp.f32 %v350_v26  ;;  %v351_v37 = vadd.f32 1.0, %v3325_v29 }
 0x115   :  { %391 = vrot.lane.b32.xlu1 %v380_v61, %s3947_s3  ;;  %3338 = vrcp.f32 %v349_v32  ;;  %v352_v40 = vadd.f32 1.0, %v3327_v30 }
 0x116   :  { %3340 = vrcp.f32 %v351_v37 }
 0x117   :  { %385 = vrot.lane.b32.xlu0 %v222_v56, %s3947_s3  ;;  %3342 = vrcp.f32 %v352_v40 }
 0x119   :  { %393 = vrot.lane.b32.xlu1 %v381_v62, %s3947_s3 }
 0x11b   :  { %397 = vrot.lane.b32.xlu0 %v383_v63, %s3947_s3 }
 0x11d   :  { %395 = vrot.lane.b32.xlu1 %v382_v1, %s3947_s3  ;;  %v4097_v33 = vpop.eup %3328 }
 0x11e   :  { %v4101_v42 = vpop.eup %3330 }
 0x11f   :  { %399 = vrot.lane.b32.xlu0 %v384_v3, %s3947_s3  ;;  %v4105_v45 = vpop.eup %3332 }
 0x120   :  { %v4108_v48 = vpop.eup %3334 }
 0x121   :  { %v4112_v51 = vpop.eup %3336 }
 0x122   :  { %v4117_v55 = vpop.eup %3338 }
 0x123   :  { %v4120_v57 = vpop.eup %3340 }
 0x124   :  { %v4124_v61 = vpop.eup %3342 }
 0x173   :  { %v426_v34 = vpop.permute.xlu1 %425 }
 0x174   :  { %v449_v36 = vmul.f32 %v4097_v33, %v426_v34 }
 0x175   :  { %v428_v38 = vpop.permute.xlu0 %427 }
 0x176   :  { %465 = vrot.lane.b32.xlu0 %v449_v36, %s3947_s3  ;;  %v450_v43 = vmul.f32 %v4101_v42, %v428_v38 }
 0x177   :  { %v432_v46 = vpop.permute.xlu1 %431 }
 0x178   :  { %v452_v47 = vmul.f32 %v4105_v45, %v432_v46 }
 0x179   :  { %v430_v49 = vpop.permute.xlu0 %429 }
 0x17a   :  { %467 = vrot.lane.b32.xlu0 %v450_v43, %s3947_s3  ;;  %v451_v50 = vmul.f32 %v4108_v48, %v430_v49  ;;  %471 = vrot.lane.b32.xlu1 %v452_v47, %s3947_s3 }
 0x17b   :  { %v436_v52 = vpop.permute.xlu1 %435 }
 0x17c   :  { %v454_v53 = vmul.f32 %v4112_v51, %v436_v52 }
 0x17d   :  { %v434_v54 = vpop.permute.xlu0 %433 }
 0x17e   :  { %469 = vrot.lane.b32.xlu0 %v451_v50, %s3947_s3  ;;  %475 = vrot.lane.b32.xlu1 %v454_v53, %s3947_s3  ;;  %v453_v56 = vmul.f32 %v4117_v55, %v434_v54 }
 0x17f   :  { %v440_v58 = vpop.permute.xlu1 %439 }
 0x180   :  { %v456_v62 = vmul.f32 %v4124_v61, %v440_v58 }
 0x181   :  { %v438_v59 = vpop.permute.xlu0 %437 }
 0x182   :  { %v455_v60 = vmul.f32 %v4120_v57, %v438_v59  ;;  %473 = vrot.lane.b32.xlu1 %v453_v56, %s3947_s3 }
 0x183   :  { %v390_v3 = vpop.permute.xlu1 %389 }
 0x184   :  { %477 = vrot.lane.b32.xlu0 %v455_v60, %s3947_s3  ;;  %v411_v21 = vmul.f32 %v4108_v48, %v390_v3 }
 0x185   :  { %v388_v63 = vpop.permute.xlu0 %387 }
 0x186   :  { %479 = vrot.lane.b32.xlu1 %v456_v62, %s3947_s3  ;;  %v410_v14 = vmul.f32 %v4101_v42, %v388_v63 }
 0x187   :  { %v392_v6 = vpop.permute.xlu1 %391 }
 0x188   :  { %v412_v18 = vmul.f32 %v4105_v45, %v392_v6 }
 0x189   :  { %v386_v1 = vpop.permute.xlu0 %385 }
 0x18a   :  { %v409_v11 = vmul.f32 %v4097_v33, %v386_v1 }
 0x18b   :  { %v394_v10 = vpop.permute.xlu1 %393 }
 0x18c   :  { %v413_v30 = vmul.f32 %v4117_v55, %v394_v10 }
 0x18d   :  { %v398_v5 = vpop.permute.xlu0 %397 }
 0x18e   :  { %v415_v36 = vmul.f32 %v4120_v57, %v398_v5 }
 0x18f   :  { %v396_v15 = vpop.permute.xlu1 %395 }
 0x190   :  { %v414_v26 = vmul.f32 %v4112_v51, %v396_v15 }
 0x191   :  { %v400_v8 = vpop.permute.xlu0 %399 }
 0x192   :  { %v416_v40 = vmul.f32 %v4124_v61, %v400_v8 }
 0x1e8   :  { %v466_v12 = vpop.permute.xlu0 %465 }
 0x1e9   :  { %v4130_v13 = vadd.f32 %v466_v12, %v409_v11 }
 0x1eb   :  { %3344 = vtanh.f32 %v4130_v13 }
 0x1ec   :  { %v468_v16 = vpop.permute.xlu0 %467  ;;  %v472_v20 = vpop.permute.xlu1 %471 }
 0x1ed   :  { %v4134_v17 = vadd.f32 %v468_v16, %v410_v14  ;;  %v4139_v22 = vadd.f32 %v472_v20, %v412_v18 }
 0x1ef   :  { %3346 = vtanh.f32 %v4134_v17 }
 0x1f0   :  { %v470_v23 = vpop.permute.xlu0 %469  ;;  %3348 = vtanh.f32 %v4139_v22  ;;  %v476_v27 = vpop.permute.xlu1 %475 }
 0x1f1   :  { %v4142_v24 = vadd.f32 %v470_v23, %v411_v21  ;;  %v4146_v29 = vadd.f32 %v476_v27, %v414_v26 }
 0x1f3   :  { %3350 = vtanh.f32 %v4142_v24 }
 0x1f4   :  { %v474_v34 = vpop.permute.xlu1 %473  ;;  %3352 = vtanh.f32 %v4146_v29 }
 0x1f5   :  { %v4150_v37 = vadd.f32 %v474_v34, %v413_v30 }
 0x1f6   :  { %v478_v38 = vpop.permute.xlu0 %477 }
 0x1f7   :  { %3354 = vtanh.f32 %v4150_v37  ;;  %v4156_v43 = vadd.f32 %v478_v38, %v415_v36 }
 0x1f8   :  { %v3345_v32 = vpop.eup %3344  ;;  %v480_v47 = vpop.permute.xlu1 %479 }
 0x1f9   :  { %513 = vrot.lane.b32.xlu0 %v3345_v32, %s3947_s3  ;;  %v4158_v49 = vadd.f32 %v480_v47, %v416_v40  ;;  %3356 = vtanh.f32 %v4156_v43 }
 0x1fb   :  { %3358 = vtanh.f32 %v4158_v49 }
 0x1fc   :  { %v3347_v46 = vpop.eup %3346 }
 0x1fd   :  { %515 = vrot.lane.b32.xlu0 %v3347_v46, %s3947_s3  ;;  %v3349_v50 = vpop.eup %3348 }
 0x1fe   :  { %519 = vrot.lane.b32.xlu1 %v3349_v50, %s3947_s3 }
 0x200   :  { %v3351_v52 = vpop.eup %3350 }
 0x201   :  { %v3353_v53 = vpop.eup %3352 }
 0x202   :  { %517 = vrot.lane.b32.xlu1 %v3351_v52, %s3947_s3 }
 0x204   :  { %v3355_v54 = vpop.eup %3354 }
 0x205   :  { %521 = vrot.lane.b32.xlu0 %v3355_v54, %s3947_s3 }
 0x206   :  { %523 = vrot.lane.b32.xlu1 %v3353_v53, %s3947_s3  ;;  %v3357_v56 = vpop.eup %3356 }
 0x208   :  { %v3359_v58 = vpop.eup %3358 }
 0x209   :  { %525 = vrot.lane.b32.xlu0 %v3357_v56, %s3947_s3 }
 0x20a   :  { %527 = vrot.lane.b32.xlu1 %v3359_v58, %s3947_s3 }
 0x26b   :  { %v514_v59 = vpop.permute.xlu0 %513 }
 0x26c   :  { %v537_v6 = vmul.f32 %v4097_v33, %v514_v59 }
 0x26f   :  { %v516_v60 = vpop.permute.xlu0 %515 }
 0x270   :  { %v520_v62 = vpop.permute.xlu1 %519  ;;  %v538_v63 = vmul.f32 %v4101_v42, %v516_v60 }
 0x271   :  { %v540_v8 = vmul.f32 %v4105_v45, %v520_v62 }
 0x272   :  { %v553_v1 = vrot.slane %v538_v63, 7 }
 0x273   :  { %v559_v18 = vrot.slane %v540_v8, 5 }
 0x274   :  { %v518_v3 = vpop.permute.xlu1 %517  ;;  %v555_v11 = vsel %vm554_vm3, %v553_v1, %v537_v6 }
 0x275   :  { %v539_v5 = vmul.f32 %v4108_v48, %v518_v3 }
 0x277   :  { %v556_v10 = vrot.slane %v539_v5, 6  ;;  %v522_v14 = vpop.permute.xlu0 %521 }
 0x278   :  { %v524_v12 = vpop.permute.xlu1 %523  ;;  %v541_v42 = vmul.f32 %v4117_v55, %v522_v14 }
 0x279   :  { %v558_v15 = vsel %vm557_vm4, %v556_v10, %v555_v11  ;;  %v542_v16 = vmul.f32 %v4112_v51, %v524_v12 }
 0x27a   :  { %v562_v48 = vrot.slane %v541_v42, 4  ;;  %v561_v33 = vsel %vm560_vm5, %v559_v18, %v558_v15 }
 0x27b   :  { %v565_v20 = vrot.slane %v542_v16, 3  ;;  %v526_v21 = vpop.permute.xlu0 %525 }
 0x27c   :  { %v528_v45 = vpop.permute.xlu1 %527  ;;  %v564_v23 = vsel %vm563_vm6, %v562_v48, %v561_v33  ;;  %v543_v27 = vmul.f32 %v4120_v57, %v526_v21 }
 0x27d   :  { %v544_v26 = vmul.f32 %v4124_v61, %v528_v45  ;;  %v567_v55 = vsel %vm566_vm7, %v565_v20, %v564_v23 }
 0x27e   :  { %v568_v30 = vrot.slane %v543_v27, 2 }
 0x27f   :  { %v571_v51 = vrot.slane %v544_v26, 1 }
 0x280   :  { %v570_v32 = vsel %vm569_vm8, %v568_v30, %v567_v55 }
 0x281   :  { %v573_v34 = vsel %vm572_vm9, %v571_v51, %v570_v32 }
 0x282   :  { %574 = vrot.lane.b32.xlu0 %v573_v34, %s3948_s13 }
 0x2f4   :  { %v575_v36 = vpop.permute.xlu0 %574 }
 0x2f5   :  { %577 = vst.msk [vmem:[#allocation8] sm:$0xff] %vm67_vm0, %v575_v36  ;;  %3215 = vmatmul.mubr.msk.f32.vlgmr.msra.gmra.mxu1 %vm67_vm0, %v575_v36 }
 0x2f6   :  { %3229 = vmatpush3.msra.mxu1 %v4004_v2  ;;  %3236 = vmatprep.mubr.msk.f32.mxu1 %vm3946_vm1, %v3945_v0 }
 0x2f7   :  { %3230 = vmatprep.subr.mxu1 %v3945_v0 }
 0x2f8   :  { %3231 = vmatpush3.msra.mxu1 %v4007_v4 }
 0x2f9   :  { %3232 = vmatprep.subr.mxu1 %v3945_v0 }
 0x2fa   :  { %3233 = vmatpush3.msra.mxu1 %v4011_v7 }
 0x2fb   :  { %3234 = vmatprep.subr.mxu1 %v3945_v0 }
 0x2fc   :  { %3235 = vmatpush3.msra.mxu1 %v4016_v9 }
 0x2fd   :  { %3250 = vmatprep.subr.mxu1 %v3945_v0 }
 0x3b5   :  { %v646_v57 = vpop.f32.mrf.mxu1 }
 0x3b6   :  { %v652_v38 = vrot.slane %v646_v57, 1  ;;  %v651_v40 = vrot.slane %v646_v57, 7  ;;  %v667_v46 = vadd.f32 %v646_v57, %v4058_v25  ;;  %v653_v47 = vrot.slane %v646_v57, 2 }
 0x3b7   :  { %v3216_v61 = vpop.f32.mrf.mxu1  ;;  %v654_v52 = vrot.slane %v646_v57, 3  ;;  %v655_v54 = vrot.slane %v646_v57, 4  ;;  %v656_v58 = vrot.slane %v646_v57, 5  ;;  %v657_v60 = vrot.slane %v646_v57, 6 }
 0x3b8   :  { %v668_v50 = vadd.f32 %v652_v38, %v4064_v31  ;;  %v666_v53 = vadd.f32 %v651_v40, %v4053_v19  ;;  %3360 = vtanh.f32 %v667_v46  ;;  %v669_v56 = vadd.f32 %v653_v47, %v4060_v28 }
 0x3b9   :  { %v670_v59 = vadd.f32 %v654_v52, %v4070_v39  ;;  %v671_v62 = vadd.f32 %v655_v54, %v4067_v35  ;;  %v672_v63 = vadd.f32 %v656_v58, %v4075_v44  ;;  %v673_v1 = vadd.f32 %v657_v60, %v4072_v41 }
 0x3ba   :  { %3362 = vtanh.f32 %v668_v50  ;;  %v3068_v15 = vmul.f32 -1.442695, %v667_v46  ;;  %v3069_v16 = vmul.f32 -1.442695, %v668_v50  ;;  %v3067_v42 = vmul.f32 -1.442695, %v666_v53 }
 0x3bb   :  { %3364 = vtanh.f32 %v666_v53  ;;  %v3070_v18 = vmul.f32 -1.442695, %v669_v56  ;;  %v3071_v48 = vmul.f32 -1.442695, %v670_v59  ;;  %v3072_v20 = vmul.f32 -1.442695, %v671_v62 }
 0x3bc   :  { %3366 = vtanh.f32 %v669_v56  ;;  %v3073_v33 = vmul.f32 -1.442695, %v672_v63  ;;  %v3074_v45 = vmul.f32 -1.442695, %v673_v1 }
 0x3bd   :  { %3368 = vtanh.f32 %v670_v59 }
 0x3be   :  { %3370 = vtanh.f32 %v671_v62 }
 0x3bf   :  { %3372 = vtanh.f32 %v672_v63 }
 0x3c0   :  { %3374 = vtanh.f32 %v673_v1 }
 0x3c1   :  { %3376 = vpow2.f32 %v3068_v15 }
 0x3c2   :  { %3378 = vpow2.f32 %v3069_v16 }
 0x3c3   :  { %3380 = vpow2.f32 %v3067_v42 }
 0x3c4   :  { %3382 = vpow2.f32 %v3070_v18 }
 0x3c5   :  { %v3361_v3 = vpop.eup %3360  ;;  %3384 = vpow2.f32 %v3071_v48 }
 0x3c6   :  { %772 = vrot.lane.b32.xlu1 %v3361_v3, %s3947_s3  ;;  %3386 = vpow2.f32 %v3072_v20  ;;  %v739_v20 = vrot.slane %v4134_v17, 7 }
 0x3c7   :  { %v3363_v5 = vpop.eup %3362  ;;  %3388 = vpow2.f32 %v3073_v33  ;;  %v740_v33 = vrot.slane %v4142_v24, 7 }
 0x3c8   :  { %774 = vrot.lane.b32.xlu0 %v3363_v5, %s3947_s3  ;;  %v3365_v6 = vpop.eup %3364  ;;  %3390 = vpow2.f32 %v3074_v45 }
 0x3c9   :  { %v3367_v8 = vpop.eup %3366 }
 0x3ca   :  { %770 = vrot.lane.b32.xlu1 %v3365_v6, %s3947_s3  ;;  %v3369_v10 = vpop.eup %3368 }
 0x3cb   :  { %v3371_v11 = vpop.eup %3370 }
 0x3cc   :  { %776 = vrot.lane.b32.xlu0 %v3367_v8, %s3947_s3  ;;  %v3373_v12 = vpop.eup %3372 }
 0x3cd   :  { %v3375_v14 = vpop.eup %3374 }
 0x3ce   :  { %778 = vrot.lane.b32.xlu1 %v3369_v10, %s3947_s3  ;;  %v3377_v21 = vpop.eup %3376 }
 0x3cf   :  { %v3379_v23 = vpop.eup %3378  ;;  %v699_v26 = vadd.f32 1.0, %v3377_v21 }
 0x3d0   :  { %780 = vrot.lane.b32.xlu0 %v3371_v11, %s3947_s3  ;;  %v3381_v27 = vpop.eup %3380  ;;  %v700_v51 = vadd.f32 1.0, %v3379_v23 }
 0x3d1   :  { %v3383_v30 = vpop.eup %3382  ;;  %v698_v55 = vadd.f32 1.0, %v3381_v27  ;;  %3392 = vrcp.f32 %v699_v26  ;;  %v738_v26 = vrot.slane %v4130_v13, 7 }
 0x3d2   :  { %782 = vrot.lane.b32.xlu1 %v3373_v12, %s3947_s3  ;;  %v3385_v32 = vpop.eup %3384  ;;  %v701_v34 = vadd.f32 1.0, %v3383_v30  ;;  %3394 = vrcp.f32 %v700_v51  ;;  %v741_v30 = vrot.slane %v4139_v22, 7 }
 0x3d3   :  { %v3387_v36 = vpop.eup %3386  ;;  %v702_v57 = vadd.f32 1.0, %v3385_v32  ;;  %3396 = vrcp.f32 %v698_v55 }
 0x3d4   :  { %784 = vrot.lane.b32.xlu0 %v3375_v14, %s3947_s3  ;;  %v3389_v61 = vpop.eup %3388  ;;  %v703_v38 = vadd.f32 1.0, %v3387_v36  ;;  %3398 = vrcp.f32 %v701_v34  ;;  %v742_v34 = vrot.slane %v4150_v37, 7 }
 0x3d5   :  { %v3391_v40 = vpop.eup %3390  ;;  %v704_v46 = vadd.f32 1.0, %v3389_v61  ;;  %3400 = vrcp.f32 %v702_v57  ;;  %v743_v57 = vrot.slane %v4146_v29, 7 }
 0x3d6   :  { %v705_v47 = vadd.f32 1.0, %v3391_v40  ;;  %3402 = vrcp.f32 %v703_v38 }
 0x3d7   :  { %3404 = vrcp.f32 %v704_v46  ;;  %v744_v46 = vrot.slane %v4156_v43, 7 }
 0x3d8   :  { %3406 = vrcp.f32 %v705_v47 }
 0x3de   :  { %v4213_v50 = vpop.eup %3392 }
 0x3df   :  { %v4215_v53 = vpop.eup %3394  ;;  %v755_v45 = vmul.f32 %v4213_v50, %v739_v20 }
 0x3e0   :  { %v4220_v59 = vpop.eup %3396  ;;  %v756_v23 = vmul.f32 %v4215_v53, %v740_v33 }
 0x3e1   :  { %v4223_v62 = vpop.eup %3398  ;;  %v754_v17 = vmul.f32 %v4220_v59, %v738_v26 }
 0x3e2   :  { %v4228_v5 = vpop.eup %3400  ;;  %v757_v32 = vmul.f32 %v4223_v62, %v741_v30 }
 0x3e3   :  { %v4231_v8 = vpop.eup %3402  ;;  %v758_v22 = vmul.f32 %v4228_v5, %v742_v34 }
 0x3e4   :  { %v4236_v14 = vpop.eup %3404  ;;  %v759_v40 = vmul.f32 %v4231_v8, %v743_v57 }
 0x3e5   :  { %v4239_v16 = vpop.eup %3406  ;;  %v760_v29 = vmul.f32 %v4236_v14, %v744_v46 }
 0x438   :  { %v773_v52 = vpop.permute.xlu1 %772 }
 0x439   :  { %v795_v54 = vmul.f32 %v4213_v50, %v773_v52  ;;  %v745_v52 = vrot.slane %v4158_v49, 7 }
 0x43a   :  { %v775_v56 = vpop.permute.xlu0 %774 }
 0x43b   :  { %v796_v58 = vmul.f32 %v4215_v53, %v775_v56  ;;  %812 = vrot.lane.b32.xlu1 %v795_v54, %s3947_s3 }
 0x43c   :  { %v771_v60 = vpop.permute.xlu1 %770 }
 0x43d   :  { %814 = vrot.lane.b32.xlu0 %v796_v58, %s3947_s3  ;;  %v794_v63 = vmul.f32 %v4220_v59, %v771_v60  ;;  %v761_v58 = vmul.f32 %v4239_v16, %v745_v52 }
 0x43e   :  { %v777_v1 = vpop.permute.xlu0 %776 }
 0x43f   :  { %v797_v3 = vmul.f32 %v4223_v62, %v777_v1  ;;  %810 = vrot.lane.b32.xlu1 %v794_v63, %s3947_s3 }
 0x440   :  { %v779_v6 = vpop.permute.xlu1 %778 }
 0x441   :  { %816 = vrot.lane.b32.xlu0 %v797_v3, %s3947_s3  ;;  %v798_v10 = vmul.f32 %v4228_v5, %v779_v6 }
 0x442   :  { %v781_v11 = vpop.permute.xlu0 %780 }
 0x443   :  { %v799_v12 = vmul.f32 %v4231_v8, %v781_v11  ;;  %818 = vrot.lane.b32.xlu1 %v798_v10, %s3947_s3 }
 0x444   :  { %v783_v15 = vpop.permute.xlu1 %782 }
 0x445   :  { %820 = vrot.lane.b32.xlu0 %v799_v12, %s3947_s3  ;;  %v800_v42 = vmul.f32 %v4236_v14, %v783_v15 }
 0x446   :  { %v785_v18 = vpop.permute.xlu0 %784 }
 0x447   :  { %v801_v48 = vmul.f32 %v4239_v16, %v785_v18  ;;  %822 = vrot.lane.b32.xlu1 %v800_v42, %s3947_s3 }
 0x449   :  { %824 = vrot.lane.b32.xlu0 %v801_v48, %s3947_s3 }
 0x4ad   :  { %v813_v21 = vpop.permute.xlu1 %812 }
 0x4ae   :  { %v4250_v27 = vadd.f32 %v813_v21, %v755_v45 }
 0x4af   :  { %v815_v51 = vpop.permute.xlu0 %814 }
 0x4b0   :  { %v4253_v55 = vadd.f32 %v815_v51, %v756_v23  ;;  %3408 = vtanh.f32 %v4250_v27 }
 0x4b1   :  { %v811_v24 = vpop.permute.xlu1 %810 }
 0x4b2   :  { %3410 = vtanh.f32 %v4253_v55  ;;  %v4260_v36 = vadd.f32 %v811_v24, %v754_v17 }
 0x4b3   :  { %v817_v13 = vpop.permute.xlu0 %816 }
 0x4b4   :  { %v4263_v61 = vadd.f32 %v817_v13, %v757_v32  ;;  %3412 = vtanh.f32 %v4260_v36 }
 0x4b5   :  { %v819_v38 = vpop.permute.xlu1 %818 }
 0x4b6   :  { %3414 = vtanh.f32 %v4263_v61  ;;  %v4270_v47 = vadd.f32 %v819_v38, %v758_v22 }
 0x4b7   :  { %v821_v37 = vpop.permute.xlu0 %820 }
 0x4b8   :  { %v4273_v54 = vadd.f32 %v821_v37, %v759_v40  ;;  %3416 = vtanh.f32 %v4270_v47 }
 0x4b9   :  { %v823_v56 = vpop.permute.xlu1 %822 }
 0x4ba   :  { %3418 = vtanh.f32 %v4273_v54  ;;  %v4279_v60 = vadd.f32 %v823_v56, %v760_v29 }
 0x4bb   :  { %v825_v63 = vpop.permute.xlu0 %824 }
 0x4bc   :  { %v4281_v43 = vadd.f32 %v825_v63, %v761_v58  ;;  %3420 = vtanh.f32 %v4279_v60 }
 0x4bd   :  { %v3409_v1 = vpop.eup %3408 }
 0x4be   :  { %3422 = vtanh.f32 %v4281_v43  ;;  %860 = vrot.lane.b32.xlu1 %v3409_v1, %s3947_s3 }
 0x4bf   :  { %v3411_v49 = vpop.eup %3410 }
 0x4c0   :  { %862 = vrot.lane.b32.xlu0 %v3411_v49, %s3947_s3 }
 0x4c1   :  { %v3413_v3 = vpop.eup %3412 }
 0x4c2   :  { %858 = vrot.lane.b32.xlu1 %v3413_v3, %s3947_s3 }
 0x4c3   :  { %v3415_v6 = vpop.eup %3414 }
 0x4c4   :  { %864 = vrot.lane.b32.xlu0 %v3415_v6, %s3947_s3 }
 0x4c5   :  { %v3417_v10 = vpop.eup %3416 }
 0x4c6   :  { %866 = vrot.lane.b32.xlu1 %v3417_v10, %s3947_s3 }
 0x4c7   :  { %v3419_v11 = vpop.eup %3418 }
 0x4c8   :  { %868 = vrot.lane.b32.xlu0 %v3419_v11, %s3947_s3 }
 0x4c9   :  { %v3421_v12 = vpop.eup %3420 }
 0x4ca   :  { %870 = vrot.lane.b32.xlu1 %v3421_v12, %s3947_s3 }
 0x4cb   :  { %v3423_v15 = vpop.eup %3422 }
 0x4cc   :  { %872 = vrot.lane.b32.xlu0 %v3423_v15, %s3947_s3 }
 0x530   :  { %v861_v42 = vpop.permute.xlu1 %860 }
 0x531   :  { %v883_v23 = vmul.f32 %v4213_v50, %v861_v42 }
 0x532   :  { %v863_v18 = vpop.permute.xlu0 %862 }
 0x533   :  { %v884_v48 = vmul.f32 %v4215_v53, %v863_v18 }
 0x534   :  { %v859_v20 = vpop.permute.xlu1 %858 }
 0x535   :  { %v882_v33 = vmul.f32 %v4220_v59, %v859_v20  ;;  %v900_v51 = vrot.slane %v884_v48, 7 }
 0x536   :  { %v865_v45 = vpop.permute.xlu0 %864 }
 0x537   :  { %v885_v21 = vmul.f32 %v4223_v62, %v865_v45  ;;  %v898_v26 = vrot.slane %v882_v33, 1 }
 0x538   :  { %v867_v17 = vpop.permute.xlu1 %866 }
 0x539   :  { %v902_v30 = vrot.slane %v885_v21, 6  ;;  %v899_v24 = vsel %vm554_vm3, %v883_v23, %v898_v26  ;;  %v886_v32 = vmul.f32 %v4228_v5, %v867_v17 }
 0x53a   :  { %v869_v34 = vpop.permute.xlu0 %868  ;;  %v901_v13 = vsel %vm557_vm4, %v900_v51, %v899_v24 }
 0x53b   :  { %v887_v53 = vmul.f32 %v4231_v8, %v869_v34  ;;  %v903_v59 = vsel %vm560_vm5, %v902_v30, %v901_v13  ;;  %v904_v57 = vrot.slane %v886_v32, 5 }
 0x53c   :  { %v871_v62 = vpop.permute.xlu1 %870 }
 0x53d   :  { %v906_v22 = vrot.slane %v887_v53, 4  ;;  %v905_v50 = vsel %vm563_vm6, %v904_v57, %v903_v59  ;;  %v888_v38 = vmul.f32 %v4236_v14, %v871_v62 }
 0x53e   :  { %v873_v40 = vpop.permute.xlu0 %872 }
 0x53f   :  { %v889_v46 = vmul.f32 %v4239_v16, %v873_v40  ;;  %v907_v37 = vsel %vm566_vm7, %v906_v22, %v905_v50  ;;  %v908_v5 = vrot.slane %v888_v38, 3 }
 0x541   :  { %v910_v52 = vrot.slane %v889_v46, 2  ;;  %v909_v29 = vsel %vm569_vm8, %v908_v5, %v907_v37 }
 0x543   :  { %v4308_v8 = vsel %vm572_vm9, %v910_v52, %v909_v29 }
 0x544   :  { %917 = vrot.lane.b32.xlu1 %v4308_v8, %s3948_s13 }
 0x5b6   :  { %v918_v56 = vpop.permute.xlu1 %917 }
 0x5b7   :  { %3226 = vmatmul.mubr.msk.f32.vlgmr.msra.gmra.mxu0 %vm67_vm0, %v918_v56 }
 0x5b8   :  { %3240 = vmatpush3.msra.mxu0 %v4004_v2  ;;  %3247 = vmatprep.mubr.msk.f32.mxu0 %vm3946_vm1, %v3945_v0 }
 0x5b9   :  { %3241 = vmatprep.subr.mxu0 %v3945_v0 }
 0x5ba   :  { %3242 = vmatpush3.msra.mxu0 %v4007_v4 }
 0x5bb   :  { %3243 = vmatprep.subr.mxu0 %v3945_v0 }
 0x5bc   :  { %3244 = vmatpush3.msra.mxu0 %v4011_v7 }
 0x5bd   :  { %3245 = vmatprep.subr.mxu0 %v3945_v0 }
 0x5be   :  { %3246 = vmatpush3.msra.mxu0 %v4016_v9 }
 0x5bf   :  { %3261 = vmatprep.subr.mxu0 %v3945_v0 }
 0x677   :  { %v987_v14 = vpop.f32.mrf.mxu0 }
 0x678   :  { %v992_v16 = vrot.slane %v987_v14, 6  ;;  %v994_v63 = vrot.slane %v987_v14, 1  ;;  %v993_v1 = vrot.slane %v987_v14, 7  ;;  %v1009_v4 = vadd.f32 %v987_v14, %v4064_v31 }
 0x679   :  { %v3227_v2 = vpop.f32.mrf.mxu0  ;;  %v995_v49 = vrot.slane %v987_v14, 2  ;;  %v996_v7 = vrot.slane %v987_v14, 3  ;;  %v997_v9 = vrot.slane %v987_v14, 4  ;;  %v998_v12 = vrot.slane %v987_v14, 5 }
 0x67a   :  { %v1007_v58 = vadd.f32 %v992_v16, %v4053_v19  ;;  %v1010_v3 = vadd.f32 %v994_v63, %v4060_v28  ;;  %v1008_v6 = vadd.f32 %v993_v1, %v4058_v25  ;;  %v3078_v30 = vmul.f32 -1.442695, %v1009_v4 }
 0x67b   :  { %v1011_v10 = vadd.f32 %v995_v49, %v4070_v39  ;;  %v1012_v15 = vadd.f32 %v996_v7, %v4067_v35  ;;  %v1013_v42 = vadd.f32 %v997_v9, %v4075_v44  ;;  %v1014_v18 = vadd.f32 %v998_v12, %v4072_v41 }
 0x67c   :  { %3424 = vtanh.f32 %v1007_v58  ;;  %v3076_v51 = vmul.f32 -1.442695, %v1007_v58  ;;  %v3079_v17 = vmul.f32 -1.442695, %v1010_v3  ;;  %v3077_v24 = vmul.f32 -1.442695, %v1008_v6 }
 0x67d   :  { %3426 = vtanh.f32 %v1009_v4  ;;  %v3080_v32 = vmul.f32 -1.442695, %v1011_v10  ;;  %v3081_v13 = vmul.f32 -1.442695, %v1012_v15  ;;  %v3082_v53 = vmul.f32 -1.442695, %v1013_v42 }
 0x67e   :  { %3428 = vtanh.f32 %v1010_v3  ;;  %v3083_v57 = vmul.f32 -1.442695, %v1014_v18 }
 0x67f   :  { %3430 = vtanh.f32 %v1008_v6 }
 0x680   :  { %3432 = vtanh.f32 %v1011_v10 }
 0x681   :  { %3434 = vtanh.f32 %v1012_v15 }
 0x682   :  { %3436 = vtanh.f32 %v1013_v42 }
 0x683   :  { %3438 = vtanh.f32 %v1014_v18 }
 0x684   :  { %3440 = vpow2.f32 %v3076_v51 }
 0x685   :  { %3442 = vpow2.f32 %v3078_v30 }
 0x686   :  { %3444 = vpow2.f32 %v3079_v17  ;;  %v1079_v17 = vrot.slane %v4260_v36, 7 }
 0x687   :  { %3446 = vpow2.f32 %v3077_v24 }
 0x688   :  { %3448 = vpow2.f32 %v3080_v32 }
 0x689   :  { %v3425_v11 = vpop.eup %3424  ;;  %3450 = vpow2.f32 %v3081_v13  ;;  %v1081_v13 = vrot.slane %v4253_v55, 7 }
 0x68a   :  { %1111 = vrot.lane.b32.xlu0 %v3425_v11, %s3947_s3  ;;  %v3427_v48 = vpop.eup %3426  ;;  %3452 = vpow2.f32 %v3082_v53  ;;  %v1082_v53 = vrot.slane %v4263_v61, 7 }
 0x68b   :  { %v3429_v20 = vpop.eup %3428  ;;  %1115 = vrot.lane.b32.xlu1 %v3427_v48, %s3947_s3 }
 0x68c   :  { %v3431_v33 = vpop.eup %3430 }
 0x68d   :  { %v3433_v45 = vpop.eup %3432 }
 0x68e   :  { %1117 = vrot.lane.b32.xlu0 %v3429_v20, %s3947_s3  ;;  %v3435_v21 = vpop.eup %3434 }
 0x68f   :  { %1113 = vrot.lane.b32.xlu1 %v3431_v33, %s3947_s3  ;;  %v3437_v23 = vpop.eup %3436 }
 0x690   :  { %v3439_v26 = vpop.eup %3438 }
 0x691   :  { %v3441_v34 = vpop.eup %3440 }
 0x692   :  { %1119 = vrot.lane.b32.xlu0 %v3433_v45, %s3947_s3  ;;  %v1039_v59 = vadd.f32 1.0, %v3441_v34  ;;  %v3443_v22 = vpop.eup %3442 }
 0x693   :  { %1121 = vrot.lane.b32.xlu1 %v3435_v21, %s3947_s3  ;;  %v3445_v62 = vpop.eup %3444  ;;  %v1041_v50 = vadd.f32 1.0, %v3443_v22 }
 0x694   :  { %3454 = vrcp.f32 %v1039_v59  ;;  %v3447_v38 = vpop.eup %3446  ;;  %v1042_v40 = vadd.f32 1.0, %v3445_v62  ;;  %v1080_v62 = vrot.slane %v4250_v27, 7 }
 0x695   :  { %3456 = vpow2.f32 %v3083_v57  ;;  %v3449_v46 = vpop.eup %3448  ;;  %v1040_v37 = vadd.f32 1.0, %v3447_v38  ;;  %v1083_v38 = vrot.slane %v4270_v47, 7 }
 0x696   :  { %1123 = vrot.lane.b32.xlu0 %v3437_v23, %s3947_s3  ;;  %3458 = vrcp.f32 %v1041_v50  ;;  %v3451_v5 = vpop.eup %3450  ;;  %v1043_v52 = vadd.f32 1.0, %v3449_v46 }
 0x697   :  { %1125 = vrot.lane.b32.xlu1 %v3439_v26, %s3947_s3  ;;  %3460 = vrcp.f32 %v1042_v40  ;;  %v3453_v29 = vpop.eup %3452  ;;  %v1044_v16 = vadd.f32 1.0, %v3451_v5 }
 0x698   :  { %3462 = vrcp.f32 %v1040_v37  ;;  %v1045_v63 = vadd.f32 1.0, %v3453_v29  ;;  %v1084_v37 = vrot.slane %v4273_v54, 7  ;;  %v1085_v29 = vrot.slane %v4279_v60, 7 }
 0x699   :  { %3464 = vrcp.f32 %v1043_v52  ;;  %v1086_v54 = vrot.slane %v4281_v43, 7 }
 0x69a   :  { %3466 = vrcp.f32 %v1044_v16 }
 0x69b   :  { %3468 = vrcp.f32 %v1045_v63 }
 0x6a1   :  { %v4339_v56 = vpop.eup %3454 }
 0x6a2   :  { %v3457_v58 = vpop.eup %3456  ;;  %v1095_v24 = vmul.f32 %v4339_v56, %v1079_v17 }
 0x6a3   :  { %v1046_v1 = vadd.f32 1.0, %v3457_v58  ;;  %v4343_v4 = vpop.eup %3458 }
 0x6a4   :  { %v4345_v3 = vpop.eup %3460  ;;  %v1097_v59 = vmul.f32 %v4343_v4, %v1081_v13 }
 0x6a5   :  { %3470 = vrcp.f32 %v1046_v1  ;;  %v4350_v10 = vpop.eup %3462  ;;  %v1098_v22 = vmul.f32 %v4345_v3, %v1082_v53 }
 0x6a6   :  { %v4353_v12 = vpop.eup %3464  ;;  %v1096_v55 = vmul.f32 %v4350_v10, %v1080_v62 }
 0x6a7   :  { %v4358_v48 = vpop.eup %3466  ;;  %v1099_v61 = vmul.f32 %v4353_v12, %v1083_v38 }
 0x6a8   :  { %v4361_v33 = vpop.eup %3468 }
 0x6b2   :  { %v4366_v26 = vpop.eup %3470 }
 0x6b3   :  { %v1102_v60 = vmul.f32 %v4366_v26, %v1086_v54 }
 0x6fc   :  { %v1112_v14 = vpop.permute.xlu0 %1111 }
 0x6fd   :  { %v1135_v2 = vmul.f32 %v4339_v56, %v1112_v14  ;;  %v1116_v49 = vpop.permute.xlu1 %1115  ;;  %v1100_v14 = vmul.f32 %v4358_v48, %v1084_v37 }
 0x6fe   :  { %v1137_v7 = vmul.f32 %v4343_v4, %v1116_v49 }
 0x6ff   :  { %1151 = vrot.lane.b32.xlu0 %v1135_v2, %s3947_s3  ;;  %v1101_v2 = vmul.f32 %v4361_v33, %v1085_v29 }
 0x700   :  { %v1118_v6 = vpop.permute.xlu0 %1117  ;;  %1155 = vrot.lane.b32.xlu1 %v1137_v7, %s3947_s3 }
 0x701   :  { %v1138_v9 = vmul.f32 %v4345_v3, %v1118_v6  ;;  %v1114_v11 = vpop.permute.xlu1 %1113 }
 0x702   :  { %v1136_v15 = vmul.f32 %v4350_v10, %v1114_v11 }
 0x703   :  { %1157 = vrot.lane.b32.xlu0 %v1138_v9, %s3947_s3 }
 0x704   :  { %v1120_v42 = vpop.permute.xlu0 %1119  ;;  %1153 = vrot.lane.b32.xlu1 %v1136_v15, %s3947_s3 }
 0x705   :  { %v1139_v18 = vmul.f32 %v4353_v12, %v1120_v42  ;;  %v1122_v20 = vpop.permute.xlu1 %1121 }
 0x706   :  { %v1140_v45 = vmul.f32 %v4358_v48, %v1122_v20 }
 0x707   :  { %1159 = vrot.lane.b32.xlu0 %v1139_v18, %s3947_s3 }
 0x708   :  { %v1124_v21 = vpop.permute.xlu0 %1123  ;;  %1161 = vrot.lane.b32.xlu1 %v1140_v45, %s3947_s3 }
 0x709   :  { %v1141_v23 = vmul.f32 %v4361_v33, %v1124_v21  ;;  %v1126_v51 = vpop.permute.xlu1 %1125 }
 0x70a   :  { %v1142_v30 = vmul.f32 %v4366_v26, %v1126_v51 }
 0x70b   :  { %1163 = vrot.lane.b32.xlu0 %v1141_v23, %s3947_s3 }
 0x70c   :  { %1165 = vrot.lane.b32.xlu1 %v1142_v30, %s3947_s3 }
 0x771   :  { %v1152_v32 = vpop.permute.xlu0 %1151 }
 0x772   :  { %v4373_v34 = vadd.f32 %v1152_v32, %v1095_v24  ;;  %v1156_v57 = vpop.permute.xlu1 %1155 }
 0x773   :  { %v4381_v50 = vadd.f32 %v1156_v57, %v1097_v59 }
 0x774   :  { %3472 = vtanh.f32 %v4373_v34 }
 0x775   :  { %v1158_v36 = vpop.permute.xlu0 %1157  ;;  %3474 = vtanh.f32 %v4381_v50 }
 0x776   :  { %v4384_v40 = vadd.f32 %v1158_v36, %v1098_v22  ;;  %v1154_v46 = vpop.permute.xlu1 %1153 }
 0x777   :  { %v4391_v5 = vadd.f32 %v1154_v46, %v1096_v55 }
 0x778   :  { %3476 = vtanh.f32 %v4384_v40 }
 0x779   :  { %v1160_v27 = vpop.permute.xlu0 %1159  ;;  %3478 = vtanh.f32 %v4391_v5 }
 0x77a   :  { %v4394_v47 = vadd.f32 %v1160_v27, %v1099_v61  ;;  %v1162_v16 = vpop.permute.xlu1 %1161 }
 0x77b   :  { %v4402_v58 = vadd.f32 %v1162_v16, %v1100_v14  ;;  %v4439_v14 = vld [vmem:[#allocation7 + $0x18] sm:$0xff]  ;;  %v4449_v16 = vld [vmem:[#allocation7 + $0x8] sm:$0xff] }
 0x77c   :  { %3480 = vtanh.f32 %v4394_v47 }
 0x77d   :  { %v1164_v63 = vpop.permute.xlu0 %1163  ;;  %3482 = vtanh.f32 %v4402_v58 }
 0x77e   :  { %v4404_v1 = vadd.f32 %v1164_v63, %v1101_v2  ;;  %v1166_v49 = vpop.permute.xlu1 %1165  ;;  %v4453_v2 = vld [vmem:[#allocation7] sm:$0xff] }
 0x77f   :  { %v4409_v7 = vadd.f32 %v1166_v49, %v1102_v60 }
 0x780   :  { %3484 = vtanh.f32 %v4404_v1 }
 0x781   :  { %v3473_v52 = vpop.eup %3472  ;;  %3486 = vtanh.f32 %v4409_v7 }
 0x782   :  { %1199 = vrot.lane.b32.xlu0 %v3473_v52, %s3947_s3  ;;  %v3475_v6 = vpop.eup %3474 }
 0x783   :  { %1203 = vrot.lane.b32.xlu1 %v3475_v6, %s3947_s3 }
 0x785   :  { %v3477_v9 = vpop.eup %3476 }
 0x786   :  { %1205 = vrot.lane.b32.xlu0 %v3477_v9, %s3947_s3  ;;  %v3479_v43 = vpop.eup %3478 }
 0x787   :  { %1201 = vrot.lane.b32.xlu1 %v3479_v43, %s3947_s3 }
 0x789   :  { %v3481_v11 = vpop.eup %3480 }
 0x78a   :  { %1207 = vrot.lane.b32.xlu0 %v3481_v11, %s3947_s3  ;;  %v3483_v15 = vpop.eup %3482 }
 0x78b   :  { %1209 = vrot.lane.b32.xlu1 %v3483_v15, %s3947_s3 }
 0x78d   :  { %v3485_v42 = vpop.eup %3484 }
 0x78e   :  { %1211 = vrot.lane.b32.xlu0 %v3485_v42, %s3947_s3  ;;  %v3487_v18 = vpop.eup %3486 }
 0x78f   :  { %1213 = vrot.lane.b32.xlu1 %v3487_v18, %s3947_s3 }
 0x7f4   :  { %v1200_v20 = vpop.permute.xlu0 %1199 }
 0x7f5   :  { %v1204_v45 = vpop.permute.xlu1 %1203  ;;  %v1223_v23 = vmul.f32 %v4339_v56, %v1200_v20 }
 0x7f6   :  { %v1225_v57 = vmul.f32 %v4343_v4, %v1204_v45 }
 0x7f7   :  { %v1239_v13 = vrot.slane %v1223_v23, 2 }
 0x7f8   :  { %v1206_v21 = vpop.permute.xlu0 %1205 }
 0x7f9   :  { %v1226_v51 = vmul.f32 %v4345_v3, %v1206_v21  ;;  %v1202_v30 = vpop.permute.xlu1 %1201 }
 0x7fa   :  { %v1224_v17 = vmul.f32 %v4350_v10, %v1202_v30 }
 0x7fb   :  { %v1243_v59 = vrot.slane %v1226_v51, 7 }
 0x7fc   :  { %v1208_v24 = vpop.permute.xlu0 %1207  ;;  %v1240_v53 = vrot.slane %v1224_v17, 1 }
 0x7fd   :  { %v1227_v32 = vmul.f32 %v4353_v12, %v1208_v24  ;;  %v1210_v22 = vpop.permute.xlu1 %1209 }
 0x7fe   :  { %v1241_v36 = vsel %vm554_vm3, %v1240_v53, %v1239_v13  ;;  %v1228_v38 = vmul.f32 %v4358_v48, %v1210_v22 }
 0x7ff   :  { %v1245_v62 = vrot.slane %v1227_v32, 6  ;;  %v1242_v3 = vsel %vm557_vm4, %v1225_v57, %v1241_v36 }
 0x800   :  { %v1212_v56 = vpop.permute.xlu0 %1211  ;;  %v1244_v10 = vsel %vm560_vm5, %v1243_v59, %v1242_v3  ;;  %v1247_v46 = vrot.slane %v1228_v38, 5 }
 0x801   :  { %v1229_v55 = vmul.f32 %v4361_v33, %v1212_v56  ;;  %v1246_v12 = vsel %vm563_vm6, %v1245_v62, %v1244_v10  ;;  %v1214_v61 = vpop.permute.xlu1 %1213 }
 0x802   :  { %v1230_v4 = vmul.f32 %v4366_v26, %v1214_v61  ;;  %v1248_v27 = vsel %vm566_vm7, %v1247_v46, %v1246_v12  ;;  %v4445_v26 = vld [vmem:[#allocation7 + $0x10] sm:$0xff] }
 0x803   :  { %v1249_v37 = vrot.slane %v1229_v55, 4 }
 0x804   :  { %v1251_v29 = vrot.slane %v1230_v4, 3 }
 0x805   :  { %v1250_v52 = vsel %vm569_vm8, %v1249_v37, %v1248_v27 }
 0x806   :  { %v4434_v48 = vsel %vm572_vm9, %v1251_v29, %v1250_v52 }
 0x807   :  { %1256 = vrot.lane.b32.xlu0 %v4434_v48, %s3948_s13 }
 0x879   :  { %v1257_v33 = vpop.permute.xlu0 %1256 }
 0x87a   :  { %3237 = vmatmul.mubr.msk.f32.vlgmr.msra.gmra.mxu1 %vm67_vm0, %v1257_v33 }
 0x87b   :  { %3251 = vmatpush3.msra.mxu1 %v4439_v14  ;;  %3258 = vmatprep.mubr.msk.f32.mxu1 %vm3946_vm1, %v3945_v0 }
 0x87c   :  { %3252 = vmatprep.subr.mxu1 %v3945_v0 }
 0x87d   :  { %3253 = vmatpush3.msra.mxu1 %v4445_v26 }
 0x87e   :  { %3254 = vmatprep.subr.mxu1 %v3945_v0 }
 0x87f   :  { %3255 = vmatpush3.msra.mxu1 %v4449_v16 }
 0x880   :  { %3256 = vmatprep.subr.mxu1 %v3945_v0 }
 0x881   :  { %3257 = vmatpush3.msra.mxu1 %v4453_v2 }
 0x882   :  { %3272 = vmatprep.subr.mxu1 %v3945_v0 }
 0x93a   :  { %v1326_v54 = vpop.f32.mrf.mxu1 }
 0x93b   :  { %v1332_v60 = vrot.slane %v1326_v54, 6  ;;  %v1334_v49 = vrot.slane %v1326_v54, 1  ;;  %v1331_v9 = vrot.slane %v1326_v54, 5  ;;  %v1349_v43 = vadd.f32 %v1326_v54, %v4060_v28 }
 0x93c   :  { %v3238_v63 = vpop.f32.mrf.mxu1  ;;  %v1335_v11 = vrot.slane %v1326_v54, 2  ;;  %v1333_v42 = vrot.slane %v1326_v54, 7  ;;  %v1337_v20 = vrot.slane %v1326_v54, 4  ;;  %v1336_v21 = vrot.slane %v1326_v54, 3 }
 0x93d   :  { %v1347_v6 = vadd.f32 %v1332_v60, %v4058_v25  ;;  %v1350_v15 = vadd.f32 %v1334_v49, %v4070_v39  ;;  %v1346_v18 = vadd.f32 %v1331_v9, %v4053_v19  ;;  %v3088_v36 = vmul.f32 -1.442695, %v1349_v43 }
 0x93e   :  { %v1351_v45 = vadd.f32 %v1335_v11, %v4067_v35  ;;  %v1348_v23 = vadd.f32 %v1333_v42, %v4064_v31  ;;  %v1353_v51 = vadd.f32 %v1337_v20, %v4072_v41  ;;  %v1352_v30 = vadd.f32 %v1336_v21, %v4075_v44 }
 0x93f   :  { %3488 = vtanh.f32 %v1347_v6  ;;  %v3086_v62 = vmul.f32 -1.442695, %v1347_v6  ;;  %v3089_v38 = vmul.f32 -1.442695, %v1350_v15  ;;  %v3085_v56 = vmul.f32 -1.442695, %v1346_v18 }
 0x940   :  { %3490 = vtanh.f32 %v1349_v43  ;;  %v3090_v3 = vmul.f32 -1.442695, %v1351_v45  ;;  %v3087_v55 = vmul.f32 -1.442695, %v1348_v23  ;;  %v3092_v10 = vmul.f32 -1.442695, %v1353_v51 }
 0x941   :  { %3492 = vtanh.f32 %v1350_v15  ;;  %v3091_v46 = vmul.f32 -1.442695, %v1352_v30 }
 0x942   :  { %3494 = vtanh.f32 %v1346_v18 }
 0x943   :  { %3496 = vtanh.f32 %v1351_v45 }
 0x944   :  { %3498 = vtanh.f32 %v1348_v23 }
 0x945   :  { %3500 = vtanh.f32 %v1353_v51 }
 0x946   :  { %3502 = vtanh.f32 %v1352_v30 }
 0x947   :  { %3504 = vpow2.f32 %v3086_v62 }
 0x948   :  { %3506 = vpow2.f32 %v3088_v36 }
 0x949   :  { %3508 = vpow2.f32 %v3089_v38 }
 0x94a   :  { %3510 = vpow2.f32 %v3085_v56 }
 0x94b   :  { %3512 = vpow2.f32 %v3090_v3 }
 0x94c   :  { %v3489_v17 = vpop.eup %3488  ;;  %3514 = vpow2.f32 %v3087_v55 }
 0x94d   :  { %1452 = vrot.lane.b32.xlu0 %v3489_v17, %s3947_s3  ;;  %v3491_v24 = vpop.eup %3490  ;;  %3516 = vpow2.f32 %v3092_v10 }
 0x94e   :  { %1456 = vrot.lane.b32.xlu1 %v3491_v24, %s3947_s3  ;;  %v3493_v32 = vpop.eup %3492  ;;  %3518 = vpow2.f32 %v3091_v46  ;;  %v1419_v46 = vrot.slane %v4391_v5, 7 }
 0x94f   :  { %v3495_v13 = vpop.eup %3494 }
 0x950   :  { %v3497_v53 = vpop.eup %3496 }
 0x951   :  { %1458 = vrot.lane.b32.xlu0 %v3493_v32, %s3947_s3  ;;  %v3499_v59 = vpop.eup %3498 }
 0x952   :  { %1450 = vrot.lane.b32.xlu1 %v3495_v13, %s3947_s3  ;;  %v3501_v57 = vpop.eup %3500 }
 0x953   :  { %v3503_v22 = vpop.eup %3502 }
 0x954   :  { %v3505_v12 = vpop.eup %3504 }
 0x955   :  { %1460 = vrot.lane.b32.xlu0 %v3497_v53, %s3947_s3  ;;  %v3507_v61 = vpop.eup %3506  ;;  %v1379_v37 = vadd.f32 1.0, %v3505_v12  ;;  %v1421_v12 = vrot.slane %v4384_v40, 7  ;;  %v1423_v40 = vrot.slane %v4402_v58, 7 }
 0x956   :  { %1454 = vrot.lane.b32.xlu1 %v3499_v59, %s3947_s3  ;;  %v3509_v4 = vpop.eup %3508  ;;  %v1381_v27 = vadd.f32 1.0, %v3507_v61 }
 0x957   :  { %v3511_v52 = vpop.eup %3510  ;;  %v1382_v29 = vadd.f32 1.0, %v3509_v4  ;;  %3520 = vrcp.f32 %v1379_v37  ;;  %v1422_v4 = vrot.slane %v4394_v47, 7 }
 0x958   :  { %v3513_v33 = vpop.eup %3512  ;;  %v1378_v54 = vadd.f32 1.0, %v3511_v52  ;;  %3522 = vrcp.f32 %v1381_v27 }
 0x959   :  { %1464 = vrot.lane.b32.xlu0 %v3501_v57, %s3947_s3  ;;  %v3515_v63 = vpop.eup %3514  ;;  %v1383_v60 = vadd.f32 1.0, %v3513_v33  ;;  %3524 = vrcp.f32 %v1382_v29  ;;  %v1418_v33 = vrot.slane %v4373_v34, 7 }
 0x95a   :  { %1462 = vrot.lane.b32.xlu1 %v3503_v22, %s3947_s3  ;;  %v3517_v49 = vpop.eup %3516  ;;  %v1380_v6 = vadd.f32 1.0, %v3515_v63  ;;  %3526 = vrcp.f32 %v1378_v54 }
 0x95b   :  { %v3519_v9 = vpop.eup %3518  ;;  %v1385_v43 = vadd.f32 1.0, %v3517_v49  ;;  %3528 = vrcp.f32 %v1383_v60 }
 0x95c   :  { %v1384_v11 = vadd.f32 1.0, %v3519_v9  ;;  %3530 = vrcp.f32 %v1380_v6  ;;  %v1420_v6 = vrot.slane %v4381_v50, 7 }
 0x95d   :  { %3532 = vrcp.f32 %v1385_v43 }
 0x95e   :  { %3534 = vrcp.f32 %v1384_v11  ;;  %v1425_v11 = vrot.slane %v4409_v7, 7 }
 0x964   :  { %v4473_v15 = vpop.eup %3520 }
 0x965   :  { %v4476_v20 = vpop.eup %3522  ;;  %v1435_v61 = vmul.f32 %v4473_v15, %v1419_v46 }
 0x966   :  { %v4480_v23 = vpop.eup %3524  ;;  %v1437_v27 = vmul.f32 %v4476_v20, %v1421_v12 }
 0x967   :  { %v4484_v17 = vpop.eup %3526  ;;  %v1438_v5 = vmul.f32 %v4480_v23, %v1422_v4 }
 0x968   :  { %v4488_v13 = vpop.eup %3528  ;;  %v1434_v47 = vmul.f32 %v4484_v17, %v1418_v33 }
 0x969   :  { %v4492_v57 = vpop.eup %3530  ;;  %v1439_v34 = vmul.f32 %v4488_v13, %v1423_v40 }
 0x96a   :  { %v4496_v36 = vpop.eup %3532  ;;  %v1436_v58 = vmul.f32 %v4492_v57, %v1420_v6 }
 0x96b   :  { %v4500_v3 = vpop.eup %3534  ;;  %v1441_v50 = vmul.f32 %v4496_v36, %v1425_v11 }
 0x9bf   :  { %v1453_v42 = vpop.permute.xlu0 %1452 }
 0x9c0   :  { %v1475_v18 = vmul.f32 %v4473_v15, %v1453_v42  ;;  %v1457_v45 = vpop.permute.xlu1 %1456 }
 0x9c1   :  { %v1477_v21 = vmul.f32 %v4476_v20, %v1457_v45  ;;  %v1424_v45 = vrot.slane %v4404_v1, 7 }
 0x9c2   :  { %1492 = vrot.lane.b32.xlu0 %v1475_v18, %s3947_s3 }
 0x9c3   :  { %v1459_v51 = vpop.permute.xlu0 %1458  ;;  %1496 = vrot.lane.b32.xlu1 %v1477_v21, %s3947_s3  ;;  %v1440_v7 = vmul.f32 %v4500_v3, %v1424_v45 }
 0x9c4   :  { %v1478_v30 = vmul.f32 %v4480_v23, %v1459_v51  ;;  %v1451_v24 = vpop.permute.xlu1 %1450 }
 0x9c5   :  { %v1474_v32 = vmul.f32 %v4484_v17, %v1451_v24 }
 0x9c6   :  { %1498 = vrot.lane.b32.xlu0 %v1478_v30, %s3947_s3 }
 0x9c7   :  { %v1461_v53 = vpop.permute.xlu0 %1460  ;;  %1490 = vrot.lane.b32.xlu1 %v1474_v32, %s3947_s3 }
 0x9c8   :  { %v1479_v59 = vmul.f32 %v4488_v13, %v1461_v53  ;;  %v1455_v22 = vpop.permute.xlu1 %1454 }
 0x9c9   :  { %v1476_v62 = vmul.f32 %v4492_v57, %v1455_v22 }
 0x9ca   :  { %1500 = vrot.lane.b32.xlu0 %v1479_v59, %s3947_s3 }
 0x9cb   :  { %v1465_v38 = vpop.permute.xlu0 %1464  ;;  %1494 = vrot.lane.b32.xlu1 %v1476_v62, %s3947_s3 }
 0x9cc   :  { %v1481_v56 = vmul.f32 %v4496_v36, %v1465_v38  ;;  %v1463_v55 = vpop.permute.xlu1 %1462 }
 0x9cd   :  { %v1480_v10 = vmul.f32 %v4500_v3, %v1463_v55 }
 0x9ce   :  { %1504 = vrot.lane.b32.xlu0 %v1481_v56, %s3947_s3 }
 0x9cf   :  { %1502 = vrot.lane.b32.xlu1 %v1480_v10, %s3947_s3 }
 0xa34   :  { %v1493_v37 = vpop.permute.xlu0 %1492 }
 0xa35   :  { %v4510_v52 = vadd.f32 %v1493_v37, %v1435_v61  ;;  %v1497_v29 = vpop.permute.xlu1 %1496 }
 0xa36   :  { %v4513_v54 = vadd.f32 %v1497_v29, %v1437_v27 }
 0xa37   :  { %3536 = vtanh.f32 %v4510_v52 }
 0xa38   :  { %v1499_v63 = vpop.permute.xlu0 %1498  ;;  %3538 = vtanh.f32 %v4513_v54 }
 0xa39   :  { %v4520_v60 = vadd.f32 %v1499_v63, %v1438_v5  ;;  %v1491_v49 = vpop.permute.xlu1 %1490 }
 0xa3a   :  { %v4523_v9 = vadd.f32 %v1491_v49, %v1434_v47 }
 0xa3b   :  { %3540 = vtanh.f32 %v4520_v60 }
 0xa3c   :  { %v1501_v43 = vpop.permute.xlu0 %1500  ;;  %3542 = vtanh.f32 %v4523_v9 }
 0xa3d   :  { %v4530_v42 = vadd.f32 %v1501_v43, %v1439_v34  ;;  %v1495_v18 = vpop.permute.xlu1 %1494 }
 0xa3e   :  { %v4533_v21 = vadd.f32 %v1495_v18, %v1436_v58 }
 0xa3f   :  { %3544 = vtanh.f32 %v4530_v42 }
 0xa40   :  { %v1505_v51 = vpop.permute.xlu0 %1504  ;;  %3546 = vtanh.f32 %v4533_v21 }
 0xa41   :  { %v4539_v30 = vadd.f32 %v1505_v51, %v1441_v50  ;;  %v1503_v24 = vpop.permute.xlu1 %1502 }
 0xa42   :  { %v4541_v32 = vadd.f32 %v1503_v24, %v1440_v7 }
 0xa43   :  { %3548 = vtanh.f32 %v4539_v30 }
 0xa44   :  { %v3537_v53 = vpop.eup %3536  ;;  %3550 = vtanh.f32 %v4541_v32 }
 0xa45   :  { %1540 = vrot.lane.b32.xlu0 %v3537_v53, %s3947_s3  ;;  %v3539_v1 = vpop.eup %3538 }
 0xa46   :  { %1544 = vrot.lane.b32.xlu1 %v3539_v1, %s3947_s3 }
 0xa48   :  { %v3541_v59 = vpop.eup %3540 }
 0xa49   :  { %1546 = vrot.lane.b32.xlu0 %v3541_v59, %s3947_s3  ;;  %v3543_v22 = vpop.eup %3542 }
 0xa4a   :  { %1538 = vrot.lane.b32.xlu1 %v3543_v22, %s3947_s3 }
 0xa4c   :  { %v3545_v62 = vpop.eup %3544 }
 0xa4d   :  { %1548 = vrot.lane.b32.xlu0 %v3545_v62, %s3947_s3  ;;  %v3547_v38 = vpop.eup %3546 }
 0xa4e   :  { %1542 = vrot.lane.b32.xlu1 %v3547_v38, %s3947_s3 }
 0xa50   :  { %v3549_v56 = vpop.eup %3548 }
 0xa51   :  { %1552 = vrot.lane.b32.xlu0 %v3549_v56, %s3947_s3  ;;  %v3551_v55 = vpop.eup %3550 }
 0xa52   :  { %1550 = vrot.lane.b32.xlu1 %v3551_v55, %s3947_s3 }
 0xab7   :  { %v1541_v10 = vpop.permute.xlu0 %1540 }
 0xab8   :  { %v1545_v46 = vpop.permute.xlu1 %1544  ;;  %v1563_v4 = vmul.f32 %v4473_v15, %v1541_v10 }
 0xab9   :  { %v1565_v43 = vmul.f32 %v4476_v20, %v1545_v46 }
 0xaba   :  { %v1579_v47 = vrot.slane %v1563_v4, 2 }
 0xabb   :  { %v1547_v12 = vpop.permute.xlu0 %1546 }
 0xabc   :  { %v1539_v61 = vpop.permute.xlu1 %1538  ;;  %v1566_v63 = vmul.f32 %v4480_v23, %v1547_v12 }
 0xabd   :  { %v1562_v37 = vmul.f32 %v4484_v17, %v1539_v61 }
 0xabe   :  { %v1584_v58 = vrot.slane %v1566_v63, 7 }
 0xabf   :  { %v1549_v27 = vpop.permute.xlu0 %1548  ;;  %v1578_v29 = vrot.slane %v1562_v37, 3 }
 0xac0   :  { %v1543_v33 = vpop.permute.xlu1 %1542  ;;  %v1567_v5 = vmul.f32 %v4488_v13, %v1549_v27 }
 0xac1   :  { %v1564_v40 = vmul.f32 %v4492_v57, %v1543_v33  ;;  %v1580_v17 = vsel %vm554_vm3, %v1579_v47, %v1578_v29 }
 0xac2   :  { %v1586_v11 = vrot.slane %v1567_v5, 6 }
 0xac3   :  { %v1553_v49 = vpop.permute.xlu0 %1552  ;;  %v1581_v6 = vrot.slane %v1564_v40, 1 }
 0xac4   :  { %v1569_v34 = vmul.f32 %v4496_v36, %v1553_v49  ;;  %v1551_v15 = vpop.permute.xlu1 %1550 }
 0xac5   :  { %v1582_v18 = vsel %vm557_vm4, %v1581_v6, %v1580_v17  ;;  %v1568_v13 = vmul.f32 %v4500_v3, %v1551_v15 }
 0xac6   :  { %v1583_v23 = vsel %vm560_vm5, %v1565_v43, %v1582_v18  ;;  %v1590_v45 = vrot.slane %v1569_v34, 4 }
 0xac7   :  { %v1585_v57 = vsel %vm563_vm6, %v1584_v58, %v1583_v23  ;;  %v1588_v50 = vrot.slane %v1568_v13, 5 }
 0xac8   :  { %v1587_v51 = vsel %vm566_vm7, %v1586_v11, %v1585_v57 }
 0xac9   :  { %v1589_v36 = vsel %vm569_vm8, %v1588_v50, %v1587_v51 }
 0xaca   :  { %v4568_v20 = vsel %vm572_vm9, %v1590_v45, %v1589_v36 }
 0xacb   :  { %1597 = vrot.lane.b32.xlu1 %v4568_v20, %s3948_s13 }
 0xb3d   :  { %v1598_v7 = vpop.permute.xlu1 %1597 }
 0xb3e   :  { %3248 = vmatmul.mubr.msk.f32.vlgmr.msra.gmra.mxu0 %vm67_vm0, %v1598_v7 }
 0xb3f   :  { %3262 = vmatpush3.msra.mxu0 %v4439_v14  ;;  %3269 = vmatprep.mubr.msk.f32.mxu0 %vm3946_vm1, %v3945_v0 }
 0xb40   :  { %3263 = vmatprep.subr.mxu0 %v3945_v0 }
 0xb41   :  { %3264 = vmatpush3.msra.mxu0 %v4445_v26 }
 0xb42   :  { %3265 = vmatprep.subr.mxu0 %v3945_v0 }
 0xb43   :  { %3266 = vmatpush3.msra.mxu0 %v4449_v16 }
 0xb44   :  { %3267 = vmatprep.subr.mxu0 %v3945_v0 }
 0xb45   :  { %3268 = vmatpush3.msra.mxu0 %v4453_v2 }
 0xbfe   :  { %v1667_v3 = vpop.f32.mrf.mxu0 }
 0xbff   :  { %v1672_v24 = vrot.slane %v1667_v3, 4  ;;  %v1674_v59 = vrot.slane %v1667_v3, 6  ;;  %v1676_v22 = vrot.slane %v1667_v3, 1  ;;  %v1673_v38 = vrot.slane %v1667_v3, 5 }
 0xc00   :  { %v3249_v53 = vpop.f32.mrf.mxu0  ;;  %v1691_v56 = vadd.f32 %v1667_v3, %v4070_v39  ;;  %v1677_v55 = vrot.slane %v1667_v3, 2  ;;  %v1675_v46 = vrot.slane %v1667_v3, 7  ;;  %v1678_v4 = vrot.slane %v1667_v3, 3 }
 0xc01   :  { %v1687_v1 = vadd.f32 %v1672_v24, %v4053_v19  ;;  %v1689_v62 = vadd.f32 %v1674_v59, %v4064_v31  ;;  %v1692_v10 = vadd.f32 %v1676_v22, %v4067_v35  ;;  %v1688_v12 = vadd.f32 %v1673_v38, %v4058_v25 }
 0xc02   :  { %v1693_v37 = vadd.f32 %v1677_v55, %v4075_v44  ;;  %v1690_v27 = vadd.f32 %v1675_v46, %v4060_v28  ;;  %v1694_v29 = vadd.f32 %v1678_v4, %v4072_v41  ;;  %v3098_v17 = vmul.f32 -1.442695, %v1691_v56 }
 0xc03   :  { %3552 = vtanh.f32 %v1687_v1  ;;  %v3094_v34 = vmul.f32 -1.442695, %v1687_v1  ;;  %v3096_v43 = vmul.f32 -1.442695, %v1689_v62  ;;  %v3099_v11 = vmul.f32 -1.442695, %v1692_v10 }
 0xc04   :  { %3554 = vtanh.f32 %v1689_v62  ;;  %v3095_v15 = vmul.f32 -1.442695, %v1688_v12  ;;  %v3100_v18 = vmul.f32 -1.442695, %v1693_v37  ;;  %v3097_v13 = vmul.f32 -1.442695, %v1690_v27 }
 0xc05   :  { %3556 = vtanh.f32 %v1691_v56  ;;  %v3101_v45 = vmul.f32 -1.442695, %v1694_v29 }
 0xc06   :  { %3558 = vtanh.f32 %v1692_v10 }
 0xc07   :  { %3560 = vtanh.f32 %v1688_v12 }
 0xc08   :  { %3562 = vtanh.f32 %v1693_v37 }
 0xc09   :  { %3564 = vtanh.f32 %v1690_v27 }
 0xc0a   :  { %3566 = vtanh.f32 %v1694_v29 }
 0xc0b   :  { %3568 = vpow2.f32 %v3094_v34 }
 0xc0c   :  { %3570 = vpow2.f32 %v3096_v43 }
 0xc0d   :  { %3572 = vpow2.f32 %v3098_v17 }
 0xc0e   :  { %3574 = vpow2.f32 %v3099_v11 }
 0xc0f   :  { %3576 = vpow2.f32 %v3095_v15 }
 0xc10   :  { %v3553_v61 = vpop.eup %3552  ;;  %3578 = vpow2.f32 %v3100_v18 }
 0xc11   :  { %1791 = vrot.lane.b32.xlu0 %v3553_v61, %s3947_s3  ;;  %v3555_v33 = vpop.eup %3554  ;;  %3580 = vpow2.f32 %v3097_v13 }
 0xc12   :  { %v3557_v5 = vpop.eup %3556 }
 0xc13   :  { %1799 = vrot.lane.b32.xlu1 %v3557_v5, %s3947_s3  ;;  %v3559_v63 = vpop.eup %3558 }
 0xc14   :  { %v3561_v40 = vpop.eup %3560 }
 0xc15   :  { %1795 = vrot.lane.b32.xlu0 %v3555_v33, %s3947_s3  ;;  %v3563_v47 = vpop.eup %3562 }
 0xc16   :  { %v3565_v49 = vpop.eup %3564 }
 0xc17   :  { %1793 = vrot.lane.b32.xlu1 %v3561_v40, %s3947_s3  ;;  %v3567_v6 = vpop.eup %3566 }
 0xc18   :  { %v3569_v58 = vpop.eup %3568 }
 0xc19   :  { %1801 = vrot.lane.b32.xlu0 %v3559_v63, %s3947_s3  ;;  %v1719_v23 = vadd.f32 1.0, %v3569_v58  ;;  %v3571_v57 = vpop.eup %3570 }
 0xc1a   :  { %v3573_v50 = vpop.eup %3572  ;;  %v1721_v51 = vadd.f32 1.0, %v3571_v57 }
 0xc1b   :  { %1797 = vrot.lane.b32.xlu1 %v3565_v49, %s3947_s3  ;;  %3582 = vrcp.f32 %v1719_v23  ;;  %v3575_v36 = vpop.eup %3574  ;;  %v1723_v7 = vadd.f32 1.0, %v3573_v50  ;;  %v1759_v23 = vrot.slane %v4523_v9, 7 }
 0xc1c   :  { %3584 = vpow2.f32 %v3101_v45  ;;  %v3577_v3 = vpop.eup %3576  ;;  %v1724_v24 = vadd.f32 1.0, %v3575_v36  ;;  %v1763_v36 = vrot.slane %v4520_v60, 7  ;;  %v1765_v60 = vrot.slane %v4541_v32, 7 }
 0xc1d   :  { %1803 = vrot.lane.b32.xlu0 %v3563_v47, %s3947_s3  ;;  %3586 = vrcp.f32 %v1721_v51  ;;  %v3579_v53 = vpop.eup %3578  ;;  %v1720_v59 = vadd.f32 1.0, %v3577_v3  ;;  %v1761_v51 = vrot.slane %v4533_v21, 7 }
 0xc1e   :  { %v3581_v1 = vpop.eup %3580  ;;  %3588 = vrcp.f32 %v1723_v7  ;;  %v1725_v38 = vadd.f32 1.0, %v3579_v53 }
 0xc1f   :  { %1805 = vrot.lane.b32.xlu1 %v3567_v6, %s3947_s3  ;;  %3590 = vrcp.f32 %v1724_v24  ;;  %v1722_v55 = vadd.f32 1.0, %v3581_v1  ;;  %v1764_v24 = vrot.slane %v4530_v42, 7 }
 0xc20   :  { %3592 = vrcp.f32 %v1720_v59  ;;  %v1760_v59 = vrot.slane %v4510_v52, 7 }
 0xc21   :  { %3594 = vrcp.f32 %v1725_v38 }
 0xc22   :  { %3596 = vrcp.f32 %v1722_v55 }
 0xc28   :  { %v4598_v22 = vpop.eup %3582 }
 0xc29   :  { %v3585_v10 = vpop.eup %3584  ;;  %v1775_v45 = vmul.f32 %v4598_v22, %v1759_v23 }
 0xc2a   :  { %v1726_v46 = vadd.f32 1.0, %v3585_v10  ;;  %v4602_v12 = vpop.eup %3586 }
 0xc2b   :  { %v4605_v4 = vpop.eup %3588  ;;  %v1777_v7 = vmul.f32 %v4602_v12, %v1761_v51 }
 0xc2c   :  { %3598 = vrcp.f32 %v1726_v46  ;;  %v4609_v33 = vpop.eup %3590  ;;  %v1779_v53 = vmul.f32 %v4605_v4, %v1763_v36  ;;  %v1762_v46 = vrot.slane %v4513_v54, 7 }
 0xc2d   :  { %v4613_v40 = vpop.eup %3592  ;;  %v1780_v21 = vmul.f32 %v4609_v33, %v1764_v24 }
 0xc2e   :  { %v4617_v6 = vpop.eup %3594  ;;  %v1776_v42 = vmul.f32 %v4613_v40, %v1760_v59 }
 0xc2f   :  { %v4621_v17 = vpop.eup %3596 }
 0xc30   :  { %v1778_v32 = vmul.f32 %v4621_v17, %v1762_v46 }
 0xc39   :  { %v4626_v58 = vpop.eup %3598 }
 0xc83   :  { %v1792_v62 = vpop.permute.xlu0 %1791 }
 0xc84   :  { %v1815_v56 = vmul.f32 %v4598_v22, %v1792_v62 }
 0xc85   :  { %v1800_v27 = vpop.permute.xlu1 %1799 }
 0xc86   :  { %1831 = vrot.lane.b32.xlu0 %v1815_v56, %s3947_s3  ;;  %v1819_v29 = vmul.f32 %v4605_v4, %v1800_v27 }
 0xc87   :  { %v1796_v61 = vpop.permute.xlu0 %1795 }
 0xc88   :  { %v1817_v37 = vmul.f32 %v4602_v12, %v1796_v61  ;;  %1839 = vrot.lane.b32.xlu1 %v1819_v29, %s3947_s3  ;;  %v1781_v61 = vmul.f32 %v4617_v6, %v1765_v60 }
 0xc89   :  { %v1794_v47 = vpop.permute.xlu1 %1793 }
 0xc8a   :  { %1835 = vrot.lane.b32.xlu0 %v1817_v37, %s3947_s3  ;;  %v1816_v49 = vmul.f32 %v4613_v40, %v1794_v47 }
 0xc8b   :  { %v1802_v5 = vpop.permute.xlu0 %1801 }
 0xc8c   :  { %v1820_v63 = vmul.f32 %v4609_v33, %v1802_v5  ;;  %1833 = vrot.lane.b32.xlu1 %v1816_v49, %s3947_s3  ;;  %v1766_v5 = vrot.slane %v4539_v30, 7 }
 0xc8d   :  { %v1798_v11 = vpop.permute.xlu1 %1797 }
 0xc8e   :  { %1841 = vrot.lane.b32.xlu0 %v1820_v63, %s3947_s3  ;;  %v1818_v15 = vmul.f32 %v4621_v17, %v1798_v11  ;;  %v1782_v54 = vmul.f32 %v4626_v58, %v1766_v5 }
 0xc8f   :  { %v1804_v34 = vpop.permute.xlu0 %1803 }
 0xc90   :  { %v1821_v43 = vmul.f32 %v4617_v6, %v1804_v34  ;;  %1837 = vrot.lane.b32.xlu1 %v1818_v15, %s3947_s3 }
 0xc91   :  { %v1806_v18 = vpop.permute.xlu1 %1805 }
 0xc92   :  { %1843 = vrot.lane.b32.xlu0 %v1821_v43, %s3947_s3  ;;  %v1822_v13 = vmul.f32 %v4626_v58, %v1806_v18 }
 0xc94   :  { %1845 = vrot.lane.b32.xlu1 %v1822_v13, %s3947_s3 }
 0xcf8   :  { %v1832_v57 = vpop.permute.xlu0 %1831 }
 0xcf9   :  { %v4632_v50 = vadd.f32 %v1832_v57, %v1775_v45 }
 0xcfa   :  { %v1840_v9 = vpop.permute.xlu1 %1839 }
 0xcfb   :  { %3600 = vtanh.f32 %v4632_v50  ;;  %v4643_v62 = vadd.f32 %v1840_v9, %v1779_v53 }
 0xcfc   :  { %v1836_v3 = vpop.permute.xlu0 %1835 }
 0xcfd   :  { %v4640_v1 = vadd.f32 %v1836_v3, %v1777_v7 }
 0xcfe   :  { %v1834_v10 = vpop.permute.xlu1 %1833 }
 0xcff   :  { %3602 = vtanh.f32 %v4640_v1  ;;  %v4653_v52 = vadd.f32 %v1834_v10, %v1776_v42 }
 0xd00   :  { %v1842_v38 = vpop.permute.xlu0 %1841  ;;  %3604 = vtanh.f32 %v4643_v62 }
 0xd01   :  { %v4650_v56 = vadd.f32 %v1842_v38, %v1780_v21 }
 0xd02   :  { %v1838_v29 = vpop.permute.xlu1 %1837 }
 0xd03   :  { %3606 = vtanh.f32 %v4650_v56  ;;  %v4663_v63 = vadd.f32 %v1838_v29, %v1778_v32 }
 0xd04   :  { %v1844_v37 = vpop.permute.xlu0 %1843  ;;  %3608 = vtanh.f32 %v4653_v52 }
 0xd05   :  { %v4660_v27 = vadd.f32 %v1844_v37, %v1781_v61 }
 0xd06   :  { %v1846_v47 = vpop.permute.xlu1 %1845 }
 0xd07   :  { %3610 = vtanh.f32 %v4660_v27  ;;  %v4668_v49 = vadd.f32 %v1846_v47, %v1782_v54 }
 0xd08   :  { %v3601_v55 = vpop.eup %3600  ;;  %3612 = vtanh.f32 %v4663_v63 }
 0xd09   :  { %1879 = vrot.lane.b32.xlu0 %v3601_v55, %s3947_s3  ;;  %3614 = vtanh.f32 %v4668_v49 }
 0xd0c   :  { %v3603_v34 = vpop.eup %3602 }
 0xd0d   :  { %1883 = vrot.lane.b32.xlu0 %v3603_v34, %s3947_s3  ;;  %v3605_v43 = vpop.eup %3604 }
 0xd0e   :  { %1887 = vrot.lane.b32.xlu1 %v3605_v43, %s3947_s3 }
 0xd10   :  { %v3607_v30 = vpop.eup %3606 }
 0xd11   :  { %1889 = vrot.lane.b32.xlu0 %v3607_v30, %s3947_s3  ;;  %v3609_v11 = vpop.eup %3608 }
 0xd12   :  { %1881 = vrot.lane.b32.xlu1 %v3609_v11, %s3947_s3 }
 0xd14   :  { %v3611_v15 = vpop.eup %3610 }
 0xd15   :  { %1891 = vrot.lane.b32.xlu0 %v3611_v15, %s3947_s3  ;;  %v3613_v18 = vpop.eup %3612 }
 0xd16   :  { %1885 = vrot.lane.b32.xlu1 %v3613_v18, %s3947_s3  ;;  %v3615_v13 = vpop.eup %3614 }
 0xd1a   :  { %1893 = vrot.lane.b32.xlu1 %v3615_v13, %s3947_s3 }
 0xd7b   :  { %v1880_v23 = vpop.permute.xlu0 %1879 }
 0xd7c   :  { %v1903_v7 = vmul.f32 %v4598_v22, %v1880_v23 }
 0xd7e   :  { %v1919_v59 = vrot.slane %v1903_v7, 4 }
 0xd7f   :  { %v1884_v45 = vpop.permute.xlu0 %1883 }
 0xd80   :  { %v1888_v57 = vpop.permute.xlu1 %1887  ;;  %v1905_v51 = vmul.f32 %v4602_v12, %v1884_v45 }
 0xd81   :  { %v1907_v61 = vmul.f32 %v4605_v4, %v1888_v57 }
 0xd82   :  { %v1922_v53 = vrot.slane %v1905_v51, 2 }
 0xd83   :  { %v1890_v36 = vpop.permute.xlu0 %1889 }
 0xd84   :  { %v1882_v3 = vpop.permute.xlu1 %1881  ;;  %v1908_v38 = vmul.f32 %v4609_v33, %v1890_v36 }
 0xd85   :  { %v1904_v24 = vmul.f32 %v4613_v40, %v1882_v3 }
 0xd86   :  { %v1927_v22 = vrot.slane %v1908_v38, 7 }
 0xd87   :  { %v1892_v9 = vpop.permute.xlu0 %1891  ;;  %v1920_v21 = vrot.slane %v1904_v24, 3 }
 0xd88   :  { %v1886_v60 = vpop.permute.xlu1 %1885  ;;  %v1909_v42 = vmul.f32 %v4617_v6, %v1892_v9 }
 0xd89   :  { %v1921_v55 = vsel %vm554_vm3, %v1920_v21, %v1919_v59  ;;  %v1906_v10 = vmul.f32 %v4621_v17, %v1886_v60 }
 0xd8a   :  { %v1923_v12 = vsel %vm557_vm4, %v1922_v53, %v1921_v55  ;;  %v1929_v37 = vrot.slane %v1909_v42, 6 }
 0xd8b   :  { %v1924_v46 = vrot.slane %v1906_v10, 1 }
 0xd8c   :  { %v1894_v40 = vpop.permute.xlu1 %1893 }
 0xd8d   :  { %v1925_v32 = vsel %vm560_vm5, %v1924_v46, %v1923_v12  ;;  %v1910_v29 = vmul.f32 %v4626_v58, %v1894_v40 }
 0xd8e   :  { %v1926_v33 = vsel %vm563_vm6, %v1907_v61, %v1925_v32 }
 0xd8f   :  { %v1928_v6 = vsel %vm566_vm7, %v1927_v22, %v1926_v33  ;;  %v1931_v5 = vrot.slane %v1910_v29, 5 }
 0xd90   :  { %v1930_v54 = vsel %vm569_vm8, %v1929_v37, %v1928_v6 }
 0xd91   :  { %v1932_v17 = vsel %vm572_vm9, %v1931_v5, %v1930_v54 }
 0xd92   :  { %1933 = vrot.lane.b32.xlu0 %v1932_v17, %s3948_s13 }
 0xe04   :  { %v1934_v47 = vpop.permute.xlu0 %1933 }
 0xe05   :  { %1936 = vst.msk [vmem:[#allocation8 + $0x8] sm:$0xff] %vm67_vm0, %v1934_v47  ;;  %3259 = vmatmul.mubr.msk.f32.vlgmr.msra.gmra.mxu1 %vm67_vm0, %v1934_v47 }
 0xe06   :  { %3273 = vmatpush3.msra.mxu1 %v4439_v14  ;;  %3280 = vmatprep.mubr.msk.f32.mxu1 %vm3946_vm1, %v3945_v0 }
 0xe07   :  { %3274 = vmatprep.subr.mxu1 %v3945_v0 }
 0xe08   :  { %3275 = vmatpush3.msra.mxu1 %v4445_v26 }
 0xe09   :  { %3276 = vmatprep.subr.mxu1 %v3945_v0 }
 0xe0a   :  { %3277 = vmatpush3.msra.mxu1 %v4449_v16 }
 0xe0b   :  { %3278 = vmatprep.subr.mxu1 %v3945_v0 }
 0xe0c   :  { %3279 = vmatpush3.msra.mxu1 %v4453_v2 }
 0xec5   :  { %v2005_v4 = vpop.f32.mrf.mxu1 }
 0xec6   :  { %v2010_v58 = vrot.slane %v2005_v4, 3  ;;  %v2011_v43 = vrot.slane %v2005_v4, 4  ;;  %v2012_v30 = vrot.slane %v2005_v4, 5  ;;  %v2013_v11 = vrot.slane %v2005_v4, 6 }
 0xec7   :  { %v3260_v34 = vpop.f32.mrf.mxu1  ;;  %v2014_v26 = vrot.slane %v2005_v4, 7  ;;  %v2015_v13 = vrot.slane %v2005_v4, 1  ;;  %v2016_v23 = vrot.slane %v2005_v4, 2  ;;  %v2030_v57 = vadd.f32 %v2005_v4, %v4067_v35 }
 0xec8   :  { %v2025_v14 = vadd.f32 %v2010_v58, %v4053_v19  ;;  %v2026_v15 = vadd.f32 %v2011_v43, %v4058_v25  ;;  %v2027_v18 = vadd.f32 %v2012_v30, %v4064_v31  ;;  %v2028_v16 = vadd.f32 %v2013_v11, %v4060_v28 }
 0xec9   :  { %v2029_v0 = vadd.f32 %v2014_v26, %v4070_v39  ;;  %v2031_v45 = vadd.f32 %v2015_v13, %v4075_v44  ;;  %v2032_v51 = vadd.f32 %v2016_v23, %v4072_v41  ;;  %v3108_v46 = vmul.f32 -1.442695, %v2030_v57 }
 0xeca   :  { %3616 = vtanh.f32 %v2025_v14  ;;  %v3103_v21 = vmul.f32 -1.442695, %v2025_v14  ;;  %v3104_v38 = vmul.f32 -1.442695, %v2026_v15  ;;  %v3105_v60 = vmul.f32 -1.442695, %v2027_v18 }
 0xecb   :  { %3618 = vtanh.f32 %v2026_v15  ;;  %v3106_v42 = vmul.f32 -1.442695, %v2028_v16  ;;  %v3107_v55 = vmul.f32 -1.442695, %v2029_v0  ;;  %v3109_v12 = vmul.f32 -1.442695, %v2031_v45 }
 0xecc   :  { %3620 = vtanh.f32 %v2027_v18  ;;  %v3110_v61 = vmul.f32 -1.442695, %v2032_v51 }
 0xecd   :  { %3622 = vtanh.f32 %v2028_v16 }
 0xece   :  { %3624 = vtanh.f32 %v2029_v0 }
 0xecf   :  { %3626 = vtanh.f32 %v2031_v45 }
 0xed0   :  { %3628 = vtanh.f32 %v2030_v57 }
 0xed1   :  { %3630 = vtanh.f32 %v2032_v51 }
 0xed2   :  { %3632 = vpow2.f32 %v3103_v21 }
 0xed3   :  { %3634 = vpow2.f32 %v3104_v38 }
 0xed4   :  { %3636 = vpow2.f32 %v3105_v60 }
 0xed5   :  { %3638 = vpow2.f32 %v3106_v42  ;;  %v2097_v42 = vrot.slane %v4632_v50, 7 }
 0xed6   :  { %3640 = vpow2.f32 %v3107_v55 }
 0xed7   :  { %v3617_v2 = vpop.eup %3616  ;;  %3642 = vpow2.f32 %v3109_v12 }
 0xed8   :  { %2129 = vrot.lane.b32.xlu1 %v3617_v2, %s3947_s3  ;;  %v3619_v36 = vpop.eup %3618  ;;  %3644 = vpow2.f32 %v3108_v46  ;;  %v2098_v46 = vrot.slane %v4653_v52, 7 }
 0xed9   :  { %v3621_v7 = vpop.eup %3620  ;;  %2131 = vrot.lane.b32.xlu0 %v3619_v36, %s3947_s3 }
 0xeda   :  { %v3623_v3 = vpop.eup %3622 }
 0xedb   :  { %v3625_v24 = vpop.eup %3624 }
 0xedc   :  { %2133 = vrot.lane.b32.xlu1 %v3621_v7, %s3947_s3  ;;  %v3627_v53 = vpop.eup %3626 }
 0xedd   :  { %2135 = vrot.lane.b32.xlu0 %v3623_v3, %s3947_s3  ;;  %v3629_v9 = vpop.eup %3628 }
 0xede   :  { %v3631_v59 = vpop.eup %3630 }
 0xedf   :  { %v3633_v10 = vpop.eup %3632 }
 0xee0   :  { %2137 = vrot.lane.b32.xlu1 %v3625_v24, %s3947_s3  ;;  %v2057_v22 = vadd.f32 1.0, %v3633_v10  ;;  %v3635_v40 = vpop.eup %3634 }
 0xee1   :  { %2141 = vrot.lane.b32.xlu0 %v3627_v53, %s3947_s3  ;;  %v3637_v37 = vpop.eup %3636  ;;  %v2058_v32 = vadd.f32 1.0, %v3635_v40 }
 0xee2   :  { %3646 = vrcp.f32 %v2057_v22  ;;  %v3639_v29 = vpop.eup %3638  ;;  %v2059_v33 = vadd.f32 1.0, %v3637_v37  ;;  %v2099_v22 = vrot.slane %v4640_v1, 7 }
 0xee3   :  { %3648 = vpow2.f32 %v3110_v61  ;;  %v3641_v6 = vpop.eup %3640  ;;  %v2060_v5 = vadd.f32 1.0, %v3639_v29 }
 0xee4   :  { %2139 = vrot.lane.b32.xlu1 %v3629_v9, %s3947_s3  ;;  %3650 = vrcp.f32 %v2058_v32  ;;  %v3643_v54 = vpop.eup %3642  ;;  %v2061_v17 = vadd.f32 1.0, %v3641_v6  ;;  %v2100_v32 = vrot.slane %v4663_v63, 7 }
 0xee5   :  { %2143 = vrot.lane.b32.xlu0 %v3631_v59, %s3947_s3  ;;  %3652 = vrcp.f32 %v2059_v33  ;;  %v3645_v47 = vpop.eup %3644  ;;  %v2063_v58 = vadd.f32 1.0, %v3643_v54  ;;  %v2101_v33 = vrot.slane %v4643_v62, 7  ;;  %v2103_v54 = vrot.slane %v4660_v27, 7 }
 0xee6   :  { %3654 = vrcp.f32 %v2060_v5  ;;  %v2062_v43 = vadd.f32 1.0, %v3645_v47  ;;  %v2102_v47 = vrot.slane %v4650_v56, 7  ;;  %v2104_v27 = vrot.slane %v4668_v49, 7 }
 0xee7   :  { %3656 = vrcp.f32 %v2061_v17 }
 0xee8   :  { %3658 = vrcp.f32 %v2063_v58 }
 0xee9   :  { %3660 = vrcp.f32 %v2062_v43 }
 0xeef   :  { %v4721_v4 = vpop.eup %3646 }
 0xef0   :  { %v3649_v14 = vpop.eup %3648  ;;  %v2113_v55 = vmul.f32 %v4721_v4, %v2097_v42 }
 0xef1   :  { %v2064_v11 = vadd.f32 1.0, %v3649_v14  ;;  %v4725_v15 = vpop.eup %3650 }
 0xef2   :  { %v4727_v18 = vpop.eup %3652  ;;  %v2114_v61 = vmul.f32 %v4725_v15, %v2098_v46 }
 0xef3   :  { %3662 = vrcp.f32 %v2064_v11  ;;  %v4732_v2 = vpop.eup %3654  ;;  %v2115_v37 = vmul.f32 %v4727_v18, %v2099_v22 }
 0xef4   :  { %v4735_v45 = vpop.eup %3656  ;;  %v2116_v52 = vmul.f32 %v4732_v2, %v2100_v32 }
 0xef5   :  { %v4740_v7 = vpop.eup %3658  ;;  %v2117_v1 = vmul.f32 %v4735_v45, %v2101_v33 }
 0xef6   :  { %v4743_v24 = vpop.eup %3660 }
 0xef7   :  { %v2118_v43 = vmul.f32 %v4743_v24, %v2102_v47 }
 0xf00   :  { %v4748_v21 = vpop.eup %3662 }
 0xf4a   :  { %v2130_v34 = vpop.permute.xlu1 %2129 }
 0xf4b   :  { %v2153_v30 = vmul.f32 %v4721_v4, %v2130_v34  ;;  %v2132_v26 = vpop.permute.xlu0 %2131  ;;  %v2119_v34 = vmul.f32 %v4740_v7, %v2103_v54 }
 0xf4c   :  { %v2154_v13 = vmul.f32 %v4725_v15, %v2132_v26  ;;  %v2120_v26 = vmul.f32 %v4748_v21, %v2104_v27 }
 0xf4d   :  { %2169 = vrot.lane.b32.xlu1 %v2153_v30, %s3947_s3 }
 0xf4e   :  { %v2134_v16 = vpop.permute.xlu1 %2133  ;;  %2171 = vrot.lane.b32.xlu0 %v2154_v13, %s3947_s3 }
 0xf4f   :  { %v2155_v0 = vmul.f32 %v4727_v18, %v2134_v16  ;;  %v2136_v23 = vpop.permute.xlu0 %2135 }
 0xf50   :  { %v2156_v57 = vmul.f32 %v4732_v2, %v2136_v23 }
 0xf51   :  { %2173 = vrot.lane.b32.xlu1 %v2155_v0, %s3947_s3 }
 0xf52   :  { %v2138_v51 = vpop.permute.xlu1 %2137  ;;  %2175 = vrot.lane.b32.xlu0 %v2156_v57, %s3947_s3 }
 0xf53   :  { %v2157_v36 = vmul.f32 %v4735_v45, %v2138_v51  ;;  %v2142_v3 = vpop.permute.xlu0 %2141 }
 0xf54   :  { %v2159_v53 = vmul.f32 %v4740_v7, %v2142_v3 }
 0xf55   :  { %2177 = vrot.lane.b32.xlu1 %v2157_v36, %s3947_s3 }
 0xf56   :  { %v2140_v9 = vpop.permute.xlu1 %2139  ;;  %2181 = vrot.lane.b32.xlu0 %v2159_v53, %s3947_s3 }
 0xf57   :  { %v2158_v59 = vmul.f32 %v4743_v24, %v2140_v9  ;;  %v2144_v38 = vpop.permute.xlu0 %2143 }
 0xf58   :  { %v2160_v60 = vmul.f32 %v4748_v21, %v2144_v38 }
 0xf59   :  { %2179 = vrot.lane.b32.xlu1 %v2158_v59, %s3947_s3 }
 0xf5a   :  { %2183 = vrot.lane.b32.xlu0 %v2160_v60, %s3947_s3 }
 0xfbf   :  { %v2170_v10 = vpop.permute.xlu1 %2169 }
 0xfc0   :  { %v4755_v12 = vadd.f32 %v2170_v10, %v2113_v55  ;;  %v2172_v40 = vpop.permute.xlu0 %2171 }
 0xfc1   :  { %v4763_v29 = vadd.f32 %v2172_v40, %v2114_v61 }
 0xfc2   :  { %3664 = vtanh.f32 %v4755_v12 }
 0xfc3   :  { %v2174_v50 = vpop.permute.xlu1 %2173  ;;  %3666 = vtanh.f32 %v4763_v29 }
 0xfc4   :  { %v4766_v6 = vadd.f32 %v2174_v50, %v2115_v37  ;;  %v2176_v5 = vpop.permute.xlu0 %2175 }
 0xfc5   :  { %v4773_v17 = vadd.f32 %v2176_v5, %v2116_v52 }
 0xfc6   :  { %3668 = vtanh.f32 %v4766_v6 }
 0xfc7   :  { %v2178_v63 = vpop.permute.xlu1 %2177  ;;  %3670 = vtanh.f32 %v4773_v17 }
 0xfc8   :  { %v4776_v58 = vadd.f32 %v2178_v63, %v2117_v1  ;;  %v2182_v14 = vpop.permute.xlu0 %2181 }
 0xfc9   :  { %v4784_v30 = vadd.f32 %v2182_v14, %v2119_v34 }
 0xfca   :  { %3672 = vtanh.f32 %v4776_v58 }
 0xfcb   :  { %v2180_v11 = vpop.permute.xlu1 %2179  ;;  %3674 = vtanh.f32 %v4784_v30 }
 0xfcc   :  { %v4786_v56 = vadd.f32 %v2180_v11, %v2118_v43  ;;  %v2184_v13 = vpop.permute.xlu0 %2183 }
 0xfcd   :  { %v4791_v16 = vadd.f32 %v2184_v13, %v2120_v26 }
 0xfce   :  { %3676 = vtanh.f32 %v4786_v56 }
 0xfcf   :  { %v3665_v62 = vpop.eup %3664  ;;  %3678 = vtanh.f32 %v4791_v16 }
 0xfd0   :  { %2217 = vrot.lane.b32.xlu1 %v3665_v62, %s3947_s3  ;;  %v3667_v0 = vpop.eup %3666 }
 0xfd1   :  { %2219 = vrot.lane.b32.xlu0 %v3667_v0, %s3947_s3 }
 0xfd3   :  { %v3669_v23 = vpop.eup %3668 }
 0xfd4   :  { %2221 = vrot.lane.b32.xlu1 %v3669_v23, %s3947_s3  ;;  %v3671_v49 = vpop.eup %3670 }
 0xfd5   :  { %2223 = vrot.lane.b32.xlu0 %v3671_v49, %s3947_s3 }
 0xfd7   :  { %v3673_v57 = vpop.eup %3672 }
 0xfd8   :  { %2225 = vrot.lane.b32.xlu1 %v3673_v57, %s3947_s3  ;;  %v3675_v51 = vpop.eup %3674 }
 0xfd9   :  { %2229 = vrot.lane.b32.xlu0 %v3675_v51, %s3947_s3 }
 0xfdb   :  { %v3677_v36 = vpop.eup %3676 }
 0xfdc   :  { %2227 = vrot.lane.b32.xlu1 %v3677_v36, %s3947_s3  ;;  %v3679_v3 = vpop.eup %3678 }
 0xfdd   :  { %2231 = vrot.lane.b32.xlu0 %v3679_v3, %s3947_s3 }
0x1042   :  { %v2218_v53 = vpop.permute.xlu1 %2217 }
0x1043   :  { %v2241_v9 = vmul.f32 %v4721_v4, %v2218_v53  ;;  %v2220_v59 = vpop.permute.xlu0 %2219 }
0x1044   :  { %v2242_v38 = vmul.f32 %v4725_v15, %v2220_v59 }
0x1045   :  { %v2257_v60 = vrot.slane %v2241_v9, 5 }
0x1046   :  { %v2222_v42 = vpop.permute.xlu1 %2221  ;;  %v2258_v10 = vrot.slane %v2242_v38, 4 }
0x1047   :  { %v2243_v55 = vmul.f32 %v4727_v18, %v2222_v42  ;;  %v2224_v46 = vpop.permute.xlu0 %2223 }
0x1048   :  { %v2259_v61 = vsel %vm554_vm3, %v2258_v10, %v2257_v60  ;;  %v2244_v40 = vmul.f32 %v4732_v2, %v2224_v46 }
0x1049   :  { %v2260_v22 = vrot.slane %v2243_v55, 3 }
0x104a   :  { %v2226_v37 = vpop.permute.xlu1 %2225  ;;  %v2262_v4 = vrot.slane %v2244_v40, 2 }
0x104b   :  { %v2261_v32 = vsel %vm557_vm4, %v2260_v22, %v2259_v61  ;;  %v2245_v50 = vmul.f32 %v4735_v45, %v2226_v37  ;;  %v2230_v33 = vpop.permute.xlu0 %2229 }
0x104c   :  { %v2247_v15 = vmul.f32 %v4740_v7, %v2230_v33  ;;  %v2263_v5 = vsel %vm560_vm5, %v2262_v4, %v2261_v32 }
0x104d   :  { %v2264_v52 = vrot.slane %v2245_v50, 1 }
0x104e   :  { %v2228_v18 = vpop.permute.xlu1 %2227  ;;  %v2267_v63 = vrot.slane %v2247_v15, 7 }
0x104f   :  { %v2265_v1 = vsel %vm563_vm6, %v2264_v52, %v2263_v5  ;;  %v2246_v54 = vmul.f32 %v4743_v24, %v2228_v18  ;;  %v2232_v47 = vpop.permute.xlu0 %2231 }
0x1050   :  { %v2248_v62 = vmul.f32 %v4748_v21, %v2232_v47 }
0x1051   :  { %v2266_v2 = vsel %vm566_vm7, %v2246_v54, %v2265_v1 }
0x1052   :  { %v2268_v45 = vsel %vm569_vm8, %v2267_v63, %v2266_v2  ;;  %v2269_v34 = vrot.slane %v2248_v62, 6 }
0x1054   :  { %v4816_v14 = vsel %vm572_vm9, %v2269_v34, %v2268_v45 }
0x1055   :  { %2275 = vrot.lane.b32.xlu1 %v4816_v14, %s3948_s13 }
0x10c7   :  { %v2276_v7 = vpop.permute.xlu1 %2275 }
0x10c8   :  { %3270 = vmatmul.mubr.msk.f32.vlgmr.msra.gmra.mxu0 %vm67_vm0, %v2276_v7 }
0x1188   :  { %v2345_v43 = vpop.f32.mrf.mxu0 }
0x1189   :  { %v2350_v24 = vrot.slane %v2345_v43, 2  ;;  %v2351_v26 = vrot.slane %v2345_v43, 3  ;;  %v2352_v21 = vrot.slane %v2345_v43, 4  ;;  %v2353_v13 = vrot.slane %v2345_v43, 5 }
0x118a   :  { %v3271_v27 = vpop.f32.mrf.mxu0  ;;  %v2354_v23 = vrot.slane %v2345_v43, 6  ;;  %v2355_v57 = vrot.slane %v2345_v43, 7  ;;  %v2356_v36 = vrot.slane %v2345_v43, 1  ;;  %v2371_v38 = vadd.f32 %v2345_v43, %v4075_v44 }
0x118b   :  { %v2365_v11 = vadd.f32 %v2350_v24, %v4053_v19  ;;  %v2366_v0 = vadd.f32 %v2351_v26, %v4058_v25  ;;  %v2367_v49 = vadd.f32 %v2352_v21, %v4064_v31  ;;  %v2368_v51 = vadd.f32 %v2353_v13, %v4060_v28 }
0x118c   :  { %v2369_v3 = vadd.f32 %v2354_v23, %v4070_v39  ;;  %v2370_v9 = vadd.f32 %v2355_v57, %v4067_v35  ;;  %v2372_v59 = vadd.f32 %v2356_v36, %v4072_v41  ;;  %v3118_v18 = vmul.f32 -1.442695, %v2371_v38 }
0x118d   :  { %3680 = vtanh.f32 %v2365_v11  ;;  %v3112_v40 = vmul.f32 -1.442695, %v2365_v11  ;;  %v3113_v37 = vmul.f32 -1.442695, %v2366_v0  ;;  %v3114_v32 = vmul.f32 -1.442695, %v2367_v49 }
0x118e   :  { %3682 = vtanh.f32 %v2366_v0  ;;  %v3115_v50 = vmul.f32 -1.442695, %v2368_v51  ;;  %v3116_v4 = vmul.f32 -1.442695, %v2369_v3  ;;  %v3117_v52 = vmul.f32 -1.442695, %v2370_v9 }
0x118f   :  { %3684 = vtanh.f32 %v2367_v49  ;;  %v3119_v15 = vmul.f32 -1.442695, %v2372_v59 }
0x1190   :  { %3686 = vtanh.f32 %v2368_v51 }
0x1191   :  { %3688 = vtanh.f32 %v2369_v3 }
0x1192   :  { %3690 = vtanh.f32 %v2370_v9 }
0x1193   :  { %3692 = vtanh.f32 %v2372_v59 }
0x1194   :  { %3694 = vtanh.f32 %v2371_v38 }
0x1195   :  { %3696 = vpow2.f32 %v3112_v40 }
0x1196   :  { %3698 = vpow2.f32 %v3113_v37 }
0x1197   :  { %3700 = vpow2.f32 %v3114_v32 }
0x1198   :  { %3702 = vpow2.f32 %v3115_v50 }
0x1199   :  { %3704 = vpow2.f32 %v3116_v4  ;;  %v2437_v4 = vrot.slane %v4755_v12, 7 }
0x119a   :  { %v3681_v53 = vpop.eup %3680  ;;  %3706 = vpow2.f32 %v3117_v52 }
0x119b   :  { %2469 = vrot.lane.b32.xlu0 %v3681_v53, %s3947_s3  ;;  %v3683_v60 = vpop.eup %3682  ;;  %3708 = vpow2.f32 %v3119_v15 }
0x119c   :  { %v3685_v42 = vpop.eup %3684  ;;  %2471 = vrot.lane.b32.xlu1 %v3683_v60, %s3947_s3 }
0x119d   :  { %v3687_v55 = vpop.eup %3686 }
0x119e   :  { %v3689_v10 = vpop.eup %3688 }
0x119f   :  { %2473 = vrot.lane.b32.xlu0 %v3685_v42, %s3947_s3  ;;  %v3691_v46 = vpop.eup %3690 }
0x11a0   :  { %2475 = vrot.lane.b32.xlu1 %v3687_v55, %s3947_s3  ;;  %v3693_v22 = vpop.eup %3692 }
0x11a1   :  { %v3695_v61 = vpop.eup %3694 }
0x11a2   :  { %v3697_v33 = vpop.eup %3696 }
0x11a3   :  { %2477 = vrot.lane.b32.xlu0 %v3689_v10, %s3947_s3  ;;  %v2397_v5 = vadd.f32 1.0, %v3697_v33  ;;  %v3699_v1 = vpop.eup %3698 }
0x11a4   :  { %2479 = vrot.lane.b32.xlu1 %v3691_v46, %s3947_s3  ;;  %v3701_v54 = vpop.eup %3700  ;;  %v2398_v63 = vadd.f32 1.0, %v3699_v1 }
0x11a5   :  { %3710 = vrcp.f32 %v2397_v5  ;;  %v3703_v47 = vpop.eup %3702  ;;  %v2399_v2 = vadd.f32 1.0, %v3701_v54  ;;  %v2438_v5 = vrot.slane %v4763_v29, 7 }
0x11a6   :  { %3712 = vpow2.f32 %v3118_v18  ;;  %v3705_v62 = vpop.eup %3704  ;;  %v2400_v45 = vadd.f32 1.0, %v3703_v47  ;;  %v2439_v18 = vrot.slane %v4766_v6, 7  ;;  %v2440_v47 = vrot.slane %v4773_v17, 7 }
0x11a7   :  { %2483 = vrot.lane.b32.xlu0 %v3693_v22, %s3947_s3  ;;  %3714 = vrcp.f32 %v2398_v63  ;;  %v3707_v34 = vpop.eup %3706  ;;  %v2401_v7 = vadd.f32 1.0, %v3705_v62  ;;  %v2441_v62 = vrot.slane %v4776_v58, 7 }
0x11a8   :  { %2481 = vrot.lane.b32.xlu1 %v3695_v61, %s3947_s3  ;;  %3716 = vrcp.f32 %v2399_v2  ;;  %v3709_v43 = vpop.eup %3708  ;;  %v2402_v27 = vadd.f32 1.0, %v3707_v34 }
0x11a9   :  { %3718 = vrcp.f32 %v2400_v45  ;;  %v2404_v21 = vadd.f32 1.0, %v3709_v43 }
0x11aa   :  { %3720 = vrcp.f32 %v2401_v7  ;;  %v2442_v7 = vrot.slane %v4786_v56, 7  ;;  %v2443_v56 = vrot.slane %v4784_v30, 7 }
0x11ab   :  { %3722 = vrcp.f32 %v2402_v27  ;;  %v2444_v27 = vrot.slane %v4791_v16, 7 }
0x11ac   :  { %3724 = vrcp.f32 %v2404_v21 }
0x11b2   :  { %v4837_v24 = vpop.eup %3710 }
0x11b3   :  { %v3713_v26 = vpop.eup %3712  ;;  %v2453_v33 = vmul.f32 %v4837_v24, %v2437_v4 }
0x11b4   :  { %v2403_v0 = vadd.f32 1.0, %v3713_v26  ;;  %v4841_v23 = vpop.eup %3714 }
0x11b5   :  { %v4843_v57 = vpop.eup %3716  ;;  %v2454_v1 = vmul.f32 %v4841_v23, %v2438_v5 }
0x11b6   :  { %3726 = vrcp.f32 %v2403_v0  ;;  %v4848_v53 = vpop.eup %3718  ;;  %v2455_v63 = vmul.f32 %v4843_v57, %v2439_v18 }
0x11b7   :  { %v4851_v59 = vpop.eup %3720  ;;  %v2456_v29 = vmul.f32 %v4848_v53, %v2440_v47 }
0x11b8   :  { %v4856_v55 = vpop.eup %3722  ;;  %v2457_v6 = vmul.f32 %v4851_v59, %v2441_v62 }
0x11b9   :  { %v4859_v46 = vpop.eup %3724  ;;  %v2458_v26 = vmul.f32 %v4856_v55, %v2442_v7 }
0x11c3   :  { %v4864_v37 = vpop.eup %3726 }
0x120d   :  { %v2470_v11 = vpop.permute.xlu0 %2469 }
0x120e   :  { %v2493_v13 = vmul.f32 %v4837_v24, %v2470_v11  ;;  %v2472_v49 = vpop.permute.xlu1 %2471 }
0x120f   :  { %v2494_v51 = vmul.f32 %v4841_v23, %v2472_v49 }
0x1210   :  { %2509 = vrot.lane.b32.xlu0 %v2493_v13, %s3947_s3  ;;  %v2460_v13 = vmul.f32 %v4859_v46, %v2444_v27 }
0x1211   :  { %v2474_v36 = vpop.permute.xlu0 %2473  ;;  %2511 = vrot.lane.b32.xlu1 %v2494_v51, %s3947_s3  ;;  %v2459_v51 = vmul.f32 %v4864_v37, %v2443_v56 }
0x1212   :  { %v2495_v3 = vmul.f32 %v4843_v57, %v2474_v36  ;;  %v2476_v9 = vpop.permute.xlu1 %2475 }
0x1213   :  { %v2496_v38 = vmul.f32 %v4848_v53, %v2476_v9 }
0x1214   :  { %2513 = vrot.lane.b32.xlu0 %v2495_v3, %s3947_s3 }
0x1215   :  { %v2478_v60 = vpop.permute.xlu0 %2477  ;;  %2515 = vrot.lane.b32.xlu1 %v2496_v38, %s3947_s3 }
0x1216   :  { %v2497_v42 = vmul.f32 %v4851_v59, %v2478_v60  ;;  %v2480_v10 = vpop.permute.xlu1 %2479 }
0x1217   :  { %v2498_v22 = vmul.f32 %v4856_v55, %v2480_v10 }
0x1218   :  { %2517 = vrot.lane.b32.xlu0 %v2497_v42, %s3947_s3 }
0x1219   :  { %v2484_v61 = vpop.permute.xlu0 %2483  ;;  %2519 = vrot.lane.b32.xlu1 %v2498_v22, %s3947_s3 }
0x121a   :  { %v2500_v40 = vmul.f32 %v4859_v46, %v2484_v61  ;;  %v2482_v32 = vpop.permute.xlu1 %2481 }
0x121b   :  { %v2499_v50 = vmul.f32 %v4864_v37, %v2482_v32 }
0x121c   :  { %2523 = vrot.lane.b32.xlu0 %v2500_v40, %s3947_s3 }
0x121d   :  { %2521 = vrot.lane.b32.xlu1 %v2499_v50, %s3947_s3 }
0x1282   :  { %v2510_v52 = vpop.permute.xlu0 %2509 }
0x1283   :  { %v4871_v15 = vadd.f32 %v2510_v52, %v2453_v33  ;;  %v2512_v54 = vpop.permute.xlu1 %2511 }
0x1284   :  { %v4879_v2 = vadd.f32 %v2512_v54, %v2454_v1 }
0x1285   :  { %3728 = vtanh.f32 %v4871_v15 }
0x1286   :  { %v2514_v12 = vpop.permute.xlu0 %2513  ;;  %3730 = vtanh.f32 %v4879_v2 }
0x1287   :  { %v4882_v45 = vadd.f32 %v2514_v12, %v2455_v63  ;;  %v2516_v34 = vpop.permute.xlu1 %2515 }
0x1288   :  { %v4889_v43 = vadd.f32 %v2516_v34, %v2456_v29 }
0x1289   :  { %3732 = vtanh.f32 %v4882_v45 }
0x128a   :  { %v2518_v17 = vpop.permute.xlu0 %2517  ;;  %3734 = vtanh.f32 %v4889_v43 }
0x128b   :  { %v4892_v11 = vadd.f32 %v2518_v17, %v2457_v6  ;;  %v2520_v21 = vpop.permute.xlu1 %2519 }
0x128c   :  { %v4900_v0 = vadd.f32 %v2520_v21, %v2458_v26 }
0x128d   :  { %3736 = vtanh.f32 %v4892_v11 }
0x128e   :  { %v2524_v49 = vpop.permute.xlu0 %2523  ;;  %3738 = vtanh.f32 %v4900_v0 }
0x128f   :  { %v4902_v16 = vadd.f32 %v2524_v49, %v2460_v13  ;;  %v2522_v36 = vpop.permute.xlu1 %2521 }
0x1290   :  { %v4907_v3 = vadd.f32 %v2522_v36, %v2459_v51 }
0x1291   :  { %3740 = vtanh.f32 %v4902_v16 }
0x1292   :  { %v3729_v58 = vpop.eup %3728  ;;  %3742 = vtanh.f32 %v4907_v3 }
0x1293   :  { %2557 = vrot.lane.b32.xlu0 %v3729_v58, %s3947_s3  ;;  %v3731_v9 = vpop.eup %3730 }
0x1294   :  { %2559 = vrot.lane.b32.xlu1 %v3731_v9, %s3947_s3 }
0x1296   :  { %v3733_v38 = vpop.eup %3732 }
0x1297   :  { %2561 = vrot.lane.b32.xlu0 %v3733_v38, %s3947_s3  ;;  %v3735_v30 = vpop.eup %3734 }
0x1298   :  { %2563 = vrot.lane.b32.xlu1 %v3735_v30, %s3947_s3 }
0x129a   :  { %v3737_v60 = vpop.eup %3736 }
0x129b   :  { %2565 = vrot.lane.b32.xlu0 %v3737_v60, %s3947_s3  ;;  %v3739_v42 = vpop.eup %3738 }
0x129c   :  { %2567 = vrot.lane.b32.xlu1 %v3739_v42, %s3947_s3 }
0x129e   :  { %v3741_v10 = vpop.eup %3740 }
0x129f   :  { %2571 = vrot.lane.b32.xlu0 %v3741_v10, %s3947_s3  ;;  %v3743_v22 = vpop.eup %3742 }
0x12a0   :  { %2569 = vrot.lane.b32.xlu1 %v3743_v22, %s3947_s3 }
0x1305   :  { %v2558_v61 = vpop.permute.xlu0 %2557 }
0x1306   :  { %v2581_v40 = vmul.f32 %v4837_v24, %v2558_v61  ;;  %v2560_v32 = vpop.permute.xlu1 %2559 }
0x1307   :  { %v2582_v50 = vmul.f32 %v4841_v23, %v2560_v32 }
0x1308   :  { %v2597_v4 = vrot.slane %v2581_v40, 6 }
0x1309   :  { %v2562_v33 = vpop.permute.xlu0 %2561  ;;  %v2598_v5 = vrot.slane %v2582_v50, 5 }
0x130a   :  { %v2583_v52 = vmul.f32 %v4843_v57, %v2562_v33  ;;  %v2564_v18 = vpop.permute.xlu1 %2563 }
0x130b   :  { %v2599_v54 = vsel %vm554_vm3, %v2598_v5, %v2597_v4  ;;  %v2584_v63 = vmul.f32 %v4848_v53, %v2564_v18 }
0x130c   :  { %v2600_v1 = vrot.slane %v2583_v52, 4 }
0x130d   :  { %v2566_v47 = vpop.permute.xlu0 %2565  ;;  %v2602_v24 = vrot.slane %v2584_v63, 3 }
0x130e   :  { %v2601_v12 = vsel %vm557_vm4, %v2600_v1, %v2599_v54  ;;  %v2585_v62 = vmul.f32 %v4851_v59, %v2566_v47  ;;  %v2568_v29 = vpop.permute.xlu1 %2567 }
0x130f   :  { %v2586_v23 = vmul.f32 %v4856_v55, %v2568_v29  ;;  %v2603_v6 = vsel %vm560_vm5, %v2602_v24, %v2601_v12 }
0x1310   :  { %v2604_v34 = vrot.slane %v2585_v62, 2 }
0x1311   :  { %v2572_v57 = vpop.permute.xlu0 %2571  ;;  %v2606_v27 = vrot.slane %v2586_v23, 1 }
0x1312   :  { %v2605_v7 = vsel %vm563_vm6, %v2604_v34, %v2603_v6  ;;  %v2588_v17 = vmul.f32 %v4859_v46, %v2572_v57  ;;  %v2570_v58 = vpop.permute.xlu1 %2569 }
0x1313   :  { %v2587_v26 = vmul.f32 %v4864_v37, %v2570_v58  ;;  %v2607_v21 = vsel %vm566_vm7, %v2606_v27, %v2605_v7 }
0x1314   :  { %v2609_v53 = vrot.slane %v2588_v17, 7 }
0x1315   :  { %v2608_v59 = vsel %vm569_vm8, %v2587_v26, %v2607_v21 }
0x1316   :  { %v4932_v13 = vsel %vm572_vm9, %v2609_v53, %v2608_v59 }
0x1317   :  { %2613 = vrot.lane.b32.xlu0 %v4932_v13, %s3948_s13 }
0x1389   :  { %v2614_v55 = vpop.permute.xlu0 %2613 }
0x138a   :  { %3281 = vmatmul.mubr.msk.f32.vlgmr.msra.gmra.mxu1 %vm67_vm0, %v2614_v55 }
0x144a   :  { %v2683_v56 = vpop.f32.mrf.mxu1 }
0x144b   :  { %v2688_v46 = vrot.slane %v2683_v56, 1  ;;  %v2689_v37 = vrot.slane %v2683_v56, 2  ;;  %v2690_v36 = vrot.slane %v2683_v56, 3  ;;  %v2691_v9 = vrot.slane %v2683_v56, 4 }
0x144c   :  { %v3282_v49 = vpop.f32.mrf.mxu1  ;;  %v2692_v30 = vrot.slane %v2683_v56, 5  ;;  %v2693_v42 = vrot.slane %v2683_v56, 6  ;;  %v2694_v22 = vrot.slane %v2683_v56, 7 }
0x144d   :  { %v2703_v51 = vadd.f32 %v2688_v46, %v4053_v19  ;;  %v2704_v38 = vadd.f32 %v2689_v37, %v4058_v25  ;;  %v2705_v60 = vadd.f32 %v2690_v36, %v4064_v31  ;;  %v2706_v10 = vadd.f32 %v2691_v9, %v4060_v28 }
0x144e   :  { %v2707_v61 = vadd.f32 %v2692_v30, %v4070_v39  ;;  %v2708_v19 = vadd.f32 %v2693_v42, %v4067_v35  ;;  %v2709_v32 = vadd.f32 %v2694_v22, %v4075_v44  ;;  %v2710_v25 = vadd.f32 %v2683_v56, %v4072_v41 }
0x144f   :  { %3744 = vtanh.f32 %v2703_v51  ;;  %v3121_v4 = vmul.f32 -1.442695, %v2703_v51  ;;  %v3122_v33 = vmul.f32 -1.442695, %v2704_v38  ;;  %v3123_v52 = vmul.f32 -1.442695, %v2705_v60 }
0x1450   :  { %3746 = vtanh.f32 %v2704_v38  ;;  %v3124_v5 = vmul.f32 -1.442695, %v2706_v10  ;;  %v3125_v18 = vmul.f32 -1.442695, %v2707_v61  ;;  %v3126_v54 = vmul.f32 -1.442695, %v2708_v19 }
0x1451   :  { %3748 = vtanh.f32 %v2705_v60  ;;  %v3127_v63 = vmul.f32 -1.442695, %v2709_v32  ;;  %v3128_v12 = vmul.f32 -1.442695, %v2710_v25 }
0x1452   :  { %3750 = vtanh.f32 %v2706_v10 }
0x1453   :  { %3752 = vtanh.f32 %v2707_v61 }
0x1454   :  { %3754 = vtanh.f32 %v2708_v19 }
0x1455   :  { %3756 = vtanh.f32 %v2709_v32 }
0x1456   :  { %3758 = vtanh.f32 %v2710_v25 }
0x1457   :  { %3760 = vpow2.f32 %v3121_v4 }
0x1458   :  { %3762 = vpow2.f32 %v3122_v33  ;;  %v2776_v33 = vrot.slane %v4879_v2, 7 }
0x1459   :  { %3764 = vpow2.f32 %v3123_v52  ;;  %v2777_v52 = vrot.slane %v4882_v45, 7 }
0x145a   :  { %3766 = vpow2.f32 %v3124_v5 }
0x145b   :  { %3768 = vpow2.f32 %v3125_v18 }
0x145c   :  { %v3745_v40 = vpop.eup %3744  ;;  %3770 = vpow2.f32 %v3126_v54  ;;  %v2778_v54 = vrot.slane %v4889_v43, 7  ;;  %v2781_v43 = vrot.slane %v4907_v3, 7 }
0x145d   :  { %2807 = vrot.lane.b32.xlu1 %v3745_v40, %s3947_s3  ;;  %v3747_v28 = vpop.eup %3746  ;;  %3772 = vpow2.f32 %v3127_v63 }
0x145e   :  { %v3749_v31 = vpop.eup %3748  ;;  %2809 = vrot.lane.b32.xlu0 %v3747_v28, %s3947_s3 }
0x145f   :  { %v3751_v39 = vpop.eup %3750 }
0x1460   :  { %v3753_v50 = vpop.eup %3752 }
0x1461   :  { %2811 = vrot.lane.b32.xlu1 %v3749_v31, %s3947_s3  ;;  %v3755_v35 = vpop.eup %3754 }
0x1462   :  { %2813 = vrot.lane.b32.xlu0 %v3751_v39, %s3947_s3  ;;  %v3757_v44 = vpop.eup %3756 }
0x1463   :  { %v3759_v41 = vpop.eup %3758 }
0x1464   :  { %v3761_v1 = vpop.eup %3760 }
0x1465   :  { %2815 = vrot.lane.b32.xlu1 %v3753_v50, %s3947_s3  ;;  %v2735_v47 = vadd.f32 1.0, %v3761_v1  ;;  %v3763_v62 = vpop.eup %3762 }
0x1466   :  { %2817 = vrot.lane.b32.xlu0 %v3755_v35, %s3947_s3  ;;  %v3765_v24 = vpop.eup %3764  ;;  %v2736_v29 = vadd.f32 1.0, %v3763_v62  ;;  %v2775_v35 = vrot.slane %v4871_v15, 7 }
0x1467   :  { %3774 = vrcp.f32 %v2735_v47  ;;  %v3767_v34 = vpop.eup %3766  ;;  %v2737_v23 = vadd.f32 1.0, %v3765_v24  ;;  %v2779_v47 = vrot.slane %v4892_v11, 7 }
0x1468   :  { %3776 = vpow2.f32 %v3128_v12  ;;  %v3769_v6 = vpop.eup %3768  ;;  %v2738_v57 = vadd.f32 1.0, %v3767_v34  ;;  %v2780_v34 = vrot.slane %v4900_v0, 7  ;;  %v2782_v0 = vrot.slane %v4902_v16, 7 }
0x1469   :  { %2819 = vrot.lane.b32.xlu1 %v3757_v44, %s3947_s3  ;;  %3778 = vrcp.f32 %v2736_v29  ;;  %v3771_v7 = vpop.eup %3770  ;;  %v2739_v17 = vadd.f32 1.0, %v3769_v6 }
0x146a   :  { %2821 = vrot.lane.b32.xlu0 %v3759_v41, %s3947_s3  ;;  %3780 = vrcp.f32 %v2737_v23  ;;  %v3773_v27 = vpop.eup %3772  ;;  %v2740_v53 = vadd.f32 1.0, %v3771_v7 }
0x146b   :  { %3782 = vrcp.f32 %v2738_v57  ;;  %v2741_v59 = vadd.f32 1.0, %v3773_v27 }
0x146c   :  { %3784 = vrcp.f32 %v2739_v17 }
0x146d   :  { %3786 = vrcp.f32 %v2740_v53 }
0x146e   :  { %3788 = vrcp.f32 %v2741_v59 }
0x1474   :  { %v4953_v58 = vpop.eup %3774 }
0x1475   :  { %v3777_v21 = vpop.eup %3776  ;;  %v2791_v44 = vmul.f32 %v4953_v58, %v2775_v35 }
0x1476   :  { %v2742_v56 = vadd.f32 1.0, %v3777_v21  ;;  %v4957_v46 = vpop.eup %3778 }
0x1477   :  { %v4959_v51 = vpop.eup %3780  ;;  %v2792_v5 = vmul.f32 %v4957_v46, %v2776_v33 }
0x1478   :  { %3790 = vrcp.f32 %v2742_v56  ;;  %v4964_v38 = vpop.eup %3782  ;;  %v2793_v1 = vmul.f32 %v4959_v51, %v2777_v52 }
0x1479   :  { %v4967_v60 = vpop.eup %3784  ;;  %v2794_v62 = vmul.f32 %v4964_v38, %v2778_v54 }
0x147a   :  { %v4972_v61 = vpop.eup %3786  ;;  %v2795_v45 = vmul.f32 %v4967_v60, %v2779_v47 }
0x147b   :  { %v4975_v19 = vpop.eup %3788  ;;  %v2796_v27 = vmul.f32 %v4972_v61, %v2780_v34 }
0x147c   :  { %v2797_v21 = vmul.f32 %v4975_v19, %v2781_v43 }
0x1485   :  { %v4980_v31 = vpop.eup %3790 }
0x14cf   :  { %v2808_v26 = vpop.permute.xlu1 %2807 }
0x14d0   :  { %v2831_v55 = vmul.f32 %v4953_v58, %v2808_v26  ;;  %v2810_v49 = vpop.permute.xlu0 %2809 }
0x14d1   :  { %v2832_v37 = vmul.f32 %v4957_v46, %v2810_v49 }
0x14d2   :  { %2847 = vrot.lane.b32.xlu1 %v2831_v55, %s3947_s3 }
0x14d3   :  { %v2812_v36 = vpop.permute.xlu1 %2811  ;;  %2849 = vrot.lane.b32.xlu0 %v2832_v37, %s3947_s3 }
0x14d4   :  { %v2833_v9 = vmul.f32 %v4959_v51, %v2812_v36  ;;  %v2814_v30 = vpop.permute.xlu0 %2813  ;;  %v2798_v36 = vmul.f32 %v4980_v31, %v2782_v0 }
0x14d5   :  { %v2834_v42 = vmul.f32 %v4964_v38, %v2814_v30 }
0x14d6   :  { %2851 = vrot.lane.b32.xlu1 %v2833_v9, %s3947_s3 }
0x14d7   :  { %v2816_v10 = vpop.permute.xlu1 %2815  ;;  %2853 = vrot.lane.b32.xlu0 %v2834_v42, %s3947_s3 }
0x14d8   :  { %v2835_v22 = vmul.f32 %v4967_v60, %v2816_v10  ;;  %v2818_v40 = vpop.permute.xlu0 %2817 }
0x14d9   :  { %v2836_v32 = vmul.f32 %v4972_v61, %v2818_v40 }
0x14da   :  { %2855 = vrot.lane.b32.xlu1 %v2835_v22, %s3947_s3 }
0x14db   :  { %v2820_v25 = vpop.permute.xlu1 %2819  ;;  %2857 = vrot.lane.b32.xlu0 %v2836_v32, %s3947_s3 }
0x14dc   :  { %v2837_v28 = vmul.f32 %v4975_v19, %v2820_v25  ;;  %v2822_v39 = vpop.permute.xlu0 %2821 }
0x14dd   :  { %v2838_v50 = vmul.f32 %v4980_v31, %v2822_v39 }
0x14de   :  { %2859 = vrot.lane.b32.xlu1 %v2837_v28, %s3947_s3 }
0x14df   :  { %2861 = vrot.lane.b32.xlu0 %v2838_v50, %s3947_s3 }
0x1544   :  { %v2848_v41 = vpop.permute.xlu1 %2847 }
0x1545   :  { %v4987_v4 = vadd.f32 %v2848_v41, %v2791_v44  ;;  %v2850_v18 = vpop.permute.xlu0 %2849 }
0x1546   :  { %v2872_v63 = vadd.f32 %v2850_v18, %v2792_v5 }
0x1547   :  { %3792 = vtanh.f32 %v4987_v4 }
0x1548   :  { %v2852_v15 = vpop.permute.xlu1 %2851  ;;  %3794 = vtanh.f32 %v2872_v63  ;;  %v2984_v24 = vrot.slane %v2872_v63, 7 }
0x1549   :  { %v2873_v12 = vadd.f32 %v2852_v15, %v2793_v1  ;;  %v2854_v29 = vpop.permute.xlu0 %2853 }
0x154a   :  { %v2874_v23 = vadd.f32 %v2854_v29, %v2794_v62 }
0x154b   :  { %3796 = vtanh.f32 %v2873_v12  ;;  %v2985_v2 = vrot.slane %v2873_v12, 6 }
0x154c   :  { %v2856_v6 = vpop.permute.xlu1 %2855  ;;  %3798 = vtanh.f32 %v2874_v23  ;;  %v2987_v17 = vrot.slane %v2874_v23, 5 }
0x154d   :  { %v2986_v57 = vsel %vm554_vm3, %v2985_v2, %v2984_v24  ;;  %v2875_v7 = vadd.f32 %v2856_v6, %v2795_v45  ;;  %v2858_v53 = vpop.permute.xlu0 %2857 }
0x154e   :  { %v2876_v59 = vadd.f32 %v2858_v53, %v2796_v27  ;;  %v2988_v3 = vsel %vm557_vm4, %v2987_v17, %v2986_v57 }
0x154f   :  { %3800 = vtanh.f32 %v2875_v7  ;;  %v2989_v26 = vrot.slane %v2875_v7, 4 }
0x1550   :  { %v2860_v55 = vpop.permute.xlu1 %2859  ;;  %3802 = vtanh.f32 %v2876_v59  ;;  %v2991_v37 = vrot.slane %v2876_v59, 3 }
0x1551   :  { %v2990_v56 = vsel %vm560_vm5, %v2989_v26, %v2988_v3  ;;  %v2877_v49 = vadd.f32 %v2860_v55, %v2797_v21  ;;  %v2862_v9 = vpop.permute.xlu0 %2861 }
0x1552   :  { %v2878_v42 = vadd.f32 %v2862_v9, %v2798_v36  ;;  %v2992_v10 = vsel %vm563_vm6, %v2991_v37, %v2990_v56 }
0x1553   :  { %3804 = vtanh.f32 %v2877_v49  ;;  %v2993_v30 = vrot.slane %v2877_v49, 2 }
0x1554   :  { %v3793_v11 = vpop.eup %3792  ;;  %3806 = vtanh.f32 %v2878_v42  ;;  %v2995_v16 = vrot.slane %v2878_v42, 1 }
0x1555   :  { %2895 = vrot.lane.b32.xlu1 %v3793_v11, %s3947_s3  ;;  %v2994_v22 = vsel %vm566_vm7, %v2993_v30, %v2992_v10  ;;  %v3795_v40 = vpop.eup %3794 }
0x1556   :  { %2897 = vrot.lane.b32.xlu0 %v3795_v40, %s3947_s3  ;;  %v5012_v25 = vsel %vm569_vm8, %v2995_v16, %v2994_v22 }
0x1558   :  { %v3797_v32 = vpop.eup %3796 }
0x1559   :  { %2899 = vrot.lane.b32.xlu1 %v3797_v32, %s3947_s3  ;;  %v3799_v28 = vpop.eup %3798 }
0x155a   :  { %2901 = vrot.lane.b32.xlu0 %v3799_v28, %s3947_s3 }
0x155c   :  { %v3801_v39 = vpop.eup %3800 }
0x155d   :  { %2903 = vrot.lane.b32.xlu1 %v3801_v39, %s3947_s3  ;;  %v3803_v50 = vpop.eup %3802 }
0x155e   :  { %2905 = vrot.lane.b32.xlu0 %v3803_v50, %s3947_s3 }
0x1560   :  { %v3805_v35 = vpop.eup %3804 }
0x1561   :  { %2907 = vrot.lane.b32.xlu1 %v3805_v35, %s3947_s3  ;;  %v3807_v44 = vpop.eup %3806 }
0x1562   :  { %2909 = vrot.lane.b32.xlu0 %v3807_v44, %s3947_s3 }
0x1565   :  { %912 = vrot.lane.b32.xlu1 %v4308_v8, %s3949_s14 }
0x1566   :  { %2271 = vrot.lane.b32.xlu0 %v4816_v14, %s3949_s14 }
0x1569   :  { %1592 = vrot.lane.b32.xlu1 %v4568_v20, %s3947_s3 }
0x15c7   :  { %v2896_v41 = vpop.permute.xlu1 %2895 }
0x15c8   :  { %v2919_v33 = vmul.f32 %v4953_v58, %v2896_v41  ;;  %v2898_v52 = vpop.permute.xlu0 %2897 }
0x15c9   :  { %v2920_v5 = vmul.f32 %v4957_v46, %v2898_v52 }
0x15ca   :  { %2966 = vrot.lane.b32.xlu1 %v2919_v33, %s3948_s13  ;;  %v2935_v15 = vrot.slane %v2919_v33, 7 }
0x15cb   :  { %v2900_v18 = vpop.permute.xlu1 %2899  ;;  %v2953_v1 = vrot.slane %v2920_v5, 7  ;;  %v2936_v63 = vrot.slane %v2920_v5, 6 }
0x15cc   :  { %v2921_v8 = vmul.f32 %v4959_v51, %v2900_v18  ;;  %v2902_v54 = vpop.permute.xlu0 %2901 }
0x15cd   :  { %v2922_v20 = vmul.f32 %v4964_v38, %v2902_v54  ;;  %v2937_v46 = vsel %vm554_vm3, %v2936_v63, %v2935_v15 }
0x15ce   :  { %2997 = vrot.lane.b32.xlu1 %v4987_v4, %s3949_s14  ;;  %v2954_v14 = vrot.slane %v2921_v8, 6  ;;  %v2938_v58 = vrot.slane %v2921_v8, 5 }
0x15cf   :  { %v2904_v47 = vpop.permute.xlu1 %2903  ;;  %v2956_v4 = vrot.slane %v2922_v20, 5  ;;  %v2940_v2 = vrot.slane %v2922_v20, 4 }
0x15d0   :  { %v2955_v12 = vsel %vm554_vm3, %v2954_v14, %v2953_v1  ;;  %v2923_v62 = vmul.f32 %v4967_v60, %v2904_v47  ;;  %v2906_v24 = vpop.permute.xlu0 %2905  ;;  %v2939_v23 = vsel %vm557_vm4, %v2938_v58, %v2937_v46 }
0x15d1   :  { %v2924_v51 = vmul.f32 %v4972_v61, %v2906_v24  ;;  %v2957_v45 = vsel %vm557_vm4, %v2956_v4, %v2955_v12  ;;  %v2941_v17 = vsel %vm560_vm5, %v2940_v2, %v2939_v23 }
0x15d2   :  { %v2958_v29 = vrot.slane %v2923_v62, 4  ;;  %v2942_v38 = vrot.slane %v2923_v62, 3 }
0x15d3   :  { %v2908_v34 = vpop.permute.xlu1 %2907  ;;  %v2960_v57 = vrot.slane %v2924_v51, 3  ;;  %v2944_v11 = vrot.slane %v2924_v51, 2 }
0x15d4   :  { %v2959_v6 = vsel %vm560_vm5, %v2958_v29, %v2957_v45  ;;  %v2925_v43 = vmul.f32 %v4975_v19, %v2908_v34  ;;  %v2910_v60 = vpop.permute.xlu0 %2909  ;;  %v2943_v26 = vsel %vm563_vm6, %v2942_v38, %v2941_v17 }
0x15d5   :  { %v2926_v61 = vmul.f32 %v4980_v31, %v2910_v60  ;;  %v2961_v53 = vsel %vm563_vm6, %v2960_v57, %v2959_v6  ;;  %v2945_v55 = vsel %vm566_vm7, %v2944_v11, %v2943_v26 }
0x15d6   :  { %v2962_v7 = vrot.slane %v2925_v43, 2  ;;  %v2946_v21 = vrot.slane %v2925_v43, 1 }
0x15d7   :  { %v913_v27 = vpop.permute.xlu1 %912  ;;  %v2964_v0 = vrot.slane %v2926_v61, 1 }
0x15d8   :  { %916 = vst.msk [vmem:[#allocation8] sm:$0xff] %vm915_vm10, %v913_v27  ;;  %v2963_v19 = vsel %vm566_vm7, %v2962_v7, %v2961_v53  ;;  %v2272_v59 = vpop.permute.xlu0 %2271  ;;  %v2947_v56 = vsel %vm569_vm8, %v2946_v21, %v2945_v55 }
0x15d9   :  { %1255 = vst.msk [vmem:[#allocation8] sm:$0xff] %vm1254_vm11, %v4434_v48  ;;  %v2965_v31 = vsel %vm569_vm8, %v2964_v0, %v2963_v19  ;;  %v2948_v48 = vsel %vm572_vm9, %v2926_v61, %v2947_v56 }
0x15da   :  { %2274 = vst.msk [vmem:[#allocation8 + $0x8] sm:$0xff] %vm915_vm10, %v2272_v59  ;;  %2968 = vrot.lane.b32.xlu0 %v2965_v31, %s3948_s13 }
0x15db   :  { %v1593_v3 = vpop.permute.xlu1 %1592  ;;  %2612 = vst.msk [vmem:[#allocation8 + $0x8] sm:$0xff] %vm1254_vm11, %v4932_v13 }
0x15dc   :  { %1596 = vst.msk [vmem:[#allocation8] sm:$0xff] %vm1595_vm12, %v1593_v3 }
0x15de   :  { %2949 = vrot.lane.b32.xlu0 %v2948_v48, %s3947_s3 }
0x15e2   :  { %2999 = vrot.lane.b32.xlu0 %v5012_v25, %s3949_s14 }
0x163c   :  { %v2967_v49 = vpop.permute.xlu1 %2966 }
0x163d   :  { %2973 = vst.msk [vmem:[#allocation9 - $0x7] sm:$0x80] %vm2972_vm13, %v2967_v49 }
0x1640   :  { %v2998_v37 = vpop.permute.xlu1 %2997 }
0x1641   :  { %3003 = vst.msk [vmem:[#allocation11 - $0x7] sm:$0x80] %vm2972_vm13, %v2998_v37 }
0x164c   :  { %v2969_v36 = vpop.permute.xlu0 %2968 }
0x164d   :  { %2975 = vst.msk [vmem:[#allocation9 + $0x1] sm:$0x7f] %vm2974_vm14, %v2969_v36 }
0x164e   :  { %3883 = shalt.err (!%p3880_p5)
}
0x164f   :  { %3024 = dma.vmem_to_hbm [thread:$0]  %s3022_s16, 128, %s5078_s5, [#allocation10]  }
0x1650   :  { %v2950_v13 = vpop.permute.xlu0 %2949  ;;  %s3952_s22 = smov [#allocation11]   ;;  %s3892_s24 = scalar_lea.vmem %s3012_s18, 256 }
0x1651   :  { %s3031_s23 = sshll.u32 %s3952_s22, 4  ;;  %2952 = vst.msk [vmem:[#allocation8 + $0x8] sm:$0xff] %vm1595_vm12, %v2950_v13  ;;  %p3893_p6 = scmp.ne.s32.totalorder %s3012_s18, %s3892_s24  ;;  %s3032_s23 = int_to_ptr.vmem [resolvable:$true] %s3031_s23 }
0x1652   :  { %p3897_p7 = scmp.lt.s32.totalorder %s3012_s18, %s3012_s18  ;;  %p3898_p8 = scmp.lt.s32.totalorder %s3892_s24, %s3892_s24 }
0x1654   :  { %p3899_p9 = por %p3898_p8, %p3897_p7 }
0x1656   :  { %p3900_p10 = pnand %p3899_p9, %p3893_p6 }
0x1658   :  { %3903 = shalt.err (!%p3900_p10)
}
0x1659   :  { %3014 = dma.vmem_to_hbm [thread:$0]  %s3012_s18, 256, %s5077_s4, [#allocation4]   ;;  %v3000_v9 = vpop.permute.xlu0 %2999 }
0x165a   :  { %3004 = vst.msk [vmem:[#allocation11 + $0x1] sm:$0x7f] %vm2974_vm14, %v3000_v9  ;;  %s3912_s5 = scalar_lea.vmem %s3032_s23, 128  ;;  %p3917_p12 = scmp.lt.s32.totalorder %s3032_s23, %s3032_s23 }
0x165b   :  { %p3913_p11 = scmp.ne.s32.totalorder %s3032_s23, %s3912_s5  ;;  %p3918_p13 = scmp.lt.s32.totalorder %s3912_s5, %s3912_s5 }
0x165d   :  { %p3919_p0 = por %p3918_p13, %p3917_p12 }
0x165f   :  { %p3920_p1 = pnand %p3919_p0, %p3913_p11 }
0x1661   :  { %3923 = shalt.err (!%p3920_p1)
}
0x1662   :  { %3034 = dma.vmem_to_hbm [thread:$0]  %s3032_s23, 128, %s5079_s6, [#allocation10]  }
0x1663   :  { %3936 = dma.done.wait [#allocation4], 256  }
0x1664   :  { %3937 = vsyncadd [#allocation4], 4294967040 }
0x1665   :  { %3938 = dma.done.wait [#allocation10], 256  }
0x1666   :  { %3939 = vsyncadd [#allocation10], 4294967040 }
0x1667   :  { %3044 = vsyncpa [#allocation3], 1 }
0x1668   :  { %3045 = vsyncpa [#allocation6], 1 }
0x1669   :  { %3046 = vsyncpa [#allocation4], 1 }
0x166a   :  { %3047 = vsyncpa [#allocation10], 1 }

// kernel: tpu_custom_call.1
= control target key start
LH: loop header
LB: loop body
LE: loop exit
PB: predicated region body
PF: predicated region fallthrough
CT: control target
= control target key end

     0   :  { %12 = vsyncpa [#allocation3], 0  ;;  %s5073_s0 = inlined_call_operand.hbm [shape: f32[8,8,16], index: 0, kind: input, shape index: {}]   ;;  %s5074_s1 = inlined_call_operand.hbm [shape: f32[16,128], index: 1, kind: input, shape index: {}]   ;;  %s5075_s2 = inlined_call_operand.hbm [shape: f32[32,128], index: 2, kind: input, shape index: {}]   ;;  %s5076_s3 = inlined_call_operand.vmem [shape: f32[1,128], index: 3, kind: input, shape index: {}]   ;;  %s5077_s4 = inlined_call_operand.hbm [shape: f32[8,256], index: 4, kind: output, shape index: {0}]   ;;  %s5078_s5 = inlined_call_operand.hbm [shape: f32[8,32], index: 5, kind: output, shape index: {1}]   ;;  %s5079_s6 = inlined_call_operand.hbm [shape: f32[8,32], index: 6, kind: output, shape index: {2}]  }
   0x1   :  { %13 = vsyncpa [#allocation6], 0 }
   0x2   :  { %14 = vsyncpa [#allocation4], 0 }
   0x3   :  { %15 = vsyncpa [#allocation10], 0  ;;  %s3940_s21 = smov [#allocation5]   ;;  %s3941_s23 = smov [#allocation2]  }
   0x4   :  { %s33_s22 = sshll.u32 %s3940_s21, 4  ;;  %s21_s24 = sshll.u32 %s3941_s23, 4  ;;  %s34_s22 = int_to_ptr.vmem [resolvable:$true] %s33_s22  ;;  %s22_s24 = int_to_ptr.vmem [resolvable:$true] %s21_s24 }
   0x5   :  { %s3820_s25 = scalar_lea.vmem %s34_s22, 256  ;;  %p3825_p1 = scmp.lt.s32.totalorder %s34_s22, %s34_s22 }
   0x6   :  { %p3821_p0 = scmp.ne.s32.totalorder %s34_s22, %s3820_s25  ;;  %p3826_p2 = scmp.lt.s32.totalorder %s3820_s25, %s3820_s25 }
   0x8   :  { %p3827_p3 = por %p3826_p2, %p3825_p1 }
   0xa   :  { %p3828_p4 = pnand %p3827_p3, %p3821_p0 }
   0xc   :  { %3831 = shalt.err (!%p3828_p4)
}
   0xd   :  { %s3942_s26 = smov 128   ;;  %s3943_s27 = smov 8  }
   0xe   :  { %39 = dma.hbm_to_vmem [thread:$0]  %s5074_s1, 256, %s34_s22, [#allocation6], %s3942_s26, %s3942_s26, %s3943_s27  }
   0xf   :  { %s3840_s30 = scalar_lea.vmem %s22_s24, 1024  ;;  %p3845_p6 = scmp.lt.s32.totalorder %s22_s24, %s22_s24 }
  0x10   :  { %p3841_p5 = scmp.ne.s32.totalorder %s22_s24, %s3840_s30  ;;  %p3846_p7 = scmp.lt.s32.totalorder %s3840_s30, %s3840_s30 }
  0x12   :  { %p3847_p8 = por %p3846_p7, %p3845_p6 }
  0x14   :  { %p3848_p9 = pnand %p3847_p8, %p3841_p5 }
  0x16   :  { %3851 = shalt.err (!%p3848_p9)
}
  0x17   :  { %27 = dma.hbm_to_vmem [thread:$0]  %s5073_s0, 1024, %s22_s24, [#allocation3], %s3942_s26, %s3942_s26, %s3943_s27  }
  0x18   :  { %s3944_s9 = smov [#allocation7]  }
  0x19   :  { %s45_s10 = sshll.u32 %s3944_s9, 4  ;;  %s46_s10 = int_to_ptr.vmem [resolvable:$true] %s45_s10 }
  0x1a   :  { %s3860_s11 = scalar_lea.vmem %s46_s10, 512  ;;  %p3865_p11 = scmp.lt.s32.totalorder %s46_s10, %s46_s10 }
  0x1b   :  { %p3861_p10 = scmp.ne.s32.totalorder %s46_s10, %s3860_s11  ;;  %p3866_p12 = scmp.lt.s32.totalorder %s3860_s11, %s3860_s11 }
  0x1d   :  { %p3867_p13 = por %p3866_p12, %p3865_p11 }
  0x1f   :  { %p3868_p0 = pnand %p3867_p13, %p3861_p10 }
  0x21   :  { %3871 = shalt.err (!%p3868_p0)
}
  0x22   :  { %51 = dma.hbm_to_vmem [thread:$0]  %s5075_s2, 512, %s46_s10, [#allocation6], %s3942_s26, %s3942_s26, %s3943_s27  }
  0x23   :  { %3932 = dma.done.wait [#allocation3], 1024  }
  0x24   :  { %3933 = vsyncadd [#allocation3], 4294966272 }
  0x25   :  { %3934 = dma.done.wait [#allocation6], 768  }
  0x26   :  { %3935 = vsyncadd [#allocation6], 4294966528  ;;  %vm67_vm0 = vcmask 261120   ;;  %v3945_v0 = vmov 0.0   ;;  %vm3946_vm1 = vmmov 0   ;;  %v79_v1 = vld [vmem:[#allocation5 + $0x8] sm:$0xff] }
  0x27   :  { %3195 = vmatprep.subr.mxu1 %v3945_v0  ;;  %3203 = vmatprep.mubr.msk.f32.mxu1 %vm3946_vm1, %v3945_v0  ;;  %68 = vst.msk [vmem:[#allocation9] sm:$0xff] %vm67_vm0, %v3945_v0  ;;  %69 = vst.msk [vmem:[#allocation11] sm:$0xff] %vm67_vm0, %v3945_v0  ;;  %v4004_v2 = vld [vmem:[#allocation7 + $0x18] sm:$0xff]  ;;  %v78_v3 = vld [vmem:[#allocation5] sm:$0xff]  ;;  %vm87_vm2 = vcmask 130048   ;;  %vm554_vm3 = vcmask 1041409  }
  0x28   :  { %3179 = vmatprep.subr.mxu0 %v79_v1  ;;  %3196 = vmatpush3.msra.mxu1 %v4004_v2  ;;  %v4007_v4 = vld [vmem:[#allocation7 + $0x10] sm:$0xff]  ;;  %v71_v6 = vld [vmem:[#allocation2 + $0x8] sm:$0xff]  ;;  %v4011_v7 = vld [vmem:[#allocation7 + $0x8] sm:$0xff]  ;;  %vm557_vm4 = vcmask 1042434   ;;  %vm560_vm5 = vcmask 1043459   ;;  %vm563_vm6 = vcmask 1044484  }
  0x29   :  { %v70_v5 = vld [vmem:[#allocation2] sm:$0xff]  ;;  %3180 = vmatpush3.msra.mxu0 %v79_v1  ;;  %3197 = vmatprep.subr.mxu1 %v3945_v0  ;;  %v72_v8 = vld [vmem:[#allocation2 + $0x10] sm:$0xff]  ;;  %v73_v11 = vld [vmem:[#allocation2 + $0x18] sm:$0xff]  ;;  %vm566_vm7 = vcmask 1045509   ;;  %vm569_vm8 = vcmask 1046534   ;;  %vm572_vm9 = vcmask 1047559  }
  0x2a   :  { %3181 = vmatprep.subr.mxu0 %v78_v3  ;;  %3198 = vmatpush3.msra.mxu1 %v4007_v4  ;;  %v4016_v9 = vld [vmem:[#allocation7] sm:$0xff]  ;;  %v74_v12 = vld [vmem:[#allocation2 + $0x20] sm:$0xff]  ;;  %v75_v13 = vld [vmem:[#allocation2 + $0x28] sm:$0xff]  ;;  %s3948_s13 = smov 64   ;;  %s3949_s14 = smov 96   ;;  %vm915_vm10 = vcmask 523520  }
  0x2b   :  { %3182 = vmatpush3.msra.mxu0 %v78_v3  ;;  %3183 = vmatprep.mubr.msk.f32.mxu0 %vm87_vm2, %v70_v5  ;;  %v76_v14 = vld [vmem:[#allocation2 + $0x30] sm:$0xff]  ;;  %v77_v15 = vld [vmem:[#allocation2 + $0x38] sm:$0xff]  ;;  %v3048_v17 = vld [vmem:[%s5076_s3] ss:$0 sm:$0xff]  ;;  %s3947_s3 = smov 32   ;;  %vm1254_vm11 = vcmask 785920  }
  0x2c   :  { %3199 = vmatprep.subr.mxu1 %v3945_v0  ;;  %3184 = vmatmul.mubr.msk.f32.vlgmr.msra.gmra.mxu0 %vm87_vm2, %v71_v6  ;;  %vm1595_vm12 = vcmask 1048320   ;;  %vm2972_vm13 = vcmask 261127   ;;  %s3950_s15 = smov [#allocation9]   ;;  %vm2974_vm14 = vcmask 260096   ;;  %s3951_s17 = smov [#allocation8]  }
  0x2d   :  { %3200 = vmatpush3.msra.mxu1 %v4011_v7  ;;  %3186 = vmatprep.mubr.msk.f32.mxu0 %vm87_vm2, %v72_v8  ;;  %s3021_s16 = sshll.u32 %s3950_s15, 4  ;;  %s3011_s18 = sshll.u32 %s3951_s17, 4  ;;  %s3022_s16 = int_to_ptr.vmem [resolvable:$true] %s3021_s16  ;;  %s3012_s18 = int_to_ptr.vmem [resolvable:$true] %s3011_s18 }
  0x2e   :  { %v221_v10 = vld [vmem:[#allocation9] sm:$0xff]  ;;  %3201 = vmatprep.subr.mxu1 %v3945_v0  ;;  %3217 = vmatprep.subr.mxu0 %v3945_v0  ;;  %v222_v56 = vld [vmem:[#allocation11] sm:$0xff]  ;;  %s3872_s19 = scalar_lea.vmem %s3022_s16, 128  ;;  %p3877_p2 = scmp.lt.s32.totalorder %s3022_s16, %s3022_s16 }
  0x2f   :  { %3202 = vmatpush3.msra.mxu1 %v4016_v9  ;;  %3218 = vmatpush3.msra.mxu0 %v4004_v2  ;;  %v379_v59 = vrot.slane %v222_v56, 2  ;;  %v378_v60 = vrot.slane %v222_v56, 1  ;;  %v380_v61 = vrot.slane %v222_v56, 3  ;;  %v381_v62 = vrot.slane %v222_v56, 4  ;;  %p3873_p1 = scmp.ne.s32.totalorder %s3022_s16, %s3872_s19  ;;  %p3878_p3 = scmp.lt.s32.totalorder %s3872_s19, %s3872_s19 }
  0x30   :  { %3204 = vmatmul.mubr.msk.f32.vlgmr.msra.gmra.mxu1 %vm67_vm0, %v221_v10  ;;  %3187 = vmatmul.mubr.msk.f32.gmra.mxu0 %vm87_vm2, %v73_v11  ;;  %v383_v63 = vrot.slane %v222_v56, 6  ;;  %v382_v1 = vrot.slane %v222_v56, 5  ;;  %v384_v3 = vrot.slane %v222_v56, 7 }
  0x31   :  { %3189 = vmatprep.mubr.msk.f32.mxu0 %vm87_vm2, %v74_v12  ;;  %3206 = vmatprep.subr.mxu1 %v3945_v0  ;;  %p3879_p4 = por %p3878_p3, %p3877_p2 }
  0x32   :  { %3207 = vmatpush3.msra.mxu1 %v4004_v2  ;;  %3214 = vmatprep.mubr.msk.f32.mxu1 %vm3946_vm1, %v3945_v0 }
  0x33   :  { %3208 = vmatprep.subr.mxu1 %v3945_v0  ;;  %3219 = vmatprep.subr.mxu0 %v3945_v0  ;;  %p3880_p5 = pnand %p3879_p4, %p3873_p1 }
  0x34   :  { %3190 = vmatmul.mubr.msk.f32.gmra.mxu0 %vm87_vm2, %v75_v13  ;;  %3209 = vmatpush3.msra.mxu1 %v4007_v4 }
  0x35   :  { %3192 = vmatprep.mubr.msk.f32.mxu0 %vm87_vm2, %v76_v14  ;;  %3210 = vmatprep.subr.mxu1 %v3945_v0 }
  0x36   :  { %3211 = vmatpush3.msra.mxu1 %v4011_v7  ;;  %3220 = vmatpush3.msra.mxu0 %v4007_v4 }
  0x37   :  { %3212 = vmatprep.subr.mxu1 %v3945_v0  ;;  %3221 = vmatprep.subr.mxu0 %v3945_v0 }
  0x38   :  { %3193 = vmatmul.mubr.msk.f32.gmra.mxu0 %vm87_vm2, %v77_v15  ;;  %3213 = vmatpush3.msra.mxu1 %v4016_v9 }
  0x39   :  { %3222 = vmatpush3.msra.mxu0 %v4011_v7  ;;  %3225 = vmatprep.mubr.msk.f32.mxu0 %vm3946_vm1, %v3945_v0 }
  0x3a   :  { %3223 = vmatprep.subr.mxu0 %v3945_v0  ;;  %3228 = vmatprep.subr.mxu1 %v3945_v0 }
  0x3b   :  { %3224 = vmatpush3.msra.mxu0 %v4016_v9 }
  0x3c   :  { %3239 = vmatprep.subr.mxu0 %v3945_v0 }
  0xec   :  { %v3185_v16 = vpop.f32.mrf.mxu0 }
  0xed   :  { %v4058_v25 = vadd.f32 %v3185_v16, %v3048_v17 }
  0xee   :  { %v178_v18 = vpop.f32.mrf.mxu0 }
  0xef   :  { %v4053_v19 = vadd.f32 %v3048_v17, %v178_v18 }
  0xf0   :  { %v293_v20 = vpop.f32.mrf.mxu1  ;;  %v3188_v21 = vpop.f32.mrf.mxu0 }
  0xf1   :  { %v4056_v24 = vadd.f32 %v293_v20, %v4053_v19  ;;  %v298_v26 = vrot.slane %v293_v20, 1  ;;  %v300_v27 = vrot.slane %v293_v20, 3  ;;  %v4060_v28 = vadd.f32 %v3188_v21, %v3048_v17 }
  0xf2   :  { %v3205_v22 = vpop.f32.mrf.mxu1  ;;  %v188_v23 = vpop.f32.mrf.mxu0  ;;  %v299_v33 = vrot.slane %v293_v20, 2  ;;  %v302_v37 = vrot.slane %v293_v20, 5  ;;  %v301_v42 = vrot.slane %v293_v20, 4  ;;  %v304_v45 = vrot.slane %v293_v20, 7 }
  0xf3   :  { %3296 = vtanh.f32 %v4056_v24  ;;  %v314_v30 = vadd.f32 %v298_v26, %v4058_v25  ;;  %v4064_v31 = vadd.f32 %v3048_v17, %v188_v23  ;;  %v316_v34 = vadd.f32 %v300_v27, %v4060_v28 }
  0xf4   :  { %v3191_v29 = vpop.f32.mrf.mxu0  ;;  %v303_v46 = vrot.slane %v293_v20, 6  ;;  %v3058_v5 = vmul.f32 -1.442695, %v4056_v24 }
  0xf5   :  { %3298 = vtanh.f32 %v314_v30  ;;  %v4067_v35 = vadd.f32 %v3191_v29, %v3048_v17  ;;  %v315_v38 = vadd.f32 %v299_v33, %v4064_v31  ;;  %v3059_v6 = vmul.f32 -1.442695, %v314_v30 }
  0xf6   :  { %v198_v32 = vpop.f32.mrf.mxu0  ;;  %3300 = vtanh.f32 %v316_v34  ;;  %v3061_v8 = vmul.f32 -1.442695, %v316_v34 }
  0xf7   :  { %v4070_v39 = vadd.f32 %v3048_v17, %v198_v32  ;;  %v318_v43 = vadd.f32 %v302_v37, %v4067_v35  ;;  %3302 = vtanh.f32 %v315_v38  ;;  %v3060_v10 = vmul.f32 -1.442695, %v315_v38 }
  0xf8   :  { %v3194_v36 = vpop.f32.mrf.mxu0 }
  0xf9   :  { %v4072_v41 = vadd.f32 %v3194_v36, %v3048_v17  ;;  %v317_v47 = vadd.f32 %v301_v42, %v4070_v39  ;;  %3304 = vtanh.f32 %v318_v43  ;;  %v3063_v11 = vmul.f32 -1.442695, %v318_v43 }
  0xfa   :  { %v208_v40 = vpop.f32.mrf.mxu0 }
  0xfb   :  { %v4075_v44 = vadd.f32 %v3048_v17, %v208_v40  ;;  %v320_v48 = vadd.f32 %v304_v45, %v4072_v41  ;;  %3306 = vtanh.f32 %v317_v47  ;;  %v3062_v12 = vmul.f32 -1.442695, %v317_v47 }
  0xfd   :  { %v319_v49 = vadd.f32 %v303_v46, %v4075_v44  ;;  %3308 = vtanh.f32 %v320_v48  ;;  %v3065_v15 = vmul.f32 -1.442695, %v320_v48 }
  0xff   :  { %3310 = vtanh.f32 %v319_v49  ;;  %v3064_v14 = vmul.f32 -1.442695, %v319_v49 }
 0x100   :  { %v3297_v50 = vpop.eup %3296  ;;  %3312 = vpow2.f32 %v3058_v5 }
 0x101   :  { %425 = vrot.lane.b32.xlu1 %v3297_v50, %s3947_s3  ;;  %3314 = vpow2.f32 %v3059_v6 }
 0x102   :  { %v3299_v51 = vpop.eup %3298  ;;  %3316 = vpow2.f32 %v3061_v8 }
 0x103   :  { %427 = vrot.lane.b32.xlu0 %v3299_v51, %s3947_s3  ;;  %v3301_v52 = vpop.eup %3300  ;;  %3318 = vpow2.f32 %v3060_v10 }
 0x104   :  { %v3303_v53 = vpop.eup %3302  ;;  %3320 = vpow2.f32 %v3063_v11 }
 0x105   :  { %431 = vrot.lane.b32.xlu1 %v3301_v52, %s3947_s3  ;;  %3322 = vpow2.f32 %v3062_v12 }
 0x106   :  { %v3305_v54 = vpop.eup %3304  ;;  %3324 = vpow2.f32 %v3064_v14 }
 0x107   :  { %429 = vrot.lane.b32.xlu0 %v3303_v53, %s3947_s3  ;;  %3326 = vpow2.f32 %v3065_v15 }
 0x108   :  { %v3307_v55 = vpop.eup %3306 }
 0x109   :  { %435 = vrot.lane.b32.xlu1 %v3305_v54, %s3947_s3 }
 0x10a   :  { %v3309_v57 = vpop.eup %3308 }
 0x10b   :  { %433 = vrot.lane.b32.xlu0 %v3307_v55, %s3947_s3 }
 0x10c   :  { %v3311_v58 = vpop.eup %3310 }
 0x10d   :  { %439 = vrot.lane.b32.xlu1 %v3309_v57, %s3947_s3  ;;  %v3313_v13 = vpop.eup %3312 }
 0x10e   :  { %v345_v16 = vadd.f32 1.0, %v3313_v13  ;;  %v3315_v17 = vpop.eup %3314 }
 0x10f   :  { %437 = vrot.lane.b32.xlu0 %v3311_v58, %s3947_s3  ;;  %v346_v18 = vadd.f32 1.0, %v3315_v17  ;;  %v3317_v20 = vpop.eup %3316 }
 0x110   :  { %3328 = vrcp.f32 %v345_v16  ;;  %v3319_v21 = vpop.eup %3318  ;;  %v348_v22 = vadd.f32 1.0, %v3317_v20 }
 0x111   :  { %389 = vrot.lane.b32.xlu1 %v379_v59, %s3947_s3  ;;  %3330 = vrcp.f32 %v346_v18  ;;  %v3321_v23 = vpop.eup %3320  ;;  %v347_v24 = vadd.f32 1.0, %v3319_v21 }
 0x112   :  { %3332 = vrcp.f32 %v348_v22  ;;  %v350_v26 = vadd.f32 1.0, %v3321_v23  ;;  %v3323_v27 = vpop.eup %3322 }
 0x113   :  { %387 = vrot.lane.b32.xlu0 %v378_v60, %s3947_s3  ;;  %3334 = vrcp.f32 %v347_v24  ;;  %v3325_v29 = vpop.eup %3324  ;;  %v349_v32 = vadd.f32 1.0, %v3323_v27 }
 0x114   :  { %v3327_v30 = vpop.eup %3326  ;;  %3336 = vrcp.f32 %v350_v26  ;;  %v351_v37 = vadd.f32 1.0, %v3325_v29 }
 0x115   :  { %391 = vrot.lane.b32.xlu1 %v380_v61, %s3947_s3  ;;  %3338 = vrcp.f32 %v349_v32  ;;  %v352_v40 = vadd.f32 1.0, %v3327_v30 }
 0x116   :  { %3340 = vrcp.f32 %v351_v37 }
 0x117   :  { %385 = vrot.lane.b32.xlu0 %v222_v56, %s3947_s3  ;;  %3342 = vrcp.f32 %v352_v40 }
 0x119   :  { %393 = vrot.lane.b32.xlu1 %v381_v62, %s3947_s3 }
 0x11b   :  { %397 = vrot.lane.b32.xlu0 %v383_v63, %s3947_s3 }
 0x11d   :  { %395 = vrot.lane.b32.xlu1 %v382_v1, %s3947_s3  ;;  %v4097_v33 = vpop.eup %3328 }
 0x11e   :  { %v4101_v42 = vpop.eup %3330 }
 0x11f   :  { %399 = vrot.lane.b32.xlu0 %v384_v3, %s3947_s3  ;;  %v4105_v45 = vpop.eup %3332 }
 0x120   :  { %v4108_v48 = vpop.eup %3334 }
 0x121   :  { %v4112_v51 = vpop.eup %3336 }
 0x122   :  { %v4117_v55 = vpop.eup %3338 }
 0x123   :  { %v4120_v57 = vpop.eup %3340 }
 0x124   :  { %v4124_v61 = vpop.eup %3342 }
 0x173   :  { %v426_v34 = vpop.permute.xlu1 %425 }
 0x174   :  { %v449_v36 = vmul.f32 %v4097_v33, %v426_v34 }
 0x175   :  { %v428_v38 = vpop.permute.xlu0 %427 }
 0x176   :  { %465 = vrot.lane.b32.xlu0 %v449_v36, %s3947_s3  ;;  %v450_v43 = vmul.f32 %v4101_v42, %v428_v38 }
 0x177   :  { %v432_v46 = vpop.permute.xlu1 %431 }
 0x178   :  { %v452_v47 = vmul.f32 %v4105_v45, %v432_v46 }
 0x179   :  { %v430_v49 = vpop.permute.xlu0 %429 }
 0x17a   :  { %467 = vrot.lane.b32.xlu0 %v450_v43, %s3947_s3  ;;  %v451_v50 = vmul.f32 %v4108_v48, %v430_v49  ;;  %471 = vrot.lane.b32.xlu1 %v452_v47, %s3947_s3 }
 0x17b   :  { %v436_v52 = vpop.permute.xlu1 %435 }
 0x17c   :  { %v454_v53 = vmul.f32 %v4112_v51, %v436_v52 }
 0x17d   :  { %v434_v54 = vpop.permute.xlu0 %433 }
 0x17e   :  { %469 = vrot.lane.b32.xlu0 %v451_v50, %s3947_s3  ;;  %475 = vrot.lane.b32.xlu1 %v454_v53, %s3947_s3  ;;  %v453_v56 = vmul.f32 %v4117_v55, %v434_v54 }
 0x17f   :  { %v440_v58 = vpop.permute.xlu1 %439 }
 0x180   :  { %v456_v62 = vmul.f32 %v4124_v61, %v440_v58 }
 0x181   :  { %v438_v59 = vpop.permute.xlu0 %437 }
 0x182   :  { %v455_v60 = vmul.f32 %v4120_v57, %v438_v59  ;;  %473 = vrot.lane.b32.xlu1 %v453_v56, %s3947_s3 }
 0x183   :  { %v390_v3 = vpop.permute.xlu1 %389 }
 0x184   :  { %477 = vrot.lane.b32.xlu0 %v455_v60, %s3947_s3  ;;  %v411_v21 = vmul.f32 %v4108_v48, %v390_v3 }
 0x185   :  { %v388_v63 = vpop.permute.xlu0 %387 }
 0x186   :  { %479 = vrot.lane.b32.xlu1 %v456_v62, %s3947_s3  ;;  %v410_v14 = vmul.f32 %v4101_v42, %v388_v63 }
 0x187   :  { %v392_v6 = vpop.permute.xlu1 %391 }
 0x188   :  { %v412_v18 = vmul.f32 %v4105_v45, %v392_v6 }
 0x189   :  { %v386_v1 = vpop.permute.xlu0 %385 }
 0x18a   :  { %v409_v11 = vmul.f32 %v4097_v33, %v386_v1 }
 0x18b   :  { %v394_v10 = vpop.permute.xlu1 %393 }
 0x18c   :  { %v413_v30 = vmul.f32 %v4117_v55, %v394_v10 }
 0x18d   :  { %v398_v5 = vpop.permute.xlu0 %397 }
 0x18e   :  { %v415_v36 = vmul.f32 %v4120_v57, %v398_v5 }
 0x18f   :  { %v396_v15 = vpop.permute.xlu1 %395 }
 0x190   :  { %v414_v26 = vmul.f32 %v4112_v51, %v396_v15 }
 0x191   :  { %v400_v8 = vpop.permute.xlu0 %399 }
 0x192   :  { %v416_v40 = vmul.f32 %v4124_v61, %v400_v8 }
 0x1e8   :  { %v466_v12 = vpop.permute.xlu0 %465 }
 0x1e9   :  { %v4130_v13 = vadd.f32 %v466_v12, %v409_v11 }
 0x1eb   :  { %3344 = vtanh.f32 %v4130_v13 }
 0x1ec   :  { %v468_v16 = vpop.permute.xlu0 %467  ;;  %v472_v20 = vpop.permute.xlu1 %471 }
 0x1ed   :  { %v4134_v17 = vadd.f32 %v468_v16, %v410_v14  ;;  %v4139_v22 = vadd.f32 %v472_v20, %v412_v18 }
 0x1ef   :  { %3346 = vtanh.f32 %v4134_v17 }
 0x1f0   :  { %v470_v23 = vpop.permute.xlu0 %469  ;;  %3348 = vtanh.f32 %v4139_v22  ;;  %v476_v27 = vpop.permute.xlu1 %475 }
 0x1f1   :  { %v4142_v24 = vadd.f32 %v470_v23, %v411_v21  ;;  %v4146_v29 = vadd.f32 %v476_v27, %v414_v26 }
 0x1f3   :  { %3350 = vtanh.f32 %v4142_v24 }
 0x1f4   :  { %v474_v34 = vpop.permute.xlu1 %473  ;;  %3352 = vtanh.f32 %v4146_v29 }
 0x1f5   :  { %v4150_v37 = vadd.f32 %v474_v34, %v413_v30 }
 0x1f6   :  { %v478_v38 = vpop.permute.xlu0 %477 }
 0x1f7   :  { %3354 = vtanh.f32 %v4150_v37  ;;  %v4156_v43 = vadd.f32 %v478_v38, %v415_v36 }
 0x1f8   :  { %v3345_v32 = vpop.eup %3344  ;;  %v480_v47 = vpop.permute.xlu1 %479 }
 0x1f9   :  { %513 = vrot.lane.b32.xlu0 %v3345_v32, %s3947_s3  ;;  %v4158_v49 = vadd.f32 %v480_v47, %v416_v40  ;;  %3356 = vtanh.f32 %v4156_v43 }
 0x1fb   :  { %3358 = vtanh.f32 %v4158_v49 }
 0x1fc   :  { %v3347_v46 = vpop.eup %3346 }
 0x1fd   :  { %515 = vrot.lane.b32.xlu0 %v3347_v46, %s3947_s3  ;;  %v3349_v50 = vpop.eup %3348 }
 0x1fe   :  { %519 = vrot.lane.b32.xlu1 %v3349_v50, %s3947_s3 }
 0x200   :  { %v3351_v52 = vpop.eup %3350 }
 0x201   :  { %v3353_v53 = vpop.eup %3352 }
 0x202   :  { %517 = vrot.lane.b32.xlu1 %v3351_v52, %s3947_s3 }
 0x204   :  { %v3355_v54 = vpop.eup %3354 }
 0x205   :  { %521 = vrot.lane.b32.xlu0 %v3355_v54, %s3947_s3 }
 0x206   :  { %523 = vrot.lane.b32.xlu1 %v3353_v53, %s3947_s3  ;;  %v3357_v56 = vpop.eup %3356 }
 0x208   :  { %v3359_v58 = vpop.eup %3358 }
 0x209   :  { %525 = vrot.lane.b32.xlu0 %v3357_v56, %s3947_s3 }
 0x20a   :  { %527 = vrot.lane.b32.xlu1 %v3359_v58, %s3947_s3 }
 0x26b   :  { %v514_v59 = vpop.permute.xlu0 %513 }
 0x26c   :  { %v537_v6 = vmul.f32 %v4097_v33, %v514_v59 }
 0x26f   :  { %v516_v60 = vpop.permute.xlu0 %515 }
 0x270   :  { %v520_v62 = vpop.permute.xlu1 %519  ;;  %v538_v63 = vmul.f32 %v4101_v42, %v516_v60 }
 0x271   :  { %v540_v8 = vmul.f32 %v4105_v45, %v520_v62 }
 0x272   :  { %v553_v1 = vrot.slane %v538_v63, 7 }
 0x273   :  { %v559_v18 = vrot.slane %v540_v8, 5 }
 0x274   :  { %v518_v3 = vpop.permute.xlu1 %517  ;;  %v555_v11 = vsel %vm554_vm3, %v553_v1, %v537_v6 }
 0x275   :  { %v539_v5 = vmul.f32 %v4108_v48, %v518_v3 }
 0x277   :  { %v556_v10 = vrot.slane %v539_v5, 6  ;;  %v522_v14 = vpop.permute.xlu0 %521 }
 0x278   :  { %v524_v12 = vpop.permute.xlu1 %523  ;;  %v541_v42 = vmul.f32 %v4117_v55, %v522_v14 }
 0x279   :  { %v558_v15 = vsel %vm557_vm4, %v556_v10, %v555_v11  ;;  %v542_v16 = vmul.f32 %v4112_v51, %v524_v12 }
 0x27a   :  { %v562_v48 = vrot.slane %v541_v42, 4  ;;  %v561_v33 = vsel %vm560_vm5, %v559_v18, %v558_v15 }
 0x27b   :  { %v565_v20 = vrot.slane %v542_v16, 3  ;;  %v526_v21 = vpop.permute.xlu0 %525 }
 0x27c   :  { %v528_v45 = vpop.permute.xlu1 %527  ;;  %v564_v23 = vsel %vm563_vm6, %v562_v48, %v561_v33  ;;  %v543_v27 = vmul.f32 %v4120_v57, %v526_v21 }
 0x27d   :  { %v544_v26 = vmul.f32 %v4124_v61, %v528_v45  ;;  %v567_v55 = vsel %vm566_vm7, %v565_v20, %v564_v23 }
 0x27e   :  { %v568_v30 = vrot.slane %v543_v27, 2 }
 0x27f   :  { %v571_v51 = vrot.slane %v544_v26, 1 }
 0x280   :  { %v570_v32 = vsel %vm569_vm8, %v568_v30, %v567_v55 }
 0x281   :  { %v573_v34 = vsel %vm572_vm9, %v571_v51, %v570_v32 }
 0x282   :  { %574 = vrot.lane.b32.xlu0 %v573_v34, %s3948_s13 }
 0x2f4   :  { %v575_v36 = vpop.permute.xlu0 %574 }
 0x2f5   :  { %577 = vst.msk [vmem:[#allocation8] sm:$0xff] %vm67_vm0, %v575_v36  ;;  %3215 = vmatmul.mubr.msk.f32.vlgmr.msra.gmra.mxu1 %vm67_vm0, %v575_v36 }
 0x2f6   :  { %3229 = vmatpush3.msra.mxu1 %v4004_v2  ;;  %3236 = vmatprep.mubr.msk.f32.mxu1 %vm3946_vm1, %v3945_v0 }
 0x2f7   :  { %3230 = vmatprep.subr.mxu1 %v3945_v0 }
 0x2f8   :  { %3231 = vmatpush3.msra.mxu1 %v4007_v4 }
 0x2f9   :  { %3232 = vmatprep.subr.mxu1 %v3945_v0 }
 0x2fa   :  { %3233 = vmatpush3.msra.mxu1 %v4011_v7 }
 0x2fb   :  { %3234 = vmatprep.subr.mxu1 %v3945_v0 }
 0x2fc   :  { %3235 = vmatpush3.msra.mxu1 %v4016_v9 }
 0x2fd   :  { %3250 = vmatprep.subr.mxu1 %v3945_v0 }
 0x3b5   :  { %v646_v57 = vpop.f32.mrf.mxu1 }
 0x3b6   :  { %v652_v38 = vrot.slane %v646_v57, 1  ;;  %v651_v40 = vrot.slane %v646_v57, 7  ;;  %v667_v46 = vadd.f32 %v646_v57, %v4058_v25  ;;  %v653_v47 = vrot.slane %v646_v57, 2 }
 0x3b7   :  { %v3216_v61 = vpop.f32.mrf.mxu1  ;;  %v654_v52 = vrot.slane %v646_v57, 3  ;;  %v655_v54 = vrot.slane %v646_v57, 4  ;;  %v656_v58 = vrot.slane %v646_v57, 5  ;;  %v657_v60 = vrot.slane %v646_v57, 6 }
 0x3b8   :  { %v668_v50 = vadd.f32 %v652_v38, %v4064_v31  ;;  %v666_v53 = vadd.f32 %v651_v40, %v4053_v19  ;;  %3360 = vtanh.f32 %v667_v46  ;;  %v669_v56 = vadd.f32 %v653_v47, %v4060_v28 }
 0x3b9   :  { %v670_v59 = vadd.f32 %v654_v52, %v4070_v39  ;;  %v671_v62 = vadd.f32 %v655_v54, %v4067_v35  ;;  %v672_v63 = vadd.f32 %v656_v58, %v4075_v44  ;;  %v673_v1 = vadd.f32 %v657_v60, %v4072_v41 }
 0x3ba   :  { %3362 = vtanh.f32 %v668_v50  ;;  %v3068_v15 = vmul.f32 -1.442695, %v667_v46  ;;  %v3069_v16 = vmul.f32 -1.442695, %v668_v50  ;;  %v3067_v42 = vmul.f32 -1.442695, %v666_v53 }
 0x3bb   :  { %3364 = vtanh.f32 %v666_v53  ;;  %v3070_v18 = vmul.f32 -1.442695, %v669_v56  ;;  %v3071_v48 = vmul.f32 -1.442695, %v670_v59  ;;  %v3072_v20 = vmul.f32 -1.442695, %v671_v62 }
 0x3bc   :  { %3366 = vtanh.f32 %v669_v56  ;;  %v3073_v33 = vmul.f32 -1.442695, %v672_v63  ;;  %v3074_v45 = vmul.f32 -1.442695, %v673_v1 }
 0x3bd   :  { %3368 = vtanh.f32 %v670_v59 }
 0x3be   :  { %3370 = vtanh.f32 %v671_v62 }
 0x3bf   :  { %3372 = vtanh.f32 %v672_v63 }
 0x3c0   :  { %3374 = vtanh.f32 %v673_v1 }
 0x3c1   :  { %3376 = vpow2.f32 %v3068_v15 }
 0x3c2   :  { %3378 = vpow2.f32 %v3069_v16 }
 0x3c3   :  { %3380 = vpow2.f32 %v3067_v42 }
 0x3c4   :  { %3382 = vpow2.f32 %v3070_v18 }
 0x3c5   :  { %v3361_v3 = vpop.eup %3360  ;;  %3384 = vpow2.f32 %v3071_v48 }
 0x3c6   :  { %772 = vrot.lane.b32.xlu1 %v3361_v3, %s3947_s3  ;;  %3386 = vpow2.f32 %v3072_v20  ;;  %v739_v20 = vrot.slane %v4134_v17, 7 }
 0x3c7   :  { %v3363_v5 = vpop.eup %3362  ;;  %3388 = vpow2.f32 %v3073_v33  ;;  %v740_v33 = vrot.slane %v4142_v24, 7 }
 0x3c8   :  { %774 = vrot.lane.b32.xlu0 %v3363_v5, %s3947_s3  ;;  %v3365_v6 = vpop.eup %3364  ;;  %3390 = vpow2.f32 %v3074_v45 }
 0x3c9   :  { %v3367_v8 = vpop.eup %3366 }
 0x3ca   :  { %770 = vrot.lane.b32.xlu1 %v3365_v6, %s3947_s3  ;;  %v3369_v10 = vpop.eup %3368 }
 0x3cb   :  { %v3371_v11 = vpop.eup %3370 }
 0x3cc   :  { %776 = vrot.lane.b32.xlu0 %v3367_v8, %s3947_s3  ;;  %v3373_v12 = vpop.eup %3372 }
 0x3cd   :  { %v3375_v14 = vpop.eup %3374 }
 0x3ce   :  { %778 = vrot.lane.b32.xlu1 %v3369_v10, %s3947_s3  ;;  %v3377_v21 = vpop.eup %3376 }
 0x3cf   :  { %v3379_v23 = vpop.eup %3378  ;;  %v699_v26 = vadd.f32 1.0, %v3377_v21 }
 0x3d0   :  { %780 = vrot.lane.b32.xlu0 %v3371_v11, %s3947_s3  ;;  %v3381_v27 = vpop.eup %3380  ;;  %v700_v51 = vadd.f32 1.0, %v3379_v23 }
 0x3d1   :  { %v3383_v30 = vpop.eup %3382  ;;  %v698_v55 = vadd.f32 1.0, %v3381_v27  ;;  %3392 = vrcp.f32 %v699_v26  ;;  %v738_v26 = vrot.slane %v4130_v13, 7 }
 0x3d2   :  { %782 = vrot.lane.b32.xlu1 %v3373_v12, %s3947_s3  ;;  %v3385_v32 = vpop.eup %3384  ;;  %v701_v34 = vadd.f32 1.0, %v3383_v30  ;;  %3394 = vrcp.f32 %v700_v51  ;;  %v741_v30 = vrot.slane %v4139_v22, 7 }
 0x3d3   :  { %v3387_v36 = vpop.eup %3386  ;;  %v702_v57 = vadd.f32 1.0, %v3385_v32  ;;  %3396 = vrcp.f32 %v698_v55 }
 0x3d4   :  { %784 = vrot.lane.b32.xlu0 %v3375_v14, %s3947_s3  ;;  %v3389_v61 = vpop.eup %3388  ;;  %v703_v38 = vadd.f32 1.0, %v3387_v36  ;;  %3398 = vrcp.f32 %v701_v34  ;;  %v742_v34 = vrot.slane %v4150_v37, 7 }
 0x3d5   :  { %v3391_v40 = vpop.eup %3390  ;;  %v704_v46 = vadd.f32 1.0, %v3389_v61  ;;  %3400 = vrcp.f32 %v702_v57  ;;  %v743_v57 = vrot.slane %v4146_v29, 7 }
 0x3d6   :  { %v705_v47 = vadd.f32 1.0, %v3391_v40  ;;  %3402 = vrcp.f32 %v703_v38 }
 0x3d7   :  { %3404 = vrcp.f32 %v704_v46  ;;  %v744_v46 = vrot.slane %v4156_v43, 7 }
 0x3d8   :  { %3406 = vrcp.f32 %v705_v47 }
 0x3de   :  { %v4213_v50 = vpop.eup %3392 }
 0x3df   :  { %v4215_v53 = vpop.eup %3394  ;;  %v755_v45 = vmul.f32 %v4213_v50, %v739_v20 }
 0x3e0   :  { %v4220_v59 = vpop.eup %3396  ;;  %v756_v23 = vmul.f32 %v4215_v53, %v740_v33 }
 0x3e1   :  { %v4223_v62 = vpop.eup %3398  ;;  %v754_v17 = vmul.f32 %v4220_v59, %v738_v26 }
 0x3e2   :  { %v4228_v5 = vpop.eup %3400  ;;  %v757_v32 = vmul.f32 %v4223_v62, %v741_v30 }
 0x3e3   :  { %v4231_v8 = vpop.eup %3402  ;;  %v758_v22 = vmul.f32 %v4228_v5, %v742_v34 }
 0x3e4   :  { %v4236_v14 = vpop.eup %3404  ;;  %v759_v40 = vmul.f32 %v4231_v8, %v743_v57 }
 0x3e5   :  { %v4239_v16 = vpop.eup %3406  ;;  %v760_v29 = vmul.f32 %v4236_v14, %v744_v46 }
 0x438   :  { %v773_v52 = vpop.permute.xlu1 %772 }
 0x439   :  { %v795_v54 = vmul.f32 %v4213_v50, %v773_v52  ;;  %v745_v52 = vrot.slane %v4158_v49, 7 }
 0x43a   :  { %v775_v56 = vpop.permute.xlu0 %774 }
 0x43b   :  { %v796_v58 = vmul.f32 %v4215_v53, %v775_v56  ;;  %812 = vrot.lane.b32.xlu1 %v795_v54, %s3947_s3 }
 0x43c   :  { %v771_v60 = vpop.permute.xlu1 %770 }
 0x43d   :  { %814 = vrot.lane.b32.xlu0 %v796_v58, %s3947_s3  ;;  %v794_v63 = vmul.f32 %v4220_v59, %v771_v60  ;;  %v761_v58 = vmul.f32 %v4239_v16, %v745_v52 }
 0x43e   :  { %v777_v1 = vpop.permute.xlu0 %776 }
 0x43f   :  { %v797_v3 = vmul.f32 %v4223_v62, %v777_v1  ;;  %810 = vrot.lane.b32.xlu1 %v794_v63, %s3947_s3 }
 0x440   :  { %v779_v6 = vpop.permute.xlu1 %778 }
 0x441   :  { %816 = vrot.lane.b32.xlu0 %v797_v3, %s3947_s3  ;;  %v798_v10 = vmul.f32 %v4228_v5, %v779_v6 }
 0x442   :  { %v781_v11 = vpop.permute.xlu0 %780 }
 0x443   :  { %v799_v12 = vmul.f32 %v4231_v8, %v781_v11  ;;  %818 = vrot.lane.b32.xlu1 %v798_v10, %s3947_s3 }
 0x444   :  { %v783_v15 = vpop.permute.xlu1 %782 }
 0x445   :  { %820 = vrot.lane.b32.xlu0 %v799_v12, %s3947_s3  ;;  %v800_v42 = vmul.f32 %v4236_v14, %v783_v15 }
 0x446   :  { %v785_v18 = vpop.permute.xlu0 %784 }
 0x447   :  { %v801_v48 = vmul.f32 %v4239_v16, %v785_v18  ;;  %822 = vrot.lane.b32.xlu1 %v800_v42, %s3947_s3 }
 0x449   :  { %824 = vrot.lane.b32.xlu0 %v801_v48, %s3947_s3 }
 0x4ad   :  { %v813_v21 = vpop.permute.xlu1 %812 }
 0x4ae   :  { %v4250_v27 = vadd.f32 %v813_v21, %v755_v45 }
 0x4af   :  { %v815_v51 = vpop.permute.xlu0 %814 }
 0x4b0   :  { %v4253_v55 = vadd.f32 %v815_v51, %v756_v23  ;;  %3408 = vtanh.f32 %v4250_v27 }
 0x4b1   :  { %v811_v24 = vpop.permute.xlu1 %810 }
 0x4b2   :  { %3410 = vtanh.f32 %v4253_v55  ;;  %v4260_v36 = vadd.f32 %v811_v24, %v754_v17 }
 0x4b3   :  { %v817_v13 = vpop.permute.xlu0 %816 }
 0x4b4   :  { %v4263_v61 = vadd.f32 %v817_v13, %v757_v32  ;;  %3412 = vtanh.f32 %v4260_v36 }
 0x4b5   :  { %v819_v38 = vpop.permute.xlu1 %818 }
 0x4b6   :  { %3414 = vtanh.f32 %v4263_v61  ;;  %v4270_v47 = vadd.f32 %v819_v38, %v758_v22 }
 0x4b7   :  { %v821_v37 = vpop.permute.xlu0 %820 }
 0x4b8   :  { %v4273_v54 = vadd.f32 %v821_v37, %v759_v40  ;;  %3416 = vtanh.f32 %v4270_v47 }
 0x4b9   :  { %v823_v56 = vpop.permute.xlu1 %822 }
 0x4ba   :  { %3418 = vtanh.f32 %v4273_v54  ;;  %v4279_v60 = vadd.f32 %v823_v56, %v760_v29 }
 0x4bb   :  { %v825_v63 = vpop.permute.xlu0 %824 }
 0x4bc   :  { %v4281_v43 = vadd.f32 %v825_v63, %v761_v58  ;;  %3420 = vtanh.f32 %v4279_v60 }
 0x4bd   :  { %v3409_v1 = vpop.eup %3408 }
 0x4be   :  { %3422 = vtanh.f32 %v4281_v43  ;;  %860 = vrot.lane.b32.xlu1 %v3409_v1, %s3947_s3 }
 0x4bf   :  { %v3411_v49 = vpop.eup %3410 }
 0x4c0   :  { %862 = vrot.lane.b32.xlu0 %v3411_v49, %s3947_s3 }
 0x4c1   :  { %v3413_v3 = vpop.eup %3412 }
 0x4c2   :  { %858 = vrot.lane.b32.xlu1 %v3413_v3, %s3947_s3 }
 0x4c3   :  { %v3415_v6 = vpop.eup %3414 }
 0x4c4   :  { %864 = vrot.lane.b32.xlu0 %v3415_v6, %s3947_s3 }
 0x4c5   :  { %v3417_v10 = vpop.eup %3416 }
 0x4c6   :  { %866 = vrot.lane.b32.xlu1 %v3417_v10, %s3947_s3 }
 0x4c7   :  { %v3419_v11 = vpop.eup %3418 }
 0x4c8   :  { %868 = vrot.lane.b32.xlu0 %v3419_v11, %s3947_s3 }
 0x4c9   :  { %v3421_v12 = vpop.eup %3420 }
 0x4ca   :  { %870 = vrot.lane.b32.xlu1 %v3421_v12, %s3947_s3 }
 0x4cb   :  { %v3423_v15 = vpop.eup %3422 }
 0x4cc   :  { %872 = vrot.lane.b32.xlu0 %v3423_v15, %s3947_s3 }
 0x530   :  { %v861_v42 = vpop.permute.xlu1 %860 }
 0x531   :  { %v883_v23 = vmul.f32 %v4213_v50, %v861_v42 }
 0x532   :  { %v863_v18 = vpop.permute.xlu0 %862 }
 0x533   :  { %v884_v48 = vmul.f32 %v4215_v53, %v863_v18 }
 0x534   :  { %v859_v20 = vpop.permute.xlu1 %858 }
 0x535   :  { %v882_v33 = vmul.f32 %v4220_v59, %v859_v20  ;;  %v900_v51 = vrot.slane %v884_v48, 7 }
 0x536   :  { %v865_v45 = vpop.permute.xlu0 %864 }
 0x537   :  { %v885_v21 = vmul.f32 %v4223_v62, %v865_v45  ;;  %v898_v26 = vrot.slane %v882_v33, 1 }
 0x538   :  { %v867_v17 = vpop.permute.xlu1 %866 }
 0x539   :  { %v902_v30 = vrot.slane %v885_v21, 6  ;;  %v899_v24 = vsel %vm554_vm3, %v883_v23, %v898_v26  ;;  %v886_v32 = vmul.f32 %v4228_v5, %v867_v17 }
 0x53a   :  { %v869_v34 = vpop.permute.xlu0 %868  ;;  %v901_v13 = vsel %vm557_vm4, %v900_v51, %v899_v24 }
 0x53b   :  { %v887_v53 = vmul.f32 %v4231_v8, %v869_v34  ;;  %v903_v59 = vsel %vm560_vm5, %v902_v30, %v901_v13  ;;  %v904_v57 = vrot.slane %v886_v32, 5 }
 0x53c   :  { %v871_v62 = vpop.permute.xlu1 %870 }
 0x53d   :  { %v906_v22 = vrot.slane %v887_v53, 4  ;;  %v905_v50 = vsel %vm563_vm6, %v904_v57, %v903_v59  ;;  %v888_v38 = vmul.f32 %v4236_v14, %v871_v62 }
 0x53e   :  { %v873_v40 = vpop.permute.xlu0 %872 }
 0x53f   :  { %v889_v46 = vmul.f32 %v4239_v16, %v873_v40  ;;  %v907_v37 = vsel %vm566_vm7, %v906_v22, %v905_v50  ;;  %v908_v5 = vrot.slane %v888_v38, 3 }
 0x541   :  { %v910_v52 = vrot.slane %v889_v46, 2  ;;  %v909_v29 = vsel %vm569_vm8, %v908_v5, %v907_v37 }
 0x543   :  { %v4308_v8 = vsel %vm572_vm9, %v910_v52, %v909_v29 }
 0x544   :  { %917 = vrot.lane.b32.xlu1 %v4308_v8, %s3948_s13 }
 0x5b6   :  { %v918_v56 = vpop.permute.xlu1 %917 }
 0x5b7   :  { %3226 = vmatmul.mubr.msk.f32.vlgmr.msra.gmra.mxu0 %vm67_vm0, %v918_v56 }
 0x5b8   :  { %3240 = vmatpush3.msra.mxu0 %v4004_v2  ;;  %3247 = vmatprep.mubr.msk.f32.mxu0 %vm3946_vm1, %v3945_v0 }
 0x5b9   :  { %3241 = vmatprep.subr.mxu0 %v3945_v0 }
 0x5ba   :  { %3242 = vmatpush3.msra.mxu0 %v4007_v4 }
 0x5bb   :  { %3243 = vmatprep.subr.mxu0 %v3945_v0 }
 0x5bc   :  { %3244 = vmatpush3.msra.mxu0 %v4011_v7 }
 0x5bd   :  { %3245 = vmatprep.subr.mxu0 %v3945_v0 }
 0x5be   :  { %3246 = vmatpush3.msra.mxu0 %v4016_v9 }
 0x5bf   :  { %3261 = vmatprep.subr.mxu0 %v3945_v0 }
 0x677   :  { %v987_v14 = vpop.f32.mrf.mxu0 }
 0x678   :  { %v992_v16 = vrot.slane %v987_v14, 6  ;;  %v994_v63 = vrot.slane %v987_v14, 1  ;;  %v993_v1 = vrot.slane %v987_v14, 7  ;;  %v1009_v4 = vadd.f32 %v987_v14, %v4064_v31 }
 0x679   :  { %v3227_v2 = vpop.f32.mrf.mxu0  ;;  %v995_v49 = vrot.slane %v987_v14, 2  ;;  %v996_v7 = vrot.slane %v987_v14, 3  ;;  %v997_v9 = vrot.slane %v987_v14, 4  ;;  %v998_v12 = vrot.slane %v987_v14, 5 }
 0x67a   :  { %v1007_v58 = vadd.f32 %v992_v16, %v4053_v19  ;;  %v1010_v3 = vadd.f32 %v994_v63, %v4060_v28  ;;  %v1008_v6 = vadd.f32 %v993_v1, %v4058_v25  ;;  %v3078_v30 = vmul.f32 -1.442695, %v1009_v4 }
 0x67b   :  { %v1011_v10 = vadd.f32 %v995_v49, %v4070_v39  ;;  %v1012_v15 = vadd.f32 %v996_v7, %v4067_v35  ;;  %v1013_v42 = vadd.f32 %v997_v9, %v4075_v44  ;;  %v1014_v18 = vadd.f32 %v998_v12, %v4072_v41 }
 0x67c   :  { %3424 = vtanh.f32 %v1007_v58  ;;  %v3076_v51 = vmul.f32 -1.442695, %v1007_v58  ;;  %v3079_v17 = vmul.f32 -1.442695, %v1010_v3  ;;  %v3077_v24 = vmul.f32 -1.442695, %v1008_v6 }
 0x67d   :  { %3426 = vtanh.f32 %v1009_v4  ;;  %v3080_v32 = vmul.f32 -1.442695, %v1011_v10  ;;  %v3081_v13 = vmul.f32 -1.442695, %v1012_v15  ;;  %v3082_v53 = vmul.f32 -1.442695, %v1013_v42 }
 0x67e   :  { %3428 = vtanh.f32 %v1010_v3  ;;  %v3083_v57 = vmul.f32 -1.442695, %v1014_v18 }
 0x67f   :  { %3430 = vtanh.f32 %v1008_v6 }
 0x680   :  { %3432 = vtanh.f32 %v1011_v10 }
 0x681   :  { %3434 = vtanh.f32 %v1012_v15 }
 0x682   :  { %3436 = vtanh.f32 %v1013_v42 }
 0x683   :  { %3438 = vtanh.f32 %v1014_v18 }
 0x684   :  { %3440 = vpow2.f32 %v3076_v51 }
 0x685   :  { %3442 = vpow2.f32 %v3078_v30 }
 0x686   :  { %3444 = vpow2.f32 %v3079_v17  ;;  %v1079_v17 = vrot.slane %v4260_v36, 7 }
 0x687   :  { %3446 = vpow2.f32 %v3077_v24 }
 0x688   :  { %3448 = vpow2.f32 %v3080_v32 }
 0x689   :  { %v3425_v11 = vpop.eup %3424  ;;  %3450 = vpow2.f32 %v3081_v13  ;;  %v1081_v13 = vrot.slane %v4253_v55, 7 }
 0x68a   :  { %1111 = vrot.lane.b32.xlu0 %v3425_v11, %s3947_s3  ;;  %v3427_v48 = vpop.eup %3426  ;;  %3452 = vpow2.f32 %v3082_v53  ;;  %v1082_v53 = vrot.slane %v4263_v61, 7 }
 0x68b   :  { %v3429_v20 = vpop.eup %3428  ;;  %1115 = vrot.lane.b32.xlu1 %v3427_v48, %s3947_s3 }
 0x68c   :  { %v3431_v33 = vpop.eup %3430 }
 0x68d   :  { %v3433_v45 = vpop.eup %3432 }
 0x68e   :  { %1117 = vrot.lane.b32.xlu0 %v3429_v20, %s3947_s3  ;;  %v3435_v21 = vpop.eup %3434 }
 0x68f   :  { %1113 = vrot.lane.b32.xlu1 %v3431_v33, %s3947_s3  ;;  %v3437_v23 = vpop.eup %3436 }
 0x690   :  { %v3439_v26 = vpop.eup %3438 }
 0x691   :  { %v3441_v34 = vpop.eup %3440 }
 0x692   :  { %1119 = vrot.lane.b32.xlu0 %v3433_v45, %s3947_s3  ;;  %v1039_v59 = vadd.f32 1.0, %v3441_v34  ;;  %v3443_v22 = vpop.eup %3442 }
 0x693   :  { %1121 = vrot.lane.b32.xlu1 %v3435_v21, %s3947_s3  ;;  %v3445_v62 = vpop.eup %3444  ;;  %v1041_v50 = vadd.f32 1.0, %v3443_v22 }
 0x694   :  { %3454 = vrcp.f32 %v1039_v59  ;;  %v3447_v38 = vpop.eup %3446  ;;  %v1042_v40 = vadd.f32 1.0, %v3445_v62  ;;  %v1080_v62 = vrot.slane %v4250_v27, 7 }
 0x695   :  { %3456 = vpow2.f32 %v3083_v57  ;;  %v3449_v46 = vpop.eup %3448  ;;  %v1040_v37 = vadd.f32 1.0, %v3447_v38  ;;  %v1083_v38 = vrot.slane %v4270_v47, 7 }
 0x696   :  { %1123 = vrot.lane.b32.xlu0 %v3437_v23, %s3947_s3  ;;  %3458 = vrcp.f32 %v1041_v50  ;;  %v3451_v5 = vpop.eup %3450  ;;  %v1043_v52 = vadd.f32 1.0, %v3449_v46 }
 0x697   :  { %1125 = vrot.lane.b32.xlu1 %v3439_v26, %s3947_s3  ;;  %3460 = vrcp.f32 %v1042_v40  ;;  %v3453_v29 = vpop.eup %3452  ;;  %v1044_v16 = vadd.f32 1.0, %v3451_v5 }
 0x698   :  { %3462 = vrcp.f32 %v1040_v37  ;;  %v1045_v63 = vadd.f32 1.0, %v3453_v29  ;;  %v1084_v37 = vrot.slane %v4273_v54, 7  ;;  %v1085_v29 = vrot.slane %v4279_v60, 7 }
 0x699   :  { %3464 = vrcp.f32 %v1043_v52  ;;  %v1086_v54 = vrot.slane %v4281_v43, 7 }
 0x69a   :  { %3466 = vrcp.f32 %v1044_v16 }
 0x69b   :  { %3468 = vrcp.f32 %v1045_v63 }
 0x6a1   :  { %v4339_v56 = vpop.eup %3454 }
 0x6a2   :  { %v3457_v58 = vpop.eup %3456  ;;  %v1095_v24 = vmul.f32 %v4339_v56, %v1079_v17 }
 0x6a3   :  { %v1046_v1 = vadd.f32 1.0, %v3457_v58  ;;  %v4343_v4 = vpop.eup %3458 }
 0x6a4   :  { %v4345_v3 = vpop.eup %3460  ;;  %v1097_v59 = vmul.f32 %v4343_v4, %v1081_v13 }
 0x6a5   :  { %3470 = vrcp.f32 %v1046_v1  ;;  %v4350_v10 = vpop.eup %3462  ;;  %v1098_v22 = vmul.f32 %v4345_v3, %v1082_v53 }
 0x6a6   :  { %v4353_v12 = vpop.eup %3464  ;;  %v1096_v55 = vmul.f32 %v4350_v10, %v1080_v62 }
 0x6a7   :  { %v4358_v48 = vpop.eup %3466  ;;  %v1099_v61 = vmul.f32 %v4353_v12, %v1083_v38 }
 0x6a8   :  { %v4361_v33 = vpop.eup %3468 }
 0x6b2   :  { %v4366_v26 = vpop.eup %3470 }
 0x6b3   :  { %v1102_v60 = vmul.f32 %v4366_v26, %v1086_v54 }
 0x6fc   :  { %v1112_v14 = vpop.permute.xlu0 %1111 }
 0x6fd   :  { %v1135_v2 = vmul.f32 %v4339_v56, %v1112_v14  ;;  %v1116_v49 = vpop.permute.xlu1 %1115  ;;  %v1100_v14 = vmul.f32 %v4358_v48, %v1084_v37 }
 0x6fe   :  { %v1137_v7 = vmul.f32 %v4343_v4, %v1116_v49 }
 0x6ff   :  { %1151 = vrot.lane.b32.xlu0 %v1135_v2, %s3947_s3  ;;  %v1101_v2 = vmul.f32 %v4361_v33, %v1085_v29 }
 0x700   :  { %v1118_v6 = vpop.permute.xlu0 %1117  ;;  %1155 = vrot.lane.b32.xlu1 %v1137_v7, %s3947_s3 }
 0x701   :  { %v1138_v9 = vmul.f32 %v4345_v3, %v1118_v6  ;;  %v1114_v11 = vpop.permute.xlu1 %1113 }
 0x702   :  { %v1136_v15 = vmul.f32 %v4350_v10, %v1114_v11 }
 0x703   :  { %1157 = vrot.lane.b32.xlu0 %v1138_v9, %s3947_s3 }
 0x704   :  { %v1120_v42 = vpop.permute.xlu0 %1119  ;;  %1153 = vrot.lane.b32.xlu1 %v1136_v15, %s3947_s3 }
 0x705   :  { %v1139_v18 = vmul.f32 %v4353_v12, %v1120_v42  ;;  %v1122_v20 = vpop.permute.xlu1 %1121 }
 0x706   :  { %v1140_v45 = vmul.f32 %v4358_v48, %v1122_v20 }
 0x707   :  { %1159 = vrot.lane.b32.xlu0 %v1139_v18, %s3947_s3 }
 0x708   :  { %v1124_v21 = vpop.permute.xlu0 %1123  ;;  %1161 = vrot.lane.b32.xlu1 %v1140_v45, %s3947_s3 }
 0x709   :  { %v1141_v23 = vmul.f32 %v4361_v33, %v1124_v21  ;;  %v1126_v51 = vpop.permute.xlu1 %1125 }
 0x70a   :  { %v1142_v30 = vmul.f32 %v4366_v26, %v1126_v51 }
 0x70b   :  { %1163 = vrot.lane.b32.xlu0 %v1141_v23, %s3947_s3 }
 0x70c   :  { %1165 = vrot.lane.b32.xlu1 %v1142_v30, %s3947_s3 }
 0x771   :  { %v1152_v32 = vpop.permute.xlu0 %1151 }
 0x772   :  { %v4373_v34 = vadd.f32 %v1152_v32, %v1095_v24  ;;  %v1156_v57 = vpop.permute.xlu1 %1155 }
 0x773   :  { %v4381_v50 = vadd.f32 %v1156_v57, %v1097_v59 }
 0x774   :  { %3472 = vtanh.f32 %v4373_v34 }
 0x775   :  { %v1158_v36 = vpop.permute.xlu0 %1157  ;;  %3474 = vtanh.f32 %v4381_v50 }
 0x776   :  { %v4384_v40 = vadd.f32 %v1158_v36, %v1098_v22  ;;  %v1154_v46 = vpop.permute.xlu1 %1153 }
 0x777   :  { %v4391_v5 = vadd.f32 %v1154_v46, %v1096_v55 }
 0x778   :  { %3476 = vtanh.f32 %v4384_v40 }
 0x779   :  { %v1160_v27 = vpop.permute.xlu0 %1159  ;;  %3478 = vtanh.f32 %v4391_v5 }
 0x77a   :  { %v4394_v47 = vadd.f32 %v1160_v27, %v1099_v61  ;;  %v1162_v16 = vpop.permute.xlu1 %1161 }
 0x77b   :  { %v4402_v58 = vadd.f32 %v1162_v16, %v1100_v14  ;;  %v4439_v14 = vld [vmem:[#allocation7 + $0x18] sm:$0xff]  ;;  %v4449_v16 = vld [vmem:[#allocation7 + $0x8] sm:$0xff] }
 0x77c   :  { %3480 = vtanh.f32 %v4394_v47 }
 0x77d   :  { %v1164_v63 = vpop.permute.xlu0 %1163  ;;  %3482 = vtanh.f32 %v4402_v58 }
 0x77e   :  { %v4404_v1 = vadd.f32 %v1164_v63, %v1101_v2  ;;  %v1166_v49 = vpop.permute.xlu1 %1165  ;;  %v4453_v2 = vld [vmem:[#allocation7] sm:$0xff] }
 0x77f   :  { %v4409_v7 = vadd.f32 %v1166_v49, %v1102_v60 }
 0x780   :  { %3484 = vtanh.f32 %v4404_v1 }
 0x781   :  { %v3473_v52 = vpop.eup %3472  ;;  %3486 = vtanh.f32 %v4409_v7 }
 0x782   :  { %1199 = vrot.lane.b32.xlu0 %v3473_v52, %s3947_s3  ;;  %v3475_v6 = vpop.eup %3474 }
 0x783   :  { %1203 = vrot.lane.b32.xlu1 %v3475_v6, %s3947_s3 }
 0x785   :  { %v3477_v9 = vpop.eup %3476 }
 0x786   :  { %1205 = vrot.lane.b32.xlu0 %v3477_v9, %s3947_s3  ;;  %v3479_v43 = vpop.eup %3478 }
 0x787   :  { %1201 = vrot.lane.b32.xlu1 %v3479_v43, %s3947_s3 }
 0x789   :  { %v3481_v11 = vpop.eup %3480 }
 0x78a   :  { %1207 = vrot.lane.b32.xlu0 %v3481_v11, %s3947_s3  ;;  %v3483_v15 = vpop.eup %3482 }
 0x78b   :  { %1209 = vrot.lane.b32.xlu1 %v3483_v15, %s3947_s3 }
 0x78d   :  { %v3485_v42 = vpop.eup %3484 }
 0x78e   :  { %1211 = vrot.lane.b32.xlu0 %v3485_v42, %s3947_s3  ;;  %v3487_v18 = vpop.eup %3486 }
 0x78f   :  { %1213 = vrot.lane.b32.xlu1 %v3487_v18, %s3947_s3 }
 0x7f4   :  { %v1200_v20 = vpop.permute.xlu0 %1199 }
 0x7f5   :  { %v1204_v45 = vpop.permute.xlu1 %1203  ;;  %v1223_v23 = vmul.f32 %v4339_v56, %v1200_v20 }
 0x7f6   :  { %v1225_v57 = vmul.f32 %v4343_v4, %v1204_v45 }
 0x7f7   :  { %v1239_v13 = vrot.slane %v1223_v23, 2 }
 0x7f8   :  { %v1206_v21 = vpop.permute.xlu0 %1205 }
 0x7f9   :  { %v1226_v51 = vmul.f32 %v4345_v3, %v1206_v21  ;;  %v1202_v30 = vpop.permute.xlu1 %1201 }
 0x7fa   :  { %v1224_v17 = vmul.f32 %v4350_v10, %v1202_v30 }
 0x7fb   :  { %v1243_v59 = vrot.slane %v1226_v51, 7 }
 0x7fc   :  { %v1208_v24 = vpop.permute.xlu0 %1207  ;;  %v1240_v53 = vrot.slane %v1224_v17, 1 }
 0x7fd   :  { %v1227_v32 = vmul.f32 %v4353_v12, %v1208_v24  ;;  %v1210_v22 = vpop.permute.xlu1 %1209 }
 0x7fe   :  { %v1241_v36 = vsel %vm554_vm3, %v1240_v53, %v1239_v13  ;;  %v1228_v38 = vmul.f32 %v4358_v48, %v1210_v22 }
 0x7ff   :  { %v1245_v62 = vrot.slane %v1227_v32, 6  ;;  %v1242_v3 = vsel %vm557_vm4, %v1225_v57, %v1241_v36 }
 0x800   :  { %v1212_v56 = vpop.permute.xlu0 %1211  ;;  %v1244_v10 = vsel %vm560_vm5, %v1243_v59, %v1242_v3  ;;  %v1247_v46 = vrot.slane %v1228_v38, 5 }
 0x801   :  { %v1229_v55 = vmul.f32 %v4361_v33, %v1212_v56  ;;  %v1246_v12 = vsel %vm563_vm6, %v1245_v62, %v1244_v10  ;;  %v1214_v61 = vpop.permute.xlu1 %1213 }
 0x802   :  { %v1230_v4 = vmul.f32 %v4366_v26, %v1214_v61  ;;  %v1248_v27 = vsel %vm566_vm7, %v1247_v46, %v1246_v12  ;;  %v4445_v26 = vld [vmem:[#allocation7 + $0x10] sm:$0xff] }
 0x803   :  { %v1249_v37 = vrot.slane %v1229_v55, 4 }
 0x804   :  { %v1251_v29 = vrot.slane %v1230_v4, 3 }
 0x805   :  { %v1250_v52 = vsel %vm569_vm8, %v1249_v37, %v1248_v27 }
 0x806   :  { %v4434_v48 = vsel %vm572_vm9, %v1251_v29, %v1250_v52 }
 0x807   :  { %1256 = vrot.lane.b32.xlu0 %v4434_v48, %s3948_s13 }
 0x879   :  { %v1257_v33 = vpop.permute.xlu0 %1256 }
 0x87a   :  { %3237 = vmatmul.mubr.msk.f32.vlgmr.msra.gmra.mxu1 %vm67_vm0, %v1257_v33 }
 0x87b   :  { %3251 = vmatpush3.msra.mxu1 %v4439_v14  ;;  %3258 = vmatprep.mubr.msk.f32.mxu1 %vm3946_vm1, %v3945_v0 }
 0x87c   :  { %3252 = vmatprep.subr.mxu1 %v3945_v0 }
 0x87d   :  { %3253 = vmatpush3.msra.mxu1 %v4445_v26 }
 0x87e   :  { %3254 = vmatprep.subr.mxu1 %v3945_v0 }
 0x87f   :  { %3255 = vmatpush3.msra.mxu1 %v4449_v16 }
 0x880   :  { %3256 = vmatprep.subr.mxu1 %v3945_v0 }
 0x881   :  { %3257 = vmatpush3.msra.mxu1 %v4453_v2 }
 0x882   :  { %3272 = vmatprep.subr.mxu1 %v3945_v0 }
 0x93a   :  { %v1326_v54 = vpop.f32.mrf.mxu1 }
 0x93b   :  { %v1332_v60 = vrot.slane %v1326_v54, 6  ;;  %v1334_v49 = vrot.slane %v1326_v54, 1  ;;  %v1331_v9 = vrot.slane %v1326_v54, 5  ;;  %v1349_v43 = vadd.f32 %v1326_v54, %v4060_v28 }
 0x93c   :  { %v3238_v63 = vpop.f32.mrf.mxu1  ;;  %v1335_v11 = vrot.slane %v1326_v54, 2  ;;  %v1333_v42 = vrot.slane %v1326_v54, 7  ;;  %v1337_v20 = vrot.slane %v1326_v54, 4  ;;  %v1336_v21 = vrot.slane %v1326_v54, 3 }
 0x93d   :  { %v1347_v6 = vadd.f32 %v1332_v60, %v4058_v25  ;;  %v1350_v15 = vadd.f32 %v1334_v49, %v4070_v39  ;;  %v1346_v18 = vadd.f32 %v1331_v9, %v4053_v19  ;;  %v3088_v36 = vmul.f32 -1.442695, %v1349_v43 }
 0x93e   :  { %v1351_v45 = vadd.f32 %v1335_v11, %v4067_v35  ;;  %v1348_v23 = vadd.f32 %v1333_v42, %v4064_v31  ;;  %v1353_v51 = vadd.f32 %v1337_v20, %v4072_v41  ;;  %v1352_v30 = vadd.f32 %v1336_v21, %v4075_v44 }
 0x93f   :  { %3488 = vtanh.f32 %v1347_v6  ;;  %v3086_v62 = vmul.f32 -1.442695, %v1347_v6  ;;  %v3089_v38 = vmul.f32 -1.442695, %v1350_v15  ;;  %v3085_v56 = vmul.f32 -1.442695, %v1346_v18 }
 0x940   :  { %3490 = vtanh.f32 %v1349_v43  ;;  %v3090_v3 = vmul.f32 -1.442695, %v1351_v45  ;;  %v3087_v55 = vmul.f32 -1.442695, %v1348_v23  ;;  %v3092_v10 = vmul.f32 -1.442695, %v1353_v51 }
 0x941   :  { %3492 = vtanh.f32 %v1350_v15  ;;  %v3091_v46 = vmul.f32 -1.442695, %v1352_v30 }
 0x942   :  { %3494 = vtanh.f32 %v1346_v18 }
 0x943   :  { %3496 = vtanh.f32 %v1351_v45 }
 0x944   :  { %3498 = vtanh.f32 %v1348_v23 }
 0x945   :  { %3500 = vtanh.f32 %v1353_v51 }
 0x946   :  { %3502 = vtanh.f32 %v1352_v30 }
 0x947   :  { %3504 = vpow2.f32 %v3086_v62 }
 0x948   :  { %3506 = vpow2.f32 %v3088_v36 }
 0x949   :  { %3508 = vpow2.f32 %v3089_v38 }
 0x94a   :  { %3510 = vpow2.f32 %v3085_v56 }
 0x94b   :  { %3512 = vpow2.f32 %v3090_v3 }
 0x94c   :  { %v3489_v17 = vpop.eup %3488  ;;  %3514 = vpow2.f32 %v3087_v55 }
 0x94d   :  { %1452 = vrot.lane.b32.xlu0 %v3489_v17, %s3947_s3  ;;  %v3491_v24 = vpop.eup %3490  ;;  %3516 = vpow2.f32 %v3092_v10 }
 0x94e   :  { %1456 = vrot.lane.b32.xlu1 %v3491_v24, %s3947_s3  ;;  %v3493_v32 = vpop.eup %3492  ;;  %3518 = vpow2.f32 %v3091_v46  ;;  %v1419_v46 = vrot.slane %v4391_v5, 7 }
 0x94f   :  { %v3495_v13 = vpop.eup %3494 }
 0x950   :  { %v3497_v53 = vpop.eup %3496 }
 0x951   :  { %1458 = vrot.lane.b32.xlu0 %v3493_v32, %s3947_s3  ;;  %v3499_v59 = vpop.eup %3498 }
 0x952   :  { %1450 = vrot.lane.b32.xlu1 %v3495_v13, %s3947_s3  ;;  %v3501_v57 = vpop.eup %3500 }
 0x953   :  { %v3503_v22 = vpop.eup %3502 }
 0x954   :  { %v3505_v12 = vpop.eup %3504 }
 0x955   :  { %1460 = vrot.lane.b32.xlu0 %v3497_v53, %s3947_s3  ;;  %v3507_v61 = vpop.eup %3506  ;;  %v1379_v37 = vadd.f32 1.0, %v3505_v12  ;;  %v1421_v12 = vrot.slane %v4384_v40, 7  ;;  %v1423_v40 = vrot.slane %v4402_v58, 7 }
 0x956   :  { %1454 = vrot.lane.b32.xlu1 %v3499_v59, %s3947_s3  ;;  %v3509_v4 = vpop.eup %3508  ;;  %v1381_v27 = vadd.f32 1.0, %v3507_v61 }
 0x957   :  { %v3511_v52 = vpop.eup %3510  ;;  %v1382_v29 = vadd.f32 1.0, %v3509_v4  ;;  %3520 = vrcp.f32 %v1379_v37  ;;  %v1422_v4 = vrot.slane %v4394_v47, 7 }
 0x958   :  { %v3513_v33 = vpop.eup %3512  ;;  %v1378_v54 = vadd.f32 1.0, %v3511_v52  ;;  %3522 = vrcp.f32 %v1381_v27 }
 0x959   :  { %1464 = vrot.lane.b32.xlu0 %v3501_v57, %s3947_s3  ;;  %v3515_v63 = vpop.eup %3514  ;;  %v1383_v60 = vadd.f32 1.0, %v3513_v33  ;;  %3524 = vrcp.f32 %v1382_v29  ;;  %v1418_v33 = vrot.slane %v4373_v34, 7 }
 0x95a   :  { %1462 = vrot.lane.b32.xlu1 %v3503_v22, %s3947_s3  ;;  %v3517_v49 = vpop.eup %3516  ;;  %v1380_v6 = vadd.f32 1.0, %v3515_v63  ;;  %3526 = vrcp.f32 %v1378_v54 }
 0x95b   :  { %v3519_v9 = vpop.eup %3518  ;;  %v1385_v43 = vadd.f32 1.0, %v3517_v49  ;;  %3528 = vrcp.f32 %v1383_v60 }
 0x95c   :  { %v1384_v11 = vadd.f32 1.0, %v3519_v9  ;;  %3530 = vrcp.f32 %v1380_v6  ;;  %v1420_v6 = vrot.slane %v4381_v50, 7 }
 0x95d   :  { %3532 = vrcp.f32 %v1385_v43 }
 0x95e   :  { %3534 = vrcp.f32 %v1384_v11  ;;  %v1425_v11 = vrot.slane %v4409_v7, 7 }
 0x964   :  { %v4473_v15 = vpop.eup %3520 }
 0x965   :  { %v4476_v20 = vpop.eup %3522  ;;  %v1435_v61 = vmul.f32 %v4473_v15, %v1419_v46 }
 0x966   :  { %v4480_v23 = vpop.eup %3524  ;;  %v1437_v27 = vmul.f32 %v4476_v20, %v1421_v12 }
 0x967   :  { %v4484_v17 = vpop.eup %3526  ;;  %v1438_v5 = vmul.f32 %v4480_v23, %v1422_v4 }
 0x968   :  { %v4488_v13 = vpop.eup %3528  ;;  %v1434_v47 = vmul.f32 %v4484_v17, %v1418_v33 }
 0x969   :  { %v4492_v57 = vpop.eup %3530  ;;  %v1439_v34 = vmul.f32 %v4488_v13, %v1423_v40 }
 0x96a   :  { %v4496_v36 = vpop.eup %3532  ;;  %v1436_v58 = vmul.f32 %v4492_v57, %v1420_v6 }
 0x96b   :  { %v4500_v3 = vpop.eup %3534  ;;  %v1441_v50 = vmul.f32 %v4496_v36, %v1425_v11 }
 0x9bf   :  { %v1453_v42 = vpop.permute.xlu0 %1452 }
 0x9c0   :  { %v1475_v18 = vmul.f32 %v4473_v15, %v1453_v42  ;;  %v1457_v45 = vpop.permute.xlu1 %1456 }
 0x9c1   :  { %v1477_v21 = vmul.f32 %v4476_v20, %v1457_v45  ;;  %v1424_v45 = vrot.slane %v4404_v1, 7 }
 0x9c2   :  { %1492 = vrot.lane.b32.xlu0 %v1475_v18, %s3947_s3 }
 0x9c3   :  { %v1459_v51 = vpop.permute.xlu0 %1458  ;;  %1496 = vrot.lane.b32.xlu1 %v1477_v21, %s3947_s3  ;;  %v1440_v7 = vmul.f32 %v4500_v3, %v1424_v45 }
 0x9c4   :  { %v1478_v30 = vmul.f32 %v4480_v23, %v1459_v51  ;;  %v1451_v24 = vpop.permute.xlu1 %1450 }
 0x9c5   :  { %v1474_v32 = vmul.f32 %v4484_v17, %v1451_v24 }
 0x9c6   :  { %1498 = vrot.lane.b32.xlu0 %v1478_v30, %s3947_s3 }
 0x9c7   :  { %v1461_v53 = vpop.permute.xlu0 %1460  ;;  %1490 = vrot.lane.b32.xlu1 %v1474_v32, %s3947_s3 }
 0x9c8   :  { %v1479_v59 = vmul.f32 %v4488_v13, %v1461_v53  ;;  %v1455_v22 = vpop.permute.xlu1 %1454 }
 0x9c9   :  { %v1476_v62 = vmul.f32 %v4492_v57, %v1455_v22 }
 0x9ca   :  { %1500 = vrot.lane.b32.xlu0 %v1479_v59, %s3947_s3 }
 0x9cb   :  { %v1465_v38 = vpop.permute.xlu0 %1464  ;;  %1494 = vrot.lane.b32.xlu1 %v1476_v62, %s3947_s3 }
 0x9cc   :  { %v1481_v56 = vmul.f32 %v4496_v36, %v1465_v38  ;;  %v1463_v55 = vpop.permute.xlu1 %1462 }
 0x9cd   :  { %v1480_v10 = vmul.f32 %v4500_v3, %v1463_v55 }
 0x9ce   :  { %1504 = vrot.lane.b32.xlu0 %v1481_v56, %s3947_s3 }
 0x9cf   :  { %1502 = vrot.lane.b32.xlu1 %v1480_v10, %s3947_s3 }
 0xa34   :  { %v1493_v37 = vpop.permute.xlu0 %1492 }
 0xa35   :  { %v4510_v52 = vadd.f32 %v1493_v37, %v1435_v61  ;;  %v1497_v29 = vpop.permute.xlu1 %1496 }
 0xa36   :  { %v4513_v54 = vadd.f32 %v1497_v29, %v1437_v27 }
 0xa37   :  { %3536 = vtanh.f32 %v4510_v52 }
 0xa38   :  { %v1499_v63 = vpop.permute.xlu0 %1498  ;;  %3538 = vtanh.f32 %v4513_v54 }
 0xa39   :  { %v4520_v60 = vadd.f32 %v1499_v63, %v1438_v5  ;;  %v1491_v49 = vpop.permute.xlu1 %1490 }
 0xa3a   :  { %v4523_v9 = vadd.f32 %v1491_v49, %v1434_v47 }
 0xa3b   :  { %3540 = vtanh.f32 %v4520_v60 }
 0xa3c   :  { %v1501_v43 = vpop.permute.xlu0 %1500  ;;  %3542 = vtanh.f32 %v4523_v9 }
 0xa3d   :  { %v4530_v42 = vadd.f32 %v1501_v43, %v1439_v34  ;;  %v1495_v18 = vpop.permute.xlu1 %1494 }
 0xa3e   :  { %v4533_v21 = vadd.f32 %v1495_v18, %v1436_v58 }
 0xa3f   :  { %3544 = vtanh.f32 %v4530_v42 }
 0xa40   :  { %v1505_v51 = vpop.permute.xlu0 %1504  ;;  %3546 = vtanh.f32 %v4533_v21 }
 0xa41   :  { %v4539_v30 = vadd.f32 %v1505_v51, %v1441_v50  ;;  %v1503_v24 = vpop.permute.xlu1 %1502 }
 0xa42   :  { %v4541_v32 = vadd.f32 %v1503_v24, %v1440_v7 }
 0xa43   :  { %3548 = vtanh.f32 %v4539_v30 }
 0xa44   :  { %v3537_v53 = vpop.eup %3536  ;;  %3550 = vtanh.f32 %v4541_v32 }
 0xa45   :  { %1540 = vrot.lane.b32.xlu0 %v3537_v53, %s3947_s3  ;;  %v3539_v1 = vpop.eup %3538 }
 0xa46   :  { %1544 = vrot.lane.b32.xlu1 %v3539_v1, %s3947_s3 }
 0xa48   :  { %v3541_v59 = vpop.eup %3540 }
 0xa49   :  { %1546 = vrot.lane.b32.xlu0 %v3541_v59, %s3947_s3  ;;  %v3543_v22 = vpop.eup %3542 }
 0xa4a   :  { %1538 = vrot.lane.b32.xlu1 %v3543_v22, %s3947_s3 }
 0xa4c   :  { %v3545_v62 = vpop.eup %3544 }
 0xa4d   :  { %1548 = vrot.lane.b32.xlu0 %v3545_v62, %s3947_s3  ;;  %v3547_v38 = vpop.eup %3546 }
 0xa4e   :  { %1542 = vrot.lane.b32.xlu1 %v3547_v38, %s3947_s3 }
 0xa50   :  { %v3549_v56 = vpop.eup %3548 }
 0xa51   :  { %1552 = vrot.lane.b32.xlu0 %v3549_v56, %s3947_s3  ;;  %v3551_v55 = vpop.eup %3550 }
 0xa52   :  { %1550 = vrot.lane.b32.xlu1 %v3551_v55, %s3947_s3 }
 0xab7   :  { %v1541_v10 = vpop.permute.xlu0 %1540 }
 0xab8   :  { %v1545_v46 = vpop.permute.xlu1 %1544  ;;  %v1563_v4 = vmul.f32 %v4473_v15, %v1541_v10 }
 0xab9   :  { %v1565_v43 = vmul.f32 %v4476_v20, %v1545_v46 }
 0xaba   :  { %v1579_v47 = vrot.slane %v1563_v4, 2 }
 0xabb   :  { %v1547_v12 = vpop.permute.xlu0 %1546 }
 0xabc   :  { %v1539_v61 = vpop.permute.xlu1 %1538  ;;  %v1566_v63 = vmul.f32 %v4480_v23, %v1547_v12 }
 0xabd   :  { %v1562_v37 = vmul.f32 %v4484_v17, %v1539_v61 }
 0xabe   :  { %v1584_v58 = vrot.slane %v1566_v63, 7 }
 0xabf   :  { %v1549_v27 = vpop.permute.xlu0 %1548  ;;  %v1578_v29 = vrot.slane %v1562_v37, 3 }
 0xac0   :  { %v1543_v33 = vpop.permute.xlu1 %1542  ;;  %v1567_v5 = vmul.f32 %v4488_v13, %v1549_v27 }
 0xac1   :  { %v1564_v40 = vmul.f32 %v4492_v57, %v1543_v33  ;;  %v1580_v17 = vsel %vm554_vm3, %v1579_v47, %v1578_v29 }
 0xac2   :  { %v1586_v11 = vrot.slane %v1567_v5, 6 }
 0xac3   :  { %v1553_v49 = vpop.permute.xlu0 %1552  ;;  %v1581_v6 = vrot.slane %v1564_v40, 1 }
 0xac4   :  { %v1569_v34 = vmul.f32 %v4496_v36, %v1553_v49  ;;  %v1551_v15 = vpop.permute.xlu1 %1550 }
 0xac5   :  { %v1582_v18 = vsel %vm557_vm4, %v1581_v6, %v1580_v17  ;;  %v1568_v13 = vmul.f32 %v4500_v3, %v1551_v15 }
 0xac6   :  { %v1583_v23 = vsel %vm560_vm5, %v1565_v43, %v1582_v18  ;;  %v1590_v45 = vrot.slane %v1569_v34, 4 }
 0xac7   :  { %v1585_v57 = vsel %vm563_vm6, %v1584_v58, %v1583_v23  ;;  %v1588_v50 = vrot.slane %v1568_v13, 5 }
 0xac8   :  { %v1587_v51 = vsel %vm566_vm7, %v1586_v11, %v1585_v57 }
 0xac9   :  { %v1589_v36 = vsel %vm569_vm8, %v1588_v50, %v1587_v51 }
 0xaca   :  { %v4568_v20 = vsel %vm572_vm9, %v1590_v45, %v1589_v36 }
 0xacb   :  { %1597 = vrot.lane.b32.xlu1 %v4568_v20, %s3948_s13 }
 0xb3d   :  { %v1598_v7 = vpop.permute.xlu1 %1597 }
 0xb3e   :  { %3248 = vmatmul.mubr.msk.f32.vlgmr.msra.gmra.mxu0 %vm67_vm0, %v1598_v7 }
 0xb3f   :  { %3262 = vmatpush3.msra.mxu0 %v4439_v14  ;;  %3269 = vmatprep.mubr.msk.f32.mxu0 %vm3946_vm1, %v3945_v0 }
 0xb40   :  { %3263 = vmatprep.subr.mxu0 %v3945_v0 }
 0xb41   :  { %3264 = vmatpush3.msra.mxu0 %v4445_v26 }
 0xb42   :  { %3265 = vmatprep.subr.mxu0 %v3945_v0 }
 0xb43   :  { %3266 = vmatpush3.msra.mxu0 %v4449_v16 }
 0xb44   :  { %3267 = vmatprep.subr.mxu0 %v3945_v0 }
 0xb45   :  { %3268 = vmatpush3.msra.mxu0 %v4453_v2 }
 0xbfe   :  { %v1667_v3 = vpop.f32.mrf.mxu0 }
 0xbff   :  { %v1672_v24 = vrot.slane %v1667_v3, 4  ;;  %v1674_v59 = vrot.slane %v1667_v3, 6  ;;  %v1676_v22 = vrot.slane %v1667_v3, 1  ;;  %v1673_v38 = vrot.slane %v1667_v3, 5 }
 0xc00   :  { %v3249_v53 = vpop.f32.mrf.mxu0  ;;  %v1691_v56 = vadd.f32 %v1667_v3, %v4070_v39  ;;  %v1677_v55 = vrot.slane %v1667_v3, 2  ;;  %v1675_v46 = vrot.slane %v1667_v3, 7  ;;  %v1678_v4 = vrot.slane %v1667_v3, 3 }
 0xc01   :  { %v1687_v1 = vadd.f32 %v1672_v24, %v4053_v19  ;;  %v1689_v62 = vadd.f32 %v1674_v59, %v4064_v31  ;;  %v1692_v10 = vadd.f32 %v1676_v22, %v4067_v35  ;;  %v1688_v12 = vadd.f32 %v1673_v38, %v4058_v25 }
 0xc02   :  { %v1693_v37 = vadd.f32 %v1677_v55, %v4075_v44  ;;  %v1690_v27 = vadd.f32 %v1675_v46, %v4060_v28  ;;  %v1694_v29 = vadd.f32 %v1678_v4, %v4072_v41  ;;  %v3098_v17 = vmul.f32 -1.442695, %v1691_v56 }
 0xc03   :  { %3552 = vtanh.f32 %v1687_v1  ;;  %v3094_v34 = vmul.f32 -1.442695, %v1687_v1  ;;  %v3096_v43 = vmul.f32 -1.442695, %v1689_v62  ;;  %v3099_v11 = vmul.f32 -1.442695, %v1692_v10 }
 0xc04   :  { %3554 = vtanh.f32 %v1689_v62  ;;  %v3095_v15 = vmul.f32 -1.442695, %v1688_v12  ;;  %v3100_v18 = vmul.f32 -1.442695, %v1693_v37  ;;  %v3097_v13 = vmul.f32 -1.442695, %v1690_v27 }
 0xc05   :  { %3556 = vtanh.f32 %v1691_v56  ;;  %v3101_v45 = vmul.f32 -1.442695, %v1694_v29 }
 0xc06   :  { %3558 = vtanh.f32 %v1692_v10 }
 0xc07   :  { %3560 = vtanh.f32 %v1688_v12 }
 0xc08   :  { %3562 = vtanh.f32 %v1693_v37 }
 0xc09   :  { %3564 = vtanh.f32 %v1690_v27 }
 0xc0a   :  { %3566 = vtanh.f32 %v1694_v29 }
 0xc0b   :  { %3568 = vpow2.f32 %v3094_v34 }
 0xc0c   :  { %3570 = vpow2.f32 %v3096_v43 }
 0xc0d   :  { %3572 = vpow2.f32 %v3098_v17 }
 0xc0e   :  { %3574 = vpow2.f32 %v3099_v11 }
 0xc0f   :  { %3576 = vpow2.f32 %v3095_v15 }
 0xc10   :  { %v3553_v61 = vpop.eup %3552  ;;  %3578 = vpow2.f32 %v3100_v18 }
 0xc11   :  { %1791 = vrot.lane.b32.xlu0 %v3553_v61, %s3947_s3  ;;  %v3555_v33 = vpop.eup %3554  ;;  %3580 = vpow2.f32 %v3097_v13 }
 0xc12   :  { %v3557_v5 = vpop.eup %3556 }
 0xc13   :  { %1799 = vrot.lane.b32.xlu1 %v3557_v5, %s3947_s3  ;;  %v3559_v63 = vpop.eup %3558 }
 0xc14   :  { %v3561_v40 = vpop.eup %3560 }
 0xc15   :  { %1795 = vrot.lane.b32.xlu0 %v3555_v33, %s3947_s3  ;;  %v3563_v47 = vpop.eup %3562 }
 0xc16   :  { %v3565_v49 = vpop.eup %3564 }
 0xc17   :  { %1793 = vrot.lane.b32.xlu1 %v3561_v40, %s3947_s3  ;;  %v3567_v6 = vpop.eup %3566 }
 0xc18   :  { %v3569_v58 = vpop.eup %3568 }
 0xc19   :  { %1801 = vrot.lane.b32.xlu0 %v3559_v63, %s3947_s3  ;;  %v1719_v23 = vadd.f32 1.0, %v3569_v58  ;;  %v3571_v57 = vpop.eup %3570 }
 0xc1a   :  { %v3573_v50 = vpop.eup %3572  ;;  %v1721_v51 = vadd.f32 1.0, %v3571_v57 }
 0xc1b   :  { %1797 = vrot.lane.b32.xlu1 %v3565_v49, %s3947_s3  ;;  %3582 = vrcp.f32 %v1719_v23  ;;  %v3575_v36 = vpop.eup %3574  ;;  %v1723_v7 = vadd.f32 1.0, %v3573_v50  ;;  %v1759_v23 = vrot.slane %v4523_v9, 7 }
 0xc1c   :  { %3584 = vpow2.f32 %v3101_v45  ;;  %v3577_v3 = vpop.eup %3576  ;;  %v1724_v24 = vadd.f32 1.0, %v3575_v36  ;;  %v1763_v36 = vrot.slane %v4520_v60, 7  ;;  %v1765_v60 = vrot.slane %v4541_v32, 7 }
 0xc1d   :  { %1803 = vrot.lane.b32.xlu0 %v3563_v47, %s3947_s3  ;;  %3586 = vrcp.f32 %v1721_v51  ;;  %v3579_v53 = vpop.eup %3578  ;;  %v1720_v59 = vadd.f32 1.0, %v3577_v3  ;;  %v1761_v51 = vrot.slane %v4533_v21, 7 }
 0xc1e   :  { %v3581_v1 = vpop.eup %3580  ;;  %3588 = vrcp.f32 %v1723_v7  ;;  %v1725_v38 = vadd.f32 1.0, %v3579_v53 }
 0xc1f   :  { %1805 = vrot.lane.b32.xlu1 %v3567_v6, %s3947_s3  ;;  %3590 = vrcp.f32 %v1724_v24  ;;  %v1722_v55 = vadd.f32 1.0, %v3581_v1  ;;  %v1764_v24 = vrot.slane %v4530_v42, 7 }
 0xc20   :  { %3592 = vrcp.f32 %v1720_v59  ;;  %v1760_v59 = vrot.slane %v4510_v52, 7 }
 0xc21   :  { %3594 = vrcp.f32 %v1725_v38 }
 0xc22   :  { %3596 = vrcp.f32 %v1722_v55 }
 0xc28   :  { %v4598_v22 = vpop.eup %3582 }
 0xc29   :  { %v3585_v10 = vpop.eup %3584  ;;  %v1775_v45 = vmul.f32 %v4598_v22, %v1759_v23 }
 0xc2a   :  { %v1726_v46 = vadd.f32 1.0, %v3585_v10  ;;  %v4602_v12 = vpop.eup %3586 }
 0xc2b   :  { %v4605_v4 = vpop.eup %3588  ;;  %v1777_v7 = vmul.f32 %v4602_v12, %v1761_v51 }
 0xc2c   :  { %3598 = vrcp.f32 %v1726_v46  ;;  %v4609_v33 = vpop.eup %3590  ;;  %v1779_v53 = vmul.f32 %v4605_v4, %v1763_v36  ;;  %v1762_v46 = vrot.slane %v4513_v54, 7 }
 0xc2d   :  { %v4613_v40 = vpop.eup %3592  ;;  %v1780_v21 = vmul.f32 %v4609_v33, %v1764_v24 }
 0xc2e   :  { %v4617_v6 = vpop.eup %3594  ;;  %v1776_v42 = vmul.f32 %v4613_v40, %v1760_v59 }
 0xc2f   :  { %v4621_v17 = vpop.eup %3596 }
 0xc30   :  { %v1778_v32 = vmul.f32 %v4621_v17, %v1762_v46 }
 0xc39   :  { %v4626_v58 = vpop.eup %3598 }
 0xc83   :  { %v1792_v62 = vpop.permute.xlu0 %1791 }
 0xc84   :  { %v1815_v56 = vmul.f32 %v4598_v22, %v1792_v62 }
 0xc85   :  { %v1800_v27 = vpop.permute.xlu1 %1799 }
 0xc86   :  { %1831 = vrot.lane.b32.xlu0 %v1815_v56, %s3947_s3  ;;  %v1819_v29 = vmul.f32 %v4605_v4, %v1800_v27 }
 0xc87   :  { %v1796_v61 = vpop.permute.xlu0 %1795 }
 0xc88   :  { %v1817_v37 = vmul.f32 %v4602_v12, %v1796_v61  ;;  %1839 = vrot.lane.b32.xlu1 %v1819_v29, %s3947_s3  ;;  %v1781_v61 = vmul.f32 %v4617_v6, %v1765_v60 }
 0xc89   :  { %v1794_v47 = vpop.permute.xlu1 %1793 }
 0xc8a   :  { %1835 = vrot.lane.b32.xlu0 %v1817_v37, %s3947_s3  ;;  %v1816_v49 = vmul.f32 %v4613_v40, %v1794_v47 }
 0xc8b   :  { %v1802_v5 = vpop.permute.xlu0 %1801 }
 0xc8c   :  { %v1820_v63 = vmul.f32 %v4609_v33, %v1802_v5  ;;  %1833 = vrot.lane.b32.xlu1 %v1816_v49, %s3947_s3  ;;  %v1766_v5 = vrot.slane %v4539_v30, 7 }
 0xc8d   :  { %v1798_v11 = vpop.permute.xlu1 %1797 }
 0xc8e   :  { %1841 = vrot.lane.b32.xlu0 %v1820_v63, %s3947_s3  ;;  %v1818_v15 = vmul.f32 %v4621_v17, %v1798_v11  ;;  %v1782_v54 = vmul.f32 %v4626_v58, %v1766_v5 }
 0xc8f   :  { %v1804_v34 = vpop.permute.xlu0 %1803 }
 0xc90   :  { %v1821_v43 = vmul.f32 %v4617_v6, %v1804_v34  ;;  %1837 = vrot.lane.b32.xlu1 %v1818_v15, %s3947_s3 }
 0xc91   :  { %v1806_v18 = vpop.permute.xlu1 %1805 }
 0xc92   :  { %1843 = vrot.lane.b32.xlu0 %v1821_v43, %s3947_s3  ;;  %v1822_v13 = vmul.f32 %v4626_v58, %v1806_v18 }
 0xc94   :  { %1845 = vrot.lane.b32.xlu1 %v1822_v13, %s3947_s3 }
 0xcf8   :  { %v1832_v57 = vpop.permute.xlu0 %1831 }
 0xcf9   :  { %v4632_v50 = vadd.f32 %v1832_v57, %v1775_v45 }
 0xcfa   :  { %v1840_v9 = vpop.permute.xlu1 %1839 }
 0xcfb   :  { %3600 = vtanh.f32 %v4632_v50  ;;  %v4643_v62 = vadd.f32 %v1840_v9, %v1779_v53 }
 0xcfc   :  { %v1836_v3 = vpop.permute.xlu0 %1835 }
 0xcfd   :  { %v4640_v1 = vadd.f32 %v1836_v3, %v1777_v7 }
 0xcfe   :  { %v1834_v10 = vpop.permute.xlu1 %1833 }
 0xcff   :  { %3602 = vtanh.f32 %v4640_v1  ;;  %v4653_v52 = vadd.f32 %v1834_v10, %v1776_v42 }
 0xd00   :  { %v1842_v38 = vpop.permute.xlu0 %1841  ;;  %3604 = vtanh.f32 %v4643_v62 }
 0xd01   :  { %v4650_v56 = vadd.f32 %v1842_v38, %v1780_v21 }
 0xd02   :  { %v1838_v29 = vpop.permute.xlu1 %1837 }
 0xd03   :  { %3606 = vtanh.f32 %v4650_v56  ;;  %v4663_v63 = vadd.f32 %v1838_v29, %v1778_v32 }
 0xd04   :  { %v1844_v37 = vpop.permute.xlu0 %1843  ;;  %3608 = vtanh.f32 %v4653_v52 }
 0xd05   :  { %v4660_v27 = vadd.f32 %v1844_v37, %v1781_v61 }
 0xd06   :  { %v1846_v47 = vpop.permute.xlu1 %1845 }
 0xd07   :  { %3610 = vtanh.f32 %v4660_v27  ;;  %v4668_v49 = vadd.f32 %v1846_v47, %v1782_v54 }
 0xd08   :  { %v3601_v55 = vpop.eup %3600  ;;  %3612 = vtanh.f32 %v4663_v63 }
 0xd09   :  { %1879 = vrot.lane.b32.xlu0 %v3601_v55, %s3947_s3  ;;  %3614 = vtanh.f32 %v4668_v49 }
 0xd0c   :  { %v3603_v34 = vpop.eup %3602 }
 0xd0d   :  { %1883 = vrot.lane.b32.xlu0 %v3603_v34, %s3947_s3  ;;  %v3605_v43 = vpop.eup %3604 }
 0xd0e   :  { %1887 = vrot.lane.b32.xlu1 %v3605_v43, %s3947_s3 }
 0xd10   :  { %v3607_v30 = vpop.eup %3606 }
 0xd11   :  { %1889 = vrot.lane.b32.xlu0 %v3607_v30, %s3947_s3  ;;  %v3609_v11 = vpop.eup %3608 }
 0xd12   :  { %1881 = vrot.lane.b32.xlu1 %v3609_v11, %s3947_s3 }
 0xd14   :  { %v3611_v15 = vpop.eup %3610 }
 0xd15   :  { %1891 = vrot.lane.b32.xlu0 %v3611_v15, %s3947_s3  ;;  %v3613_v18 = vpop.eup %3612 }
 0xd16   :  { %1885 = vrot.lane.b32.xlu1 %v3613_v18, %s3947_s3  ;;  %v3615_v13 = vpop.eup %3614 }
 0xd1a   :  { %1893 = vrot.lane.b32.xlu1 %v3615_v13, %s3947_s3 }
 0xd7b   :  { %v1880_v23 = vpop.permute.xlu0 %1879 }
 0xd7c   :  { %v1903_v7 = vmul.f32 %v4598_v22, %v1880_v23 }
 0xd7e   :  { %v1919_v59 = vrot.slane %v1903_v7, 4 }
 0xd7f   :  { %v1884_v45 = vpop.permute.xlu0 %1883 }
 0xd80   :  { %v1888_v57 = vpop.permute.xlu1 %1887  ;;  %v1905_v51 = vmul.f32 %v4602_v12, %v1884_v45 }
 0xd81   :  { %v1907_v61 = vmul.f32 %v4605_v4, %v1888_v57 }
 0xd82   :  { %v1922_v53 = vrot.slane %v1905_v51, 2 }
 0xd83   :  { %v1890_v36 = vpop.permute.xlu0 %1889 }
 0xd84   :  { %v1882_v3 = vpop.permute.xlu1 %1881  ;;  %v1908_v38 = vmul.f32 %v4609_v33, %v1890_v36 }
 0xd85   :  { %v1904_v24 = vmul.f32 %v4613_v40, %v1882_v3 }
 0xd86   :  { %v1927_v22 = vrot.slane %v1908_v38, 7 }
 0xd87   :  { %v1892_v9 = vpop.permute.xlu0 %1891  ;;  %v1920_v21 = vrot.slane %v1904_v24, 3 }
 0xd88   :  { %v1886_v60 = vpop.permute.xlu1 %1885  ;;  %v1909_v42 = vmul.f32 %v4617_v6, %v1892_v9 }
 0xd89   :  { %v1921_v55 = vsel %vm554_vm3, %v1920_v21, %v1919_v59  ;;  %v1906_v10 = vmul.f32 %v4621_v17, %v1886_v60 }
 0xd8a   :  { %v1923_v12 = vsel %vm557_vm4, %v1922_v53, %v1921_v55  ;;  %v1929_v37 = vrot.slane %v1909_v42, 6 }
 0xd8b   :  { %v1924_v46 = vrot.slane %v1906_v10, 1 }
 0xd8c   :  { %v1894_v40 = vpop.permute.xlu1 %1893 }
 0xd8d   :  { %v1925_v32 = vsel %vm560_vm5, %v1924_v46, %v1923_v12  ;;  %v1910_v29 = vmul.f32 %v4626_v58, %v1894_v40 }
 0xd8e   :  { %v1926_v33 = vsel %vm563_vm6, %v1907_v61, %v1925_v32 }
 0xd8f   :  { %v1928_v6 = vsel %vm566_vm7, %v1927_v22, %v1926_v33  ;;  %v1931_v5 = vrot.slane %v1910_v29, 5 }
 0xd90   :  { %v1930_v54 = vsel %vm569_vm8, %v1929_v37, %v1928_v6 }
 0xd91   :  { %v1932_v17 = vsel %vm572_vm9, %v1931_v5, %v1930_v54 }
 0xd92   :  { %1933 = vrot.lane.b32.xlu0 %v1932_v17, %s3948_s13 }
 0xe04   :  { %v1934_v47 = vpop.permute.xlu0 %1933 }
 0xe05   :  { %1936 = vst.msk [vmem:[#allocation8 + $0x8] sm:$0xff] %vm67_vm0, %v1934_v47  ;;  %3259 = vmatmul.mubr.msk.f32.vlgmr.msra.gmra.mxu1 %vm67_vm0, %v1934_v47 }
 0xe06   :  { %3273 = vmatpush3.msra.mxu1 %v4439_v14  ;;  %3280 = vmatprep.mubr.msk.f32.mxu1 %vm3946_vm1, %v3945_v0 }
 0xe07   :  { %3274 = vmatprep.subr.mxu1 %v3945_v0 }
 0xe08   :  { %3275 = vmatpush3.msra.mxu1 %v4445_v26 }
 0xe09   :  { %3276 = vmatprep.subr.mxu1 %v3945_v0 }
 0xe0a   :  { %3277 = vmatpush3.msra.mxu1 %v4449_v16 }
 0xe0b   :  { %3278 = vmatprep.subr.mxu1 %v3945_v0 }
 0xe0c   :  { %3279 = vmatpush3.msra.mxu1 %v4453_v2 }
 0xec5   :  { %v2005_v4 = vpop.f32.mrf.mxu1 }
 0xec6   :  { %v2010_v58 = vrot.slane %v2005_v4, 3  ;;  %v2011_v43 = vrot.slane %v2005_v4, 4  ;;  %v2012_v30 = vrot.slane %v2005_v4, 5  ;;  %v2013_v11 = vrot.slane %v2005_v4, 6 }
 0xec7   :  { %v3260_v34 = vpop.f32.mrf.mxu1  ;;  %v2014_v26 = vrot.slane %v2005_v4, 7  ;;  %v2015_v13 = vrot.slane %v2005_v4, 1  ;;  %v2016_v23 = vrot.slane %v2005_v4, 2  ;;  %v2030_v57 = vadd.f32 %v2005_v4, %v4067_v35 }
 0xec8   :  { %v2025_v14 = vadd.f32 %v2010_v58, %v4053_v19  ;;  %v2026_v15 = vadd.f32 %v2011_v43, %v4058_v25  ;;  %v2027_v18 = vadd.f32 %v2012_v30, %v4064_v31  ;;  %v2028_v16 = vadd.f32 %v2013_v11, %v4060_v28 }
 0xec9   :  { %v2029_v0 = vadd.f32 %v2014_v26, %v4070_v39  ;;  %v2031_v45 = vadd.f32 %v2015_v13, %v4075_v44  ;;  %v2032_v51 = vadd.f32 %v2016_v23, %v4072_v41  ;;  %v3108_v46 = vmul.f32 -1.442695, %v2030_v57 }
 0xeca   :  { %3616 = vtanh.f32 %v2025_v14  ;;  %v3103_v21 = vmul.f32 -1.442695, %v2025_v14  ;;  %v3104_v38 = vmul.f32 -1.442695, %v2026_v15  ;;  %v3105_v60 = vmul.f32 -1.442695, %v2027_v18 }
 0xecb   :  { %3618 = vtanh.f32 %v2026_v15  ;;  %v3106_v42 = vmul.f32 -1.442695, %v2028_v16  ;;  %v3107_v55 = vmul.f32 -1.442695, %v2029_v0  ;;  %v3109_v12 = vmul.f32 -1.442695, %v2031_v45 }
 0xecc   :  { %3620 = vtanh.f32 %v2027_v18  ;;  %v3110_v61 = vmul.f32 -1.442695, %v2032_v51 }
 0xecd   :  { %3622 = vtanh.f32 %v2028_v16 }
 0xece   :  { %3624 = vtanh.f32 %v2029_v0 }
 0xecf   :  { %3626 = vtanh.f32 %v2031_v45 }
 0xed0   :  { %3628 = vtanh.f32 %v2030_v57 }
 0xed1   :  { %3630 = vtanh.f32 %v2032_v51 }
 0xed2   :  { %3632 = vpow2.f32 %v3103_v21 }
 0xed3   :  { %3634 = vpow2.f32 %v3104_v38 }
 0xed4   :  { %3636 = vpow2.f32 %v3105_v60 }
 0xed5   :  { %3638 = vpow2.f32 %v3106_v42  ;;  %v2097_v42 = vrot.slane %v4632_v50, 7 }
 0xed6   :  { %3640 = vpow2.f32 %v3107_v55 }
 0xed7   :  { %v3617_v2 = vpop.eup %3616  ;;  %3642 = vpow2.f32 %v3109_v12 }
 0xed8   :  { %2129 = vrot.lane.b32.xlu1 %v3617_v2, %s3947_s3  ;;  %v3619_v36 = vpop.eup %3618  ;;  %3644 = vpow2.f32 %v3108_v46  ;;  %v2098_v46 = vrot.slane %v4653_v52, 7 }
 0xed9   :  { %v3621_v7 = vpop.eup %3620  ;;  %2131 = vrot.lane.b32.xlu0 %v3619_v36, %s3947_s3 }
 0xeda   :  { %v3623_v3 = vpop.eup %3622 }
 0xedb   :  { %v3625_v24 = vpop.eup %3624 }
 0xedc   :  { %2133 = vrot.lane.b32.xlu1 %v3621_v7, %s3947_s3  ;;  %v3627_v53 = vpop.eup %3626 }
 0xedd   :  { %2135 = vrot.lane.b32.xlu0 %v3623_v3, %s3947_s3  ;;  %v3629_v9 = vpop.eup %3628 }
 0xede   :  { %v3631_v59 = vpop.eup %3630 }
 0xedf   :  { %v3633_v10 = vpop.eup %3632 }
 0xee0   :  { %2137 = vrot.lane.b32.xlu1 %v3625_v24, %s3947_s3  ;;  %v2057_v22 = vadd.f32 1.0, %v3633_v10  ;;  %v3635_v40 = vpop.eup %3634 }
 0xee1   :  { %2141 = vrot.lane.b32.xlu0 %v3627_v53, %s3947_s3  ;;  %v3637_v37 = vpop.eup %3636  ;;  %v2058_v32 = vadd.f32 1.0, %v3635_v40 }
 0xee2   :  { %3646 = vrcp.f32 %v2057_v22  ;;  %v3639_v29 = vpop.eup %3638  ;;  %v2059_v33 = vadd.f32 1.0, %v3637_v37  ;;  %v2099_v22 = vrot.slane %v4640_v1, 7 }
 0xee3   :  { %3648 = vpow2.f32 %v3110_v61  ;;  %v3641_v6 = vpop.eup %3640  ;;  %v2060_v5 = vadd.f32 1.0, %v3639_v29 }
 0xee4   :  { %2139 = vrot.lane.b32.xlu1 %v3629_v9, %s3947_s3  ;;  %3650 = vrcp.f32 %v2058_v32  ;;  %v3643_v54 = vpop.eup %3642  ;;  %v2061_v17 = vadd.f32 1.0, %v3641_v6  ;;  %v2100_v32 = vrot.slane %v4663_v63, 7 }
 0xee5   :  { %2143 = vrot.lane.b32.xlu0 %v3631_v59, %s3947_s3  ;;  %3652 = vrcp.f32 %v2059_v33  ;;  %v3645_v47 = vpop.eup %3644  ;;  %v2063_v58 = vadd.f32 1.0, %v3643_v54  ;;  %v2101_v33 = vrot.slane %v4643_v62, 7  ;;  %v2103_v54 = vrot.slane %v4660_v27, 7 }
 0xee6   :  { %3654 = vrcp.f32 %v2060_v5  ;;  %v2062_v43 = vadd.f32 1.0, %v3645_v47  ;;  %v2102_v47 = vrot.slane %v4650_v56, 7  ;;  %v2104_v27 = vrot.slane %v4668_v49, 7 }
 0xee7   :  { %3656 = vrcp.f32 %v2061_v17 }
 0xee8   :  { %3658 = vrcp.f32 %v2063_v58 }
 0xee9   :  { %3660 = vrcp.f32 %v2062_v43 }
 0xeef   :  { %v4721_v4 = vpop.eup %3646 }
 0xef0   :  { %v3649_v14 = vpop.eup %3648  ;;  %v2113_v55 = vmul.f32 %v4721_v4, %v2097_v42 }
 0xef1   :  { %v2064_v11 = vadd.f32 1.0, %v3649_v14  ;;  %v4725_v15 = vpop.eup %3650 }
 0xef2   :  { %v4727_v18 = vpop.eup %3652  ;;  %v2114_v61 = vmul.f32 %v4725_v15, %v2098_v46 }
 0xef3   :  { %3662 = vrcp.f32 %v2064_v11  ;;  %v4732_v2 = vpop.eup %3654  ;;  %v2115_v37 = vmul.f32 %v4727_v18, %v2099_v22 }
 0xef4   :  { %v4735_v45 = vpop.eup %3656  ;;  %v2116_v52 = vmul.f32 %v4732_v2, %v2100_v32 }
 0xef5   :  { %v4740_v7 = vpop.eup %3658  ;;  %v2117_v1 = vmul.f32 %v4735_v45, %v2101_v33 }
 0xef6   :  { %v4743_v24 = vpop.eup %3660 }
 0xef7   :  { %v2118_v43 = vmul.f32 %v4743_v24, %v2102_v47 }
 0xf00   :  { %v4748_v21 = vpop.eup %3662 }
 0xf4a   :  { %v2130_v34 = vpop.permute.xlu1 %2129 }
 0xf4b   :  { %v2153_v30 = vmul.f32 %v4721_v4, %v2130_v34  ;;  %v2132_v26 = vpop.permute.xlu0 %2131  ;;  %v2119_v34 = vmul.f32 %v4740_v7, %v2103_v54 }
 0xf4c   :  { %v2154_v13 = vmul.f32 %v4725_v15, %v2132_v26  ;;  %v2120_v26 = vmul.f32 %v4748_v21, %v2104_v27 }
 0xf4d   :  { %2169 = vrot.lane.b32.xlu1 %v2153_v30, %s3947_s3 }
 0xf4e   :  { %v2134_v16 = vpop.permute.xlu1 %2133  ;;  %2171 = vrot.lane.b32.xlu0 %v2154_v13, %s3947_s3 }
 0xf4f   :  { %v2155_v0 = vmul.f32 %v4727_v18, %v2134_v16  ;;  %v2136_v23 = vpop.permute.xlu0 %2135 }
 0xf50   :  { %v2156_v57 = vmul.f32 %v4732_v2, %v2136_v23 }
 0xf51   :  { %2173 = vrot.lane.b32.xlu1 %v2155_v0, %s3947_s3 }
 0xf52   :  { %v2138_v51 = vpop.permute.xlu1 %2137  ;;  %2175 = vrot.lane.b32.xlu0 %v2156_v57, %s3947_s3 }
 0xf53   :  { %v2157_v36 = vmul.f32 %v4735_v45, %v2138_v51  ;;  %v2142_v3 = vpop.permute.xlu0 %2141 }
 0xf54   :  { %v2159_v53 = vmul.f32 %v4740_v7, %v2142_v3 }
 0xf55   :  { %2177 = vrot.lane.b32.xlu1 %v2157_v36, %s3947_s3 }
 0xf56   :  { %v2140_v9 = vpop.permute.xlu1 %2139  ;;  %2181 = vrot.lane.b32.xlu0 %v2159_v53, %s3947_s3 }
 0xf57   :  { %v2158_v59 = vmul.f32 %v4743_v24, %v2140_v9  ;;  %v2144_v38 = vpop.permute.xlu0 %2143 }
 0xf58   :  { %v2160_v60 = vmul.f32 %v4748_v21, %v2144_v38 }
 0xf59   :  { %2179 = vrot.lane.b32.xlu1 %v2158_v59, %s3947_s3 }
 0xf5a   :  { %2183 = vrot.lane.b32.xlu0 %v2160_v60, %s3947_s3 }
 0xfbf   :  { %v2170_v10 = vpop.permute.xlu1 %2169 }
 0xfc0   :  { %v4755_v12 = vadd.f32 %v2170_v10, %v2113_v55  ;;  %v2172_v40 = vpop.permute.xlu0 %2171 }
 0xfc1   :  { %v4763_v29 = vadd.f32 %v2172_v40, %v2114_v61 }
 0xfc2   :  { %3664 = vtanh.f32 %v4755_v12 }
 0xfc3   :  { %v2174_v50 = vpop.permute.xlu1 %2173  ;;  %3666 = vtanh.f32 %v4763_v29 }
 0xfc4   :  { %v4766_v6 = vadd.f32 %v2174_v50, %v2115_v37  ;;  %v2176_v5 = vpop.permute.xlu0 %2175 }
 0xfc5   :  { %v4773_v17 = vadd.f32 %v2176_v5, %v2116_v52 }
 0xfc6   :  { %3668 = vtanh.f32 %v4766_v6 }
 0xfc7   :  { %v2178_v63 = vpop.permute.xlu1 %2177  ;;  %3670 = vtanh.f32 %v4773_v17 }
 0xfc8   :  { %v4776_v58 = vadd.f32 %v2178_v63, %v2117_v1  ;;  %v2182_v14 = vpop.permute.xlu0 %2181 }
 0xfc9   :  { %v4784_v30 = vadd.f32 %v2182_v14, %v2119_v34 }
 0xfca   :  { %3672 = vtanh.f32 %v4776_v58 }
 0xfcb   :  { %v2180_v11 = vpop.permute.xlu1 %2179  ;;  %3674 = vtanh.f32 %v4784_v30 }
 0xfcc   :  { %v4786_v56 = vadd.f32 %v2180_v11, %v2118_v43  ;;  %v2184_v13 = vpop.permute.xlu0 %2183 }
 0xfcd   :  { %v4791_v16 = vadd.f32 %v2184_v13, %v2120_v26 }
 0xfce   :  { %3676 = vtanh.f32 %v4786_v56 }
 0xfcf   :  { %v3665_v62 = vpop.eup %3664  ;;  %3678 = vtanh.f32 %v4791_v16 }
 0xfd0   :  { %2217 = vrot.lane.b32.xlu1 %v3665_v62, %s3947_s3  ;;  %v3667_v0 = vpop.eup %3666 }
 0xfd1   :  { %2219 = vrot.lane.b32.xlu0 %v3667_v0, %s3947_s3 }
 0xfd3   :  { %v3669_v23 = vpop.eup %3668 }
 0xfd4   :  { %2221 = vrot.lane.b32.xlu1 %v3669_v23, %s3947_s3  ;;  %v3671_v49 = vpop.eup %3670 }
 0xfd5   :  { %2223 = vrot.lane.b32.xlu0 %v3671_v49, %s3947_s3 }
 0xfd7   :  { %v3673_v57 = vpop.eup %3672 }
 0xfd8   :  { %2225 = vrot.lane.b32.xlu1 %v3673_v57, %s3947_s3  ;;  %v3675_v51 = vpop.eup %3674 }
 0xfd9   :  { %2229 = vrot.lane.b32.xlu0 %v3675_v51, %s3947_s3 }
 0xfdb   :  { %v3677_v36 = vpop.eup %3676 }
 0xfdc   :  { %2227 = vrot.lane.b32.xlu1 %v3677_v36, %s3947_s3  ;;  %v3679_v3 = vpop.eup %3678 }
 0xfdd   :  { %2231 = vrot.lane.b32.xlu0 %v3679_v3, %s3947_s3 }
0x1042   :  { %v2218_v53 = vpop.permute.xlu1 %2217 }
0x1043   :  { %v2241_v9 = vmul.f32 %v4721_v4, %v2218_v53  ;;  %v2220_v59 = vpop.permute.xlu0 %2219 }
0x1044   :  { %v2242_v38 = vmul.f32 %v4725_v15, %v2220_v59 }
0x1045   :  { %v2257_v60 = vrot.slane %v2241_v9, 5 }
0x1046   :  { %v2222_v42 = vpop.permute.xlu1 %2221  ;;  %v2258_v10 = vrot.slane %v2242_v38, 4 }
0x1047   :  { %v2243_v55 = vmul.f32 %v4727_v18, %v2222_v42  ;;  %v2224_v46 = vpop.permute.xlu0 %2223 }
0x1048   :  { %v2259_v61 = vsel %vm554_vm3, %v2258_v10, %v2257_v60  ;;  %v2244_v40 = vmul.f32 %v4732_v2, %v2224_v46 }
0x1049   :  { %v2260_v22 = vrot.slane %v2243_v55, 3 }
0x104a   :  { %v2226_v37 = vpop.permute.xlu1 %2225  ;;  %v2262_v4 = vrot.slane %v2244_v40, 2 }
0x104b   :  { %v2261_v32 = vsel %vm557_vm4, %v2260_v22, %v2259_v61  ;;  %v2245_v50 = vmul.f32 %v4735_v45, %v2226_v37  ;;  %v2230_v33 = vpop.permute.xlu0 %2229 }
0x104c   :  { %v2247_v15 = vmul.f32 %v4740_v7, %v2230_v33  ;;  %v2263_v5 = vsel %vm560_vm5, %v2262_v4, %v2261_v32 }
0x104d   :  { %v2264_v52 = vrot.slane %v2245_v50, 1 }
0x104e   :  { %v2228_v18 = vpop.permute.xlu1 %2227  ;;  %v2267_v63 = vrot.slane %v2247_v15, 7 }
0x104f   :  { %v2265_v1 = vsel %vm563_vm6, %v2264_v52, %v2263_v5  ;;  %v2246_v54 = vmul.f32 %v4743_v24, %v2228_v18  ;;  %v2232_v47 = vpop.permute.xlu0 %2231 }
0x1050   :  { %v2248_v62 = vmul.f32 %v4748_v21, %v2232_v47 }
0x1051   :  { %v2266_v2 = vsel %vm566_vm7, %v2246_v54, %v2265_v1 }
0x1052   :  { %v2268_v45 = vsel %vm569_vm8, %v2267_v63, %v2266_v2  ;;  %v2269_v34 = vrot.slane %v2248_v62, 6 }
0x1054   :  { %v4816_v14 = vsel %vm572_vm9, %v2269_v34, %v2268_v45 }
0x1055   :  { %2275 = vrot.lane.b32.xlu1 %v4816_v14, %s3948_s13 }
0x10c7   :  { %v2276_v7 = vpop.permute.xlu1 %2275 }
0x10c8   :  { %3270 = vmatmul.mubr.msk.f32.vlgmr.msra.gmra.mxu0 %vm67_vm0, %v2276_v7 }
0x1188   :  { %v2345_v43 = vpop.f32.mrf.mxu0 }
0x1189   :  { %v2350_v24 = vrot.slane %v2345_v43, 2  ;;  %v2351_v26 = vrot.slane %v2345_v43, 3  ;;  %v2352_v21 = vrot.slane %v2345_v43, 4  ;;  %v2353_v13 = vrot.slane %v2345_v43, 5 }
0x118a   :  { %v3271_v27 = vpop.f32.mrf.mxu0  ;;  %v2354_v23 = vrot.slane %v2345_v43, 6  ;;  %v2355_v57 = vrot.slane %v2345_v43, 7  ;;  %v2356_v36 = vrot.slane %v2345_v43, 1  ;;  %v2371_v38 = vadd.f32 %v2345_v43, %v4075_v44 }
0x118b   :  { %v2365_v11 = vadd.f32 %v2350_v24, %v4053_v19  ;;  %v2366_v0 = vadd.f32 %v2351_v26, %v4058_v25  ;;  %v2367_v49 = vadd.f32 %v2352_v21, %v4064_v31  ;;  %v2368_v51 = vadd.f32 %v2353_v13, %v4060_v28 }
0x118c   :  { %v2369_v3 = vadd.f32 %v2354_v23, %v4070_v39  ;;  %v2370_v9 = vadd.f32 %v2355_v57, %v4067_v35  ;;  %v2372_v59 = vadd.f32 %v2356_v36, %v4072_v41  ;;  %v3118_v18 = vmul.f32 -1.442695, %v2371_v38 }
0x118d   :  { %3680 = vtanh.f32 %v2365_v11  ;;  %v3112_v40 = vmul.f32 -1.442695, %v2365_v11  ;;  %v3113_v37 = vmul.f32 -1.442695, %v2366_v0  ;;  %v3114_v32 = vmul.f32 -1.442695, %v2367_v49 }
0x118e   :  { %3682 = vtanh.f32 %v2366_v0  ;;  %v3115_v50 = vmul.f32 -1.442695, %v2368_v51  ;;  %v3116_v4 = vmul.f32 -1.442695, %v2369_v3  ;;  %v3117_v52 = vmul.f32 -1.442695, %v2370_v9 }
0x118f   :  { %3684 = vtanh.f32 %v2367_v49  ;;  %v3119_v15 = vmul.f32 -1.442695, %v2372_v59 }
0x1190   :  { %3686 = vtanh.f32 %v2368_v51 }
0x1191   :  { %3688 = vtanh.f32 %v2369_v3 }
0x1192   :  { %3690 = vtanh.f32 %v2370_v9 }
0x1193   :  { %3692 = vtanh.f32 %v2372_v59 }
0x1194   :  { %3694 = vtanh.f32 %v2371_v38 }
0x1195   :  { %3696 = vpow2.f32 %v3112_v40 }
0x1196   :  { %3698 = vpow2.f32 %v3113_v37 }
0x1197   :  { %3700 = vpow2.f32 %v3114_v32 }
0x1198   :  { %3702 = vpow2.f32 %v3115_v50 }
0x1199   :  { %3704 = vpow2.f32 %v3116_v4  ;;  %v2437_v4 = vrot.slane %v4755_v12, 7 }
0x119a   :  { %v3681_v53 = vpop.eup %3680  ;;  %3706 = vpow2.f32 %v3117_v52 }
0x119b   :  { %2469 = vrot.lane.b32.xlu0 %v3681_v53, %s3947_s3  ;;  %v3683_v60 = vpop.eup %3682  ;;  %3708 = vpow2.f32 %v3119_v15 }
0x119c   :  { %v3685_v42 = vpop.eup %3684  ;;  %2471 = vrot.lane.b32.xlu1 %v3683_v60, %s3947_s3 }
0x119d   :  { %v3687_v55 = vpop.eup %3686 }
0x119e   :  { %v3689_v10 = vpop.eup %3688 }
0x119f   :  { %2473 = vrot.lane.b32.xlu0 %v3685_v42, %s3947_s3  ;;  %v3691_v46 = vpop.eup %3690 }
0x11a0   :  { %2475 = vrot.lane.b32.xlu1 %v3687_v55, %s3947_s3  ;;  %v3693_v22 = vpop.eup %3692 }
0x11a1   :  { %v3695_v61 = vpop.eup %3694 }
0x11a2   :  { %v3697_v33 = vpop.eup %3696 }
0x11a3   :  { %2477 = vrot.lane.b32.xlu0 %v3689_v10, %s3947_s3  ;;  %v2397_v5 = vadd.f32 1.0, %v3697_v33  ;;  %v3699_v1 = vpop.eup %3698 }
0x11a4   :  { %2479 = vrot.lane.b32.xlu1 %v3691_v46, %s3947_s3  ;;  %v3701_v54 = vpop.eup %3700  ;;  %v2398_v63 = vadd.f32 1.0, %v3699_v1 }
0x11a5   :  { %3710 = vrcp.f32 %v2397_v5  ;;  %v3703_v47 = vpop.eup %3702  ;;  %v2399_v2 = vadd.f32 1.0, %v3701_v54  ;;  %v2438_v5 = vrot.slane %v4763_v29, 7 }
0x11a6   :  { %3712 = vpow2.f32 %v3118_v18  ;;  %v3705_v62 = vpop.eup %3704  ;;  %v2400_v45 = vadd.f32 1.0, %v3703_v47  ;;  %v2439_v18 = vrot.slane %v4766_v6, 7  ;;  %v2440_v47 = vrot.slane %v4773_v17, 7 }
0x11a7   :  { %2483 = vrot.lane.b32.xlu0 %v3693_v22, %s3947_s3  ;;  %3714 = vrcp.f32 %v2398_v63  ;;  %v3707_v34 = vpop.eup %3706  ;;  %v2401_v7 = vadd.f32 1.0, %v3705_v62  ;;  %v2441_v62 = vrot.slane %v4776_v58, 7 }
0x11a8   :  { %2481 = vrot.lane.b32.xlu1 %v3695_v61, %s3947_s3  ;;  %3716 = vrcp.f32 %v2399_v2  ;;  %v3709_v43 = vpop.eup %3708  ;;  %v2402_v27 = vadd.f32 1.0, %v3707_v34 }
0x11a9   :  { %3718 = vrcp.f32 %v2400_v45  ;;  %v2404_v21 = vadd.f32 1.0, %v3709_v43 }
0x11aa   :  { %3720 = vrcp.f32 %v2401_v7  ;;  %v2442_v7 = vrot.slane %v4786_v56, 7  ;;  %v2443_v56 = vrot.slane %v4784_v30, 7 }
0x11ab   :  { %3722 = vrcp.f32 %v2402_v27  ;;  %v2444_v27 = vrot.slane %v4791_v16, 7 }
0x11ac   :  { %3724 = vrcp.f32 %v2404_v21 }
0x11b2   :  { %v4837_v24 = vpop.eup %3710 }
0x11b3   :  { %v3713_v26 = vpop.eup %3712  ;;  %v2453_v33 = vmul.f32 %v4837_v24, %v2437_v4 }
0x11b4   :  { %v2403_v0 = vadd.f32 1.0, %v3713_v26  ;;  %v4841_v23 = vpop.eup %3714 }
0x11b5   :  { %v4843_v57 = vpop.eup %3716  ;;  %v2454_v1 = vmul.f32 %v4841_v23, %v2438_v5 }
0x11b6   :  { %3726 = vrcp.f32 %v2403_v0  ;;  %v4848_v53 = vpop.eup %3718  ;;  %v2455_v63 = vmul.f32 %v4843_v57, %v2439_v18 }
0x11b7   :  { %v4851_v59 = vpop.eup %3720  ;;  %v2456_v29 = vmul.f32 %v4848_v53, %v2440_v47 }
0x11b8   :  { %v4856_v55 = vpop.eup %3722  ;;  %v2457_v6 = vmul.f32 %v4851_v59, %v2441_v62 }
0x11b9   :  { %v4859_v46 = vpop.eup %3724  ;;  %v2458_v26 = vmul.f32 %v4856_v55, %v2442_v7 }
0x11c3   :  { %v4864_v37 = vpop.eup %3726 }
0x120d   :  { %v2470_v11 = vpop.permute.xlu0 %2469 }
0x120e   :  { %v2493_v13 = vmul.f32 %v4837_v24, %v2470_v11  ;;  %v2472_v49 = vpop.permute.xlu1 %2471 }
0x120f   :  { %v2494_v51 = vmul.f32 %v4841_v23, %v2472_v49 }
0x1210   :  { %2509 = vrot.lane.b32.xlu0 %v2493_v13, %s3947_s3  ;;  %v2460_v13 = vmul.f32 %v4859_v46, %v2444_v27 }
0x1211   :  { %v2474_v36 = vpop.permute.xlu0 %2473  ;;  %2511 = vrot.lane.b32.xlu1 %v2494_v51, %s3947_s3  ;;  %v2459_v51 = vmul.f32 %v4864_v37, %v2443_v56 }
0x1212   :  { %v2495_v3 = vmul.f32 %v4843_v57, %v2474_v36  ;;  %v2476_v9 = vpop.permute.xlu1 %2475 }
0x1213   :  { %v2496_v38 = vmul.f32 %v4848_v53, %v2476_v9 }
0x1214   :  { %2513 = vrot.lane.b32.xlu0 %v2495_v3, %s3947_s3 }
0x1215   :  { %v2478_v60 = vpop.permute.xlu0 %2477  ;;  %2515 = vrot.lane.b32.xlu1 %v2496_v38, %s3947_s3 }
0x1216   :  { %v2497_v42 = vmul.f32 %v4851_v59, %v2478_v60  ;;  %v2480_v10 = vpop.permute.xlu1 %2479 }
0x1217   :  { %v2498_v22 = vmul.f32 %v4856_v55, %v2480_v10 }
0x1218   :  { %2517 = vrot.lane.b32.xlu0 %v2497_v42, %s3947_s3 }
0x1219   :  { %v2484_v61 = vpop.permute.xlu0 %2483  ;;  %2519 = vrot.lane.b32.xlu1 %v2498_v22, %s3947_s3 }
0x121a   :  { %v2500_v40 = vmul.f32 %v4859_v46, %v2484_v61  ;;  %v2482_v32 = vpop.permute.xlu1 %2481 }
0x121b   :  { %v2499_v50 = vmul.f32 %v4864_v37, %v2482_v32 }
0x121c   :  { %2523 = vrot.lane.b32.xlu0 %v2500_v40, %s3947_s3 }
0x121d   :  { %2521 = vrot.lane.b32.xlu1 %v2499_v50, %s3947_s3 }
0x1282   :  { %v2510_v52 = vpop.permute.xlu0 %2509 }
0x1283   :  { %v4871_v15 = vadd.f32 %v2510_v52, %v2453_v33  ;;  %v2512_v54 = vpop.permute.xlu1 %2511 }
0x1284   :  { %v4879_v2 = vadd.f32 %v2512_v54, %v2454_v1 }
0x1285   :  { %3728 = vtanh.f32 %v4871_v15 }
0x1286   :  { %v2514_v12 = vpop.permute.xlu0 %2513  ;;  %3730 = vtanh.f32 %v4879_v2 }
0x1287   :  { %v4882_v45 = vadd.f32 %v2514_v12, %v2455_v63  ;;  %v2516_v34 = vpop.permute.xlu1 %2515 }
0x1288   :  { %v4889_v43 = vadd.f32 %v2516_v34, %v2456_v29 }
0x1289   :  { %3732 = vtanh.f32 %v4882_v45 }
0x128a   :  { %v2518_v17 = vpop.permute.xlu0 %2517  ;;  %3734 = vtanh.f32 %v4889_v43 }
0x128b   :  { %v4892_v11 = vadd.f32 %v2518_v17, %v2457_v6  ;;  %v2520_v21 = vpop.permute.xlu1 %2519 }
0x128c   :  { %v4900_v0 = vadd.f32 %v2520_v21, %v2458_v26 }
0x128d   :  { %3736 = vtanh.f32 %v4892_v11 }
0x128e   :  { %v2524_v49 = vpop.permute.xlu0 %2523  ;;  %3738 = vtanh.f32 %v4900_v0 }
0x128f   :  { %v4902_v16 = vadd.f32 %v2524_v49, %v2460_v13  ;;  %v2522_v36 = vpop.permute.xlu1 %2521 }
0x1290   :  { %v4907_v3 = vadd.f32 %v2522_v36, %v2459_v51 }
0x1291   :  { %3740 = vtanh.f32 %v4902_v16 }
0x1292   :  { %v3729_v58 = vpop.eup %3728  ;;  %3742 = vtanh.f32 %v4907_v3 }
0x1293   :  { %2557 = vrot.lane.b32.xlu0 %v3729_v58, %s3947_s3  ;;  %v3731_v9 = vpop.eup %3730 }
0x1294   :  { %2559 = vrot.lane.b32.xlu1 %v3731_v9, %s3947_s3 }
0x1296   :  { %v3733_v38 = vpop.eup %3732 }
0x1297   :  { %2561 = vrot.lane.b32.xlu0 %v3733_v38, %s3947_s3  ;;  %v3735_v30 = vpop.eup %3734 }
0x1298   :  { %2563 = vrot.lane.b32.xlu1 %v3735_v30, %s3947_s3 }
0x129a   :  { %v3737_v60 = vpop.eup %3736 }
0x129b   :  { %2565 = vrot.lane.b32.xlu0 %v3737_v60, %s3947_s3  ;;  %v3739_v42 = vpop.eup %3738 }
0x129c   :  { %2567 = vrot.lane.b32.xlu1 %v3739_v42, %s3947_s3 }
0x129e   :  { %v3741_v10 = vpop.eup %3740 }
0x129f   :  { %2571 = vrot.lane.b32.xlu0 %v3741_v10, %s3947_s3  ;;  %v3743_v22 = vpop.eup %3742 }
0x12a0   :  { %2569 = vrot.lane.b32.xlu1 %v3743_v22, %s3947_s3 }
0x1305   :  { %v2558_v61 = vpop.permute.xlu0 %2557 }
0x1306   :  { %v2581_v40 = vmul.f32 %v4837_v24, %v2558_v61  ;;  %v2560_v32 = vpop.permute.xlu1 %2559 }
0x1307   :  { %v2582_v50 = vmul.f32 %v4841_v23, %v2560_v32 }
0x1308   :  { %v2597_v4 = vrot.slane %v2581_v40, 6 }
0x1309   :  { %v2562_v33 = vpop.permute.xlu0 %2561  ;;  %v2598_v5 = vrot.slane %v2582_v50, 5 }
0x130a   :  { %v2583_v52 = vmul.f32 %v4843_v57, %v2562_v33  ;;  %v2564_v18 = vpop.permute.xlu1 %2563 }
0x130b   :  { %v2599_v54 = vsel %vm554_vm3, %v2598_v5, %v2597_v4  ;;  %v2584_v63 = vmul.f32 %v4848_v53, %v2564_v18 }
0x130c   :  { %v2600_v1 = vrot.slane %v2583_v52, 4 }
0x130d   :  { %v2566_v47 = vpop.permute.xlu0 %2565  ;;  %v2602_v24 = vrot.slane %v2584_v63, 3 }
0x130e   :  { %v2601_v12 = vsel %vm557_vm4, %v2600_v1, %v2599_v54  ;;  %v2585_v62 = vmul.f32 %v4851_v59, %v2566_v47  ;;  %v2568_v29 = vpop.permute.xlu1 %2567 }
0x130f   :  { %v2586_v23 = vmul.f32 %v4856_v55, %v2568_v29  ;;  %v2603_v6 = vsel %vm560_vm5, %v2602_v24, %v2601_v12 }
0x1310   :  { %v2604_v34 = vrot.slane %v2585_v62, 2 }
0x1311   :  { %v2572_v57 = vpop.permute.xlu0 %2571  ;;  %v2606_v27 = vrot.slane %v2586_v23, 1 }
0x1312   :  { %v2605_v7 = vsel %vm563_vm6, %v2604_v34, %v2603_v6  ;;  %v2588_v17 = vmul.f32 %v4859_v46, %v2572_v57  ;;  %v2570_v58 = vpop.permute.xlu1 %2569 }
0x1313   :  { %v2587_v26 = vmul.f32 %v4864_v37, %v2570_v58  ;;  %v2607_v21 = vsel %vm566_vm7, %v2606_v27, %v2605_v7 }
0x1314   :  { %v2609_v53 = vrot.slane %v2588_v17, 7 }
0x1315   :  { %v2608_v59 = vsel %vm569_vm8, %v2587_v26, %v2607_v21 }
0x1316   :  { %v4932_v13 = vsel %vm572_vm9, %v2609_v53, %v2608_v59 }
0x1317   :  { %2613 = vrot.lane.b32.xlu0 %v4932_v13, %s3948_s13 }
0x1389   :  { %v2614_v55 = vpop.permute.xlu0 %2613 }
0x138a   :  { %3281 = vmatmul.mubr.msk.f32.vlgmr.msra.gmra.mxu1 %vm67_vm0, %v2614_v55 }
0x144a   :  { %v2683_v56 = vpop.f32.mrf.mxu1 }
0x144b   :  { %v2688_v46 = vrot.slane %v2683_v56, 1  ;;  %v2689_v37 = vrot.slane %v2683_v56, 2  ;;  %v2690_v36 = vrot.slane %v2683_v56, 3  ;;  %v2691_v9 = vrot.slane %v2683_v56, 4 }
0x144c   :  { %v3282_v49 = vpop.f32.mrf.mxu1  ;;  %v2692_v30 = vrot.slane %v2683_v56, 5  ;;  %v2693_v42 = vrot.slane %v2683_v56, 6  ;;  %v2694_v22 = vrot.slane %v2683_v56, 7 }
0x144d   :  { %v2703_v51 = vadd.f32 %v2688_v46, %v4053_v19  ;;  %v2704_v38 = vadd.f32 %v2689_v37, %v4058_v25  ;;  %v2705_v60 = vadd.f32 %v2690_v36, %v4064_v31  ;;  %v2706_v10 = vadd.f32 %v2691_v9, %v4060_v28 }
0x144e   :  { %v2707_v61 = vadd.f32 %v2692_v30, %v4070_v39  ;;  %v2708_v19 = vadd.f32 %v2693_v42, %v4067_v35  ;;  %v2709_v32 = vadd.f32 %v2694_v22, %v4075_v44  ;;  %v2710_v25 = vadd.f32 %v2683_v56, %v4072_v41 }
0x144f   :  { %3744 = vtanh.f32 %v2703_v51  ;;  %v3121_v4 = vmul.f32 -1.442695, %v2703_v51  ;;  %v3122_v33 = vmul.f32 -1.442695, %v2704_v38  ;;  %v3123_v52 = vmul.f32 -1.442695, %v2705_v60 }
0x1450   :  { %3746 = vtanh.f32 %v2704_v38  ;;  %v3124_v5 = vmul.f32 -1.442695, %v2706_v10  ;;  %v3125_v18 = vmul.f32 -1.442695, %v2707_v61  ;;  %v3126_v54 = vmul.f32 -1.442695, %v2708_v19 }
0x1451   :  { %3748 = vtanh.f32 %v2705_v60  ;;  %v3127_v63 = vmul.f32 -1.442695, %v2709_v32  ;;  %v3128_v12 = vmul.f32 -1.442695, %v2710_v25 }
0x1452   :  { %3750 = vtanh.f32 %v2706_v10 }
0x1453   :  { %3752 = vtanh.f32 %v2707_v61 }
0x1454   :  { %3754 = vtanh.f32 %v2708_v19 }
0x1455   :  { %3756 = vtanh.f32 %v2709_v32 }
0x1456   :  { %3758 = vtanh.f32 %v2710_v25 }
0x1457   :  { %3760 = vpow2.f32 %v3121_v4 }
0x1458   :  { %3762 = vpow2.f32 %v3122_v33  ;;  %v2776_v33 = vrot.slane %v4879_v2, 7 }
0x1459   :  { %3764 = vpow2.f32 %v3123_v52  ;;  %v2777_v52 = vrot.slane %v4882_v45, 7 }
0x145a   :  { %3766 = vpow2.f32 %v3124_v5 }
0x145b   :  { %3768 = vpow2.f32 %v3125_v18 }
0x145c   :  { %v3745_v40 = vpop.eup %3744  ;;  %3770 = vpow2.f32 %v3126_v54  ;;  %v2778_v54 = vrot.slane %v4889_v43, 7  ;;  %v2781_v43 = vrot.slane %v4907_v3, 7 }
0x145d   :  { %2807 = vrot.lane.b32.xlu1 %v3745_v40, %s3947_s3  ;;  %v3747_v28 = vpop.eup %3746  ;;  %3772 = vpow2.f32 %v3127_v63 }
0x145e   :  { %v3749_v31 = vpop.eup %3748  ;;  %2809 = vrot.lane.b32.xlu0 %v3747_v28, %s3947_s3 }
0x145f   :  { %v3751_v39 = vpop.eup %3750 }
0x1460   :  { %v3753_v50 = vpop.eup %3752 }
0x1461   :  { %2811 = vrot.lane.b32.xlu1 %v3749_v31, %s3947_s3  ;;  %v3755_v35 = vpop.eup %3754 }
0x1462   :  { %2813 = vrot.lane.b32.xlu0 %v3751_v39, %s3947_s3  ;;  %v3757_v44 = vpop.eup %3756 }
0x1463   :  { %v3759_v41 = vpop.eup %3758 }
0x1464   :  { %v3761_v1 = vpop.eup %3760 }
0x1465   :  { %2815 = vrot.lane.b32.xlu1 %v3753_v50, %s3947_s3  ;;  %v2735_v47 = vadd.f32 1.0, %v3761_v1  ;;  %v3763_v62 = vpop.eup %3762 }
0x1466   :  { %2817 = vrot.lane.b32.xlu0 %v3755_v35, %s3947_s3  ;;  %v3765_v24 = vpop.eup %3764  ;;  %v2736_v29 = vadd.f32 1.0, %v3763_v62  ;;  %v2775_v35 = vrot.slane %v4871_v15, 7 }
0x1467   :  { %3774 = vrcp.f32 %v2735_v47  ;;  %v3767_v34 = vpop.eup %3766  ;;  %v2737_v23 = vadd.f32 1.0, %v3765_v24  ;;  %v2779_v47 = vrot.slane %v4892_v11, 7 }
0x1468   :  { %3776 = vpow2.f32 %v3128_v12  ;;  %v3769_v6 = vpop.eup %3768  ;;  %v2738_v57 = vadd.f32 1.0, %v3767_v34  ;;  %v2780_v34 = vrot.slane %v4900_v0, 7  ;;  %v2782_v0 = vrot.slane %v4902_v16, 7 }
0x1469   :  { %2819 = vrot.lane.b32.xlu1 %v3757_v44, %s3947_s3  ;;  %3778 = vrcp.f32 %v2736_v29  ;;  %v3771_v7 = vpop.eup %3770  ;;  %v2739_v17 = vadd.f32 1.0, %v3769_v6 }
0x146a   :  { %2821 = vrot.lane.b32.xlu0 %v3759_v41, %s3947_s3  ;;  %3780 = vrcp.f32 %v2737_v23  ;;  %v3773_v27 = vpop.eup %3772  ;;  %v2740_v53 = vadd.f32 1.0, %v3771_v7 }
0x146b   :  { %3782 = vrcp.f32 %v2738_v57  ;;  %v2741_v59 = vadd.f32 1.0, %v3773_v27 }
0x146c   :  { %3784 = vrcp.f32 %v2739_v17 }
0x146d   :  { %3786 = vrcp.f32 %v2740_v53 }
0x146e   :  { %3788 = vrcp.f32 %v2741_v59 }
0x1474   :  { %v4953_v58 = vpop.eup %3774 }
0x1475   :  { %v3777_v21 = vpop.eup %3776  ;;  %v2791_v44 = vmul.f32 %v4953_v58, %v2775_v35 }
0x1476   :  { %v2742_v56 = vadd.f32 1.0, %v3777_v21  ;;  %v4957_v46 = vpop.eup %3778 }
0x1477   :  { %v4959_v51 = vpop.eup %3780  ;;  %v2792_v5 = vmul.f32 %v4957_v46, %v2776_v33 }
0x1478   :  { %3790 = vrcp.f32 %v2742_v56  ;;  %v4964_v38 = vpop.eup %3782  ;;  %v2793_v1 = vmul.f32 %v4959_v51, %v2777_v52 }
0x1479   :  { %v4967_v60 = vpop.eup %3784  ;;  %v2794_v62 = vmul.f32 %v4964_v38, %v2778_v54 }
0x147a   :  { %v4972_v61 = vpop.eup %3786  ;;  %v2795_v45 = vmul.f32 %v4967_v60, %v2779_v47 }
0x147b   :  { %v4975_v19 = vpop.eup %3788  ;;  %v2796_v27 = vmul.f32 %v4972_v61, %v2780_v34 }
0x147c   :  { %v2797_v21 = vmul.f32 %v4975_v19, %v2781_v43 }
0x1485   :  { %v4980_v31 = vpop.eup %3790 }
0x14cf   :  { %v2808_v26 = vpop.permute.xlu1 %2807 }
0x14d0   :  { %v2831_v55 = vmul.f32 %v4953_v58, %v2808_v26  ;;  %v2810_v49 = vpop.permute.xlu0 %2809 }
0x14d1   :  { %v2832_v37 = vmul.f32 %v4957_v46, %v2810_v49 }
0x14d2   :  { %2847 = vrot.lane.b32.xlu1 %v2831_v55, %s3947_s3 }
0x14d3   :  { %v2812_v36 = vpop.permute.xlu1 %2811  ;;  %2849 = vrot.lane.b32.xlu0 %v2832_v37, %s3947_s3 }
0x14d4   :  { %v2833_v9 = vmul.f32 %v4959_v51, %v2812_v36  ;;  %v2814_v30 = vpop.permute.xlu0 %2813  ;;  %v2798_v36 = vmul.f32 %v4980_v31, %v2782_v0 }
0x14d5   :  { %v2834_v42 = vmul.f32 %v4964_v38, %v2814_v30 }
0x14d6   :  { %2851 = vrot.lane.b32.xlu1 %v2833_v9, %s3947_s3 }
0x14d7   :  { %v2816_v10 = vpop.permute.xlu1 %2815  ;;  %2853 = vrot.lane.b32.xlu0 %v2834_v42, %s3947_s3 }
0x14d8   :  { %v2835_v22 = vmul.f32 %v4967_v60, %v2816_v10  ;;  %v2818_v40 = vpop.permute.xlu0 %2817 }
0x14d9   :  { %v2836_v32 = vmul.f32 %v4972_v61, %v2818_v40 }
0x14da   :  { %2855 = vrot.lane.b32.xlu1 %v2835_v22, %s3947_s3 }
0x14db   :  { %v2820_v25 = vpop.permute.xlu1 %2819  ;;  %2857 = vrot.lane.b32.xlu0 %v2836_v32, %s3947_s3 }
0x14dc   :  { %v2837_v28 = vmul.f32 %v4975_v19, %v2820_v25  ;;  %v2822_v39 = vpop.permute.xlu0 %2821 }
0x14dd   :  { %v2838_v50 = vmul.f32 %v4980_v31, %v2822_v39 }
0x14de   :  { %2859 = vrot.lane.b32.xlu1 %v2837_v28, %s3947_s3 }
0x14df   :  { %2861 = vrot.lane.b32.xlu0 %v2838_v50, %s3947_s3 }
0x1544   :  { %v2848_v41 = vpop.permute.xlu1 %2847 }
0x1545   :  { %v4987_v4 = vadd.f32 %v2848_v41, %v2791_v44  ;;  %v2850_v18 = vpop.permute.xlu0 %2849 }
0x1546   :  { %v2872_v63 = vadd.f32 %v2850_v18, %v2792_v5 }
0x1547   :  { %3792 = vtanh.f32 %v4987_v4 }
0x1548   :  { %v2852_v15 = vpop.permute.xlu1 %2851  ;;  %3794 = vtanh.f32 %v2872_v63  ;;  %v2984_v24 = vrot.slane %v2872_v63, 7 }
0x1549   :  { %v2873_v12 = vadd.f32 %v2852_v15, %v2793_v1  ;;  %v2854_v29 = vpop.permute.xlu0 %2853 }
0x154a   :  { %v2874_v23 = vadd.f32 %v2854_v29, %v2794_v62 }
0x154b   :  { %3796 = vtanh.f32 %v2873_v12  ;;  %v2985_v2 = vrot.slane %v2873_v12, 6 }
0x154c   :  { %v2856_v6 = vpop.permute.xlu1 %2855  ;;  %3798 = vtanh.f32 %v2874_v23  ;;  %v2987_v17 = vrot.slane %v2874_v23, 5 }
0x154d   :  { %v2986_v57 = vsel %vm554_vm3, %v2985_v2, %v2984_v24  ;;  %v2875_v7 = vadd.f32 %v2856_v6, %v2795_v45  ;;  %v2858_v53 = vpop.permute.xlu0 %2857 }
0x154e   :  { %v2876_v59 = vadd.f32 %v2858_v53, %v2796_v27  ;;  %v2988_v3 = vsel %vm557_vm4, %v2987_v17, %v2986_v57 }
0x154f   :  { %3800 = vtanh.f32 %v2875_v7  ;;  %v2989_v26 = vrot.slane %v2875_v7, 4 }
0x1550   :  { %v2860_v55 = vpop.permute.xlu1 %2859  ;;  %3802 = vtanh.f32 %v2876_v59  ;;  %v2991_v37 = vrot.slane %v2876_v59, 3 }
0x1551   :  { %v2990_v56 = vsel %vm560_vm5, %v2989_v26, %v2988_v3  ;;  %v2877_v49 = vadd.f32 %v2860_v55, %v2797_v21  ;;  %v2862_v9 = vpop.permute.xlu0 %2861 }
0x1552   :  { %v2878_v42 = vadd.f32 %v2862_v9, %v2798_v36  ;;  %v2992_v10 = vsel %vm563_vm6, %v2991_v37, %v2990_v56 }
0x1553   :  { %3804 = vtanh.f32 %v2877_v49  ;;  %v2993_v30 = vrot.slane %v2877_v49, 2 }
0x1554   :  { %v3793_v11 = vpop.eup %3792  ;;  %3806 = vtanh.f32 %v2878_v42  ;;  %v2995_v16 = vrot.slane %v2878_v42, 1 }
0x1555   :  { %2895 = vrot.lane.b32.xlu1 %v3793_v11, %s3947_s3  ;;  %v2994_v22 = vsel %vm566_vm7, %v2993_v30, %v2992_v10  ;;  %v3795_v40 = vpop.eup %3794 }
0x1556   :  { %2897 = vrot.lane.b32.xlu0 %v3795_v40, %s3947_s3  ;;  %v5012_v25 = vsel %vm569_vm8, %v2995_v16, %v2994_v22 }
0x1558   :  { %v3797_v32 = vpop.eup %3796 }
0x1559   :  { %2899 = vrot.lane.b32.xlu1 %v3797_v32, %s3947_s3  ;;  %v3799_v28 = vpop.eup %3798 }
0x155a   :  { %2901 = vrot.lane.b32.xlu0 %v3799_v28, %s3947_s3 }
0x155c   :  { %v3801_v39 = vpop.eup %3800 }
0x155d   :  { %2903 = vrot.lane.b32.xlu1 %v3801_v39, %s3947_s3  ;;  %v3803_v50 = vpop.eup %3802 }
0x155e   :  { %2905 = vrot.lane.b32.xlu0 %v3803_v50, %s3947_s3 }
0x1560   :  { %v3805_v35 = vpop.eup %3804 }
0x1561   :  { %2907 = vrot.lane.b32.xlu1 %v3805_v35, %s3947_s3  ;;  %v3807_v44 = vpop.eup %3806 }
0x1562   :  { %2909 = vrot.lane.b32.xlu0 %v3807_v44, %s3947_s3 }
0x1565   :  { %912 = vrot.lane.b32.xlu1 %v4308_v8, %s3949_s14 }
0x1566   :  { %2271 = vrot.lane.b32.xlu0 %v4816_v14, %s3949_s14 }
0x1569   :  { %1592 = vrot.lane.b32.xlu1 %v4568_v20, %s3947_s3 }
0x15c7   :  { %v2896_v41 = vpop.permute.xlu1 %2895 }
0x15c8   :  { %v2919_v33 = vmul.f32 %v4953_v58, %v2896_v41  ;;  %v2898_v52 = vpop.permute.xlu0 %2897 }
0x15c9   :  { %v2920_v5 = vmul.f32 %v4957_v46, %v2898_v52 }
0x15ca   :  { %2966 = vrot.lane.b32.xlu1 %v2919_v33, %s3948_s13  ;;  %v2935_v15 = vrot.slane %v2919_v33, 7 }
0x15cb   :  { %v2900_v18 = vpop.permute.xlu1 %2899  ;;  %v2953_v1 = vrot.slane %v2920_v5, 7  ;;  %v2936_v63 = vrot.slane %v2920_v5, 6 }
0x15cc   :  { %v2921_v8 = vmul.f32 %v4959_v51, %v2900_v18  ;;  %v2902_v54 = vpop.permute.xlu0 %2901 }
0x15cd   :  { %v2922_v20 = vmul.f32 %v4964_v38, %v2902_v54  ;;  %v2937_v46 = vsel %vm554_vm3, %v2936_v63, %v2935_v15 }
0x15ce   :  { %2997 = vrot.lane.b32.xlu1 %v4987_v4, %s3949_s14  ;;  %v2954_v14 = vrot.slane %v2921_v8, 6  ;;  %v2938_v58 = vrot.slane %v2921_v8, 5 }
0x15cf   :  { %v2904_v47 = vpop.permute.xlu1 %2903  ;;  %v2956_v4 = vrot.slane %v2922_v20, 5  ;;  %v2940_v2 = vrot.slane %v2922_v20, 4 }
0x15d0   :  { %v2955_v12 = vsel %vm554_vm3, %v2954_v14, %v2953_v1  ;;  %v2923_v62 = vmul.f32 %v4967_v60, %v2904_v47  ;;  %v2906_v24 = vpop.permute.xlu0 %2905  ;;  %v2939_v23 = vsel %vm557_vm4, %v2938_v58, %v2937_v46 }
0x15d1   :  { %v2924_v51 = vmul.f32 %v4972_v61, %v2906_v24  ;;  %v2957_v45 = vsel %vm557_vm4, %v2956_v4, %v2955_v12  ;;  %v2941_v17 = vsel %vm560_vm5, %v2940_v2, %v2939_v23 }
0x15d2   :  { %v2958_v29 = vrot.slane %v2923_v62, 4  ;;  %v2942_v38 = vrot.slane %v2923_v62, 3 }
0x15d3   :  { %v2908_v34 = vpop.permute.xlu1 %2907  ;;  %v2960_v57 = vrot.slane %v2924_v51, 3  ;;  %v2944_v11 = vrot.slane %v2924_v51, 2 }
0x15d4   :  { %v2959_v6 = vsel %vm560_vm5, %v2958_v29, %v2957_v45  ;;  %v2925_v43 = vmul.f32 %v4975_v19, %v2908_v34  ;;  %v2910_v60 = vpop.permute.xlu0 %2909  ;;  %v2943_v26 = vsel %vm563_vm6, %v2942_v38, %v2941_v17 }
0x15d5   :  { %v2926_v61 = vmul.f32 %v4980_v31, %v2910_v60  ;;  %v2961_v53 = vsel %vm563_vm6, %v2960_v57, %v2959_v6  ;;  %v2945_v55 = vsel %vm566_vm7, %v2944_v11, %v2943_v26 }
0x15d6   :  { %v2962_v7 = vrot.slane %v2925_v43, 2  ;;  %v2946_v21 = vrot.slane %v2925_v43, 1 }
0x15d7   :  { %v913_v27 = vpop.permute.xlu1 %912  ;;  %v2964_v0 = vrot.slane %v2926_v61, 1 }
0x15d8   :  { %916 = vst.msk [vmem:[#allocation8] sm:$0xff] %vm915_vm10, %v913_v27  ;;  %v2963_v19 = vsel %vm566_vm7, %v2962_v7, %v2961_v53  ;;  %v2272_v59 = vpop.permute.xlu0 %2271  ;;  %v2947_v56 = vsel %vm569_vm8, %v2946_v21, %v2945_v55 }
0x15d9   :  { %1255 = vst.msk [vmem:[#allocation8] sm:$0xff] %vm1254_vm11, %v4434_v48  ;;  %v2965_v31 = vsel %vm569_vm8, %v2964_v0, %v2963_v19  ;;  %v2948_v48 = vsel %vm572_vm9, %v2926_v61, %v2947_v56 }
0x15da   :  { %2274 = vst.msk [vmem:[#allocation8 + $0x8] sm:$0xff] %vm915_vm10, %v2272_v59  ;;  %2968 = vrot.lane.b32.xlu0 %v2965_v31, %s3948_s13 }
0x15db   :  { %v1593_v3 = vpop.permute.xlu1 %1592  ;;  %2612 = vst.msk [vmem:[#allocation8 + $0x8] sm:$0xff] %vm1254_vm11, %v4932_v13 }
0x15dc   :  { %1596 = vst.msk [vmem:[#allocation8] sm:$0xff] %vm1595_vm12, %v1593_v3 }
0x15de   :  { %2949 = vrot.lane.b32.xlu0 %v2948_v48, %s3947_s3 }
0x15e2   :  { %2999 = vrot.lane.b32.xlu0 %v5012_v25, %s3949_s14 }
0x163c   :  { %v2967_v49 = vpop.permute.xlu1 %2966 }
0x163d   :  { %2973 = vst.msk [vmem:[#allocation9 - $0x7] sm:$0x80] %vm2972_vm13, %v2967_v49 }
0x1640   :  { %v2998_v37 = vpop.permute.xlu1 %2997 }
0x1641   :  { %3003 = vst.msk [vmem:[#allocation11 - $0x7] sm:$0x80] %vm2972_vm13, %v2998_v37 }
0x164c   :  { %v2969_v36 = vpop.permute.xlu0 %2968 }
0x164d   :  { %2975 = vst.msk [vmem:[#allocation9 + $0x1] sm:$0x7f] %vm2974_vm14, %v2969_v36 }
0x164e   :  { %3883 = shalt.err (!%p3880_p5)
}
0x164f   :  { %3024 = dma.vmem_to_hbm [thread:$0]  %s3022_s16, 128, %s5078_s5, [#allocation10]  }
0x1650   :  { %v2950_v13 = vpop.permute.xlu0 %2949  ;;  %s3952_s22 = smov [#allocation11]   ;;  %s3892_s24 = scalar_lea.vmem %s3012_s18, 256 }
0x1651   :  { %s3031_s23 = sshll.u32 %s3952_s22, 4  ;;  %2952 = vst.msk [vmem:[#allocation8 + $0x8] sm:$0xff] %vm1595_vm12, %v2950_v13  ;;  %p3893_p6 = scmp.ne.s32.totalorder %s3012_s18, %s3892_s24  ;;  %s3032_s23 = int_to_ptr.vmem [resolvable:$true] %s3031_s23 }
0x1652   :  { %p3897_p7 = scmp.lt.s32.totalorder %s3012_s18, %s3012_s18  ;;  %p3898_p8 = scmp.lt.s32.totalorder %s3892_s24, %s3892_s24 }
0x1654   :  { %p3899_p9 = por %p3898_p8, %p3897_p7 }
0x1656   :  { %p3900_p10 = pnand %p3899_p9, %p3893_p6 }
0x1658   :  { %3903 = shalt.err (!%p3900_p10)
}
0x1659   :  { %3014 = dma.vmem_to_hbm [thread:$0]  %s3012_s18, 256, %s5077_s4, [#allocation4]   ;;  %v3000_v9 = vpop.permute.xlu0 %2999 }
0x165a   :  { %3004 = vst.msk [vmem:[#allocation11 + $0x1] sm:$0x7f] %vm2974_vm14, %v3000_v9  ;;  %s3912_s5 = scalar_lea.vmem %s3032_s23, 128  ;;  %p3917_p12 = scmp.lt.s32.totalorder %s3032_s23, %s3032_s23 }
0x165b   :  { %p3913_p11 = scmp.ne.s32.totalorder %s3032_s23, %s3912_s5  ;;  %p3918_p13 = scmp.lt.s32.totalorder %s3912_s5, %s3912_s5 }
0x165d   :  { %p3919_p0 = por %p3918_p13, %p3917_p12 }
0x165f   :  { %p3920_p1 = pnand %p3919_p0, %p3913_p11 }
0x1661   :  { %3923 = shalt.err (!%p3920_p1)
}
0x1662   :  { %3034 = dma.vmem_to_hbm [thread:$0]  %s3032_s23, 128, %s5079_s6, [#allocation10]  }
0x1663   :  { %3936 = dma.done.wait [#allocation4], 256  }
0x1664   :  { %3937 = vsyncadd [#allocation4], 4294967040 }
0x1665   :  { %3938 = dma.done.wait [#allocation10], 256  }
0x1666   :  { %3939 = vsyncadd [#allocation10], 4294967040 }
0x1667   :  { %3044 = vsyncpa [#allocation3], 1 }
0x1668   :  { %3045 = vsyncpa [#allocation6], 1 }
0x1669   :  { %3046 = vsyncpa [#allocation4], 1 }
0x166a   :  { %3047 = vsyncpa [#allocation10], 1 }

</bundles_post_ra>
